<compile_context>
chip_gen: v5e
topology: v5e:2x2
jax: 0.10.0
libtpu: 0.0.40
codegen_flags: <defaults>
</compile_context>

<pallas_src>
import math
from functools import partial

import numpy as np
import jax
import jax.numpy as jnp
from jax.experimental import pallas as pl
from jax.experimental.pallas import tpu as pltpu

# ----------------------------- model dimensions ------------------------------
B = 2                 # image batch == number of prompts (cross path needs pairs)
D = H = W = 16        # small synthetic 3-D volume
PATCH = 8
G = D // PATCH        # 2 -> image-embedding grid 2x2x2
T_IMG = G ** 3        # 8 image tokens
C = 32                # embedding dim
HEADS = 2
DH = C // HEADS
MLP_HID = 64
NUM_MASK_TOKENS = 4
MASK_THRESHOLD = 0.5


# ========================== in-kernel helper functions =======================
def _ln_rows(x, w_row, b_row):
    mu = jnp.mean(x, axis=-1, keepdims=True)
    var = jnp.mean((x - mu) ** 2, axis=-1, keepdims=True)
    return (x - mu) * jax.lax.rsqrt(var + 1e-5) * w_row + b_row


def _mha_heads(q2d, k2d, v2d, bn, tq, tk):
    """Multi-head attention on flattened (bn*t, C) activations.

    Unrolled over (batch, head) pairs with static 2-D slices so everything
    stays 2-D inside the kernel (no 4-D transposes, no extra launches).
    """
    scale = 1.0 / math.sqrt(DH)
    batch_outs = []
    for b in range(bn):
        head_outs = []
        for h in range(HEADS):
            qb = q2d[b * tq:(b + 1) * tq, h * DH:(h + 1) * DH]
            kb = k2d[b * tk:(b + 1) * tk, h * DH:(h + 1) * DH]
            vb = v2d[b * tk:(b + 1) * tk, h * DH:(h + 1) * DH]
            s = jax.lax.dot_general(qb, kb, (((1,), (1,)), ((), ())),
                                    preferred_element_type=jnp.float32) * scale
            s = s - jnp.max(s, axis=-1, keepdims=True)
            p = jnp.exp(s)
            p = p * pl.reciprocal(jnp.sum(p, axis=-1, keepdims=True), approx=True)
            head_outs.append(jnp.dot(p, vb, preferred_element_type=jnp.float32))
        batch_outs.append(jnp.concatenate(head_outs, axis=1))
    return jnp.concatenate(batch_outs, axis=0)


# ============================== Pallas kernels ===============================
def _encoder_kernel(patch_ref, pos_ref, pew_ref, peb_ref, aw_ref, ab_ref,
                    lnw_ref, lnb_ref, m1w_ref, m1b_ref, m2w_ref, m2b_ref,
                    cmw_ref, cmb_ref, o_ref, *, bn, t):
    """Fused tiny-ViT image encoder: patch-embed -> +pos -> pre-LN attn -> pre-LN MLP -> channel mapper."""
    x = jnp.dot(patch_ref[...], pew_ref[...], preferred_element_type=jnp.float32) + peb_ref[...]
    x = x + pos_ref[...]

    # attention (pre-LN)
    hh = _ln_rows(x, lnw_ref[0:1, :], lnb_ref[0:1, :])
    q = jnp.dot(hh, aw_ref[0], preferred_element_type=jnp.float32) + ab_ref[0:1, :]
    k = jnp.dot(hh, aw_ref[1], preferred_element_type=jnp.float32) + ab_ref[1:2, :]
    v = jnp.dot(hh, aw_ref[2], preferred_element_type=jnp.float32) + ab_ref[2:3, :]
    a = _mha_heads(q, k, v, bn, t, t)
    a = jnp.dot(a, aw_ref[3], preferred_element_type=jnp.float32) + ab_ref[3:4, :]
    x = x + a

    # MLP (pre-LN)
    hh = _ln_rows(x, lnw_ref[1:2, :], lnb_ref[1:2, :])
    hh = jax.nn.gelu(jnp.dot(hh, m1w_ref[...], preferred_element_type=jnp.float32) + m1b_ref[...],
                     approximate=True)
    hh = jnp.dot(hh, m2w_ref[...], preferred_element_type=jnp.float32) + m2b_ref[...]
    x = x + hh

    o_ref[...] = jnp.dot(x, cmw_ref[...], preferred_element_type=jnp.float32) + cmb_ref[...]


def _decoder_kernel(tok_ref, src_ref, pos_ref, aw_ref, ab_ref,
                    m1w_ref, m1b_ref, m2w_ref, m2b_ref, lnw_ref, lnb_ref,
                    tok_out, src_out, *, bn, tt, ts):
    """Fused two-way decoder transformer block (all attentions / MLP / 5 LNs in one call)."""
    def proj(x, i):
        return jnp.dot(x, aw_ref[i], preferred_element_type=jnp.float32) + ab_ref[i:i + 1, :]

    def ln(x, i):
        return _ln_rows(x, lnw_ref[i:i + 1, :], lnb_ref[i:i + 1, :])

    def attn(qx, kx, vx, base, tq, tk):
        o = _mha_heads(proj(qx, base), proj(kx, base + 1), proj(vx, base + 2), bn, tq, tk)
        return proj(o, base + 3)

    tok = tok_ref[...]
    src = src_ref[...]
    pos = pos_ref[...]
    srcpos = src + pos

    tok = tok + attn(tok, tok, tok, 0, tt, tt)          # token self-attention
    tok = ln(tok, 0)
    tok = tok + attn(tok, srcpos, src, 4, tt, ts)       # token -> image cross-attention
    tok = ln(tok, 1)
    hh = jax.nn.gelu(jnp.dot(tok, m1w_ref[...], preferred_element_type=jnp.float32) + m1b_ref[...],
                     approximate=True)
    hh = jnp.dot(hh, m2w_ref[...], preferred_element_type=jnp.float32) + m2b_ref[...]
    tok = ln(tok + hh, 2)
    src2 = src + attn(srcpos, tok, tok, 8, ts, tt)      # image -> token cross-attention
    src2 = ln(src2, 3)
    tok = tok + attn(tok, src2 + pos, src2, 12, tt, ts)  # final token -> image attention
    tok = ln(tok, 4)

    tok_out[...] = tok
    src_out[...] = src2


def _decoder_head_kernel(tok_ref, src_ref, upw_ref, upb_ref,
                         hw1_ref, hb1_ref, hw2_ref, hb2_ref,
                         i1w_ref, i1b_ref, i2w_ref, i2b_ref,
                         masks_out, iou_out, *, bn, tt, ts):
    """Fused decoder heads: upscale linear + per-token hypernetwork MLPs + mask bmm + IoU MLP."""
    tok = tok_ref[...]
    src = src_ref[...]
    up = jax.nn.gelu(jnp.dot(src, upw_ref[...], preferred_element_type=jnp.float32) + upb_ref[...],
                     approximate=True)                          # (bn*ts, C//4)
    mask_rows = []
    iou_rows = []
    for b in range(bn):
        up_b = up[b * ts:(b + 1) * ts, :]
        iou_tok = tok[b * tt:b * tt + 1, :]
        for i in range(NUM_MASK_TOKENS):
            mt = tok[b * tt + 1 + i:b * tt + 2 + i, :]
            hh = jnp.maximum(jnp.dot(mt, hw1_ref[i], preferred_element_type=jnp.float32)
                             + hb1_ref[i:i + 1, :], 0.0)
            hi = jnp.dot(hh, hw2_ref[i], preferred_element_type=jnp.float32) + hb2_ref[i:i + 1, :]
            mask_rows.append(jax.lax.dot_general(hi, up_b, (((1,), (1,)), ((), ())),
                                                 preferred_element_type=jnp.float32))
        hiou = jnp.maximum(jnp.dot(iou_tok, i1w_ref[...], preferred_element_type=jnp.float32)
                           + i1b_ref[...], 0.0)
        iou_rows.append(jnp.dot(hiou, i2w_ref[...], preferred_element_type=jnp.float32) + i2b_ref[...])
    masks_out[...] = jnp.concatenate(mask_rows, axis=0)          # (bn*NUM_MASK_TOKENS, ts)
    iou_out[...] = jnp.concatenate(iou_rows, axis=0)             # (bn, NUM_MASK_TOKENS)


def _cpp_kernel(x_ref, w1_ref, b1_ref, w2_ref, b2_ref, w3_ref, b3_ref, o_ref):
    """Fused cpp stack (threshold + 3 point-wise layers), channels-on-sublane / voxels-on-lane."""
    x = x_ref[...]                                              # (8, TN): rows = [img, mask_logits, crossed, 0...]
    mask_bin = (x[1:2, :] > MASK_THRESHOLD).astype(jnp.float32)  # fused (masks > threshold)
    xin = jnp.concatenate([x[0:1, :], mask_bin, x[2:, :]], axis=0)
    hh = jnp.maximum(jnp.dot(w1_ref[...], xin, preferred_element_type=jnp.float32) + b1_ref[...], 0.0)
    hh = jnp.maximum(jnp.dot(w2_ref[...], hh, preferred_element_type=jnp.float32) + b2_ref[...], 0.0)
    o_ref[...] = jnp.dot(w3_ref[...], hh, preferred_element_type=jnp.float32) + b3_ref[...]


# =========================== parameter construction ==========================
def init_params(key):
    keys = iter(jax.random.split(key, 64))

    def nrm(shape, std=0.02):
        return jax.random.normal(next(keys), shape, jnp.float32) * std

    def lin(i, o):
        # trunc_normal_(std=0.02) approximated with normal * 0.02, bias = 0
        return {"w": nrm((i, o)), "b": jnp.zeros((o,), jnp.float32)}

    p = {
        # --- image encoder (tiny ViT stand-in) ---
        "patch_embed": lin(PATCH ** 3, C),
        "pos_embed": nrm((T_IMG, C)),
        "enc_attn_w": nrm((4, C, C)),                 # [q, k, v, proj]
        "enc_attn_b": jnp.zeros((4, C), jnp.float32),
        "enc_ln_w": jnp.ones((2, C), jnp.float32),
        "enc_ln_b": jnp.zeros((2, C), jnp.float32),
        "enc_mlp1": lin(C, MLP_HID),
        "enc_mlp2": lin(MLP_HID, C),
        "channel_mapper": lin(C, C),
        # --- prompt encoder ---
        "pe_gaussian": jax.random.normal(next(keys), (3, C // 2), jnp.float32),
        "point_embed": nrm((4, C)),
        "no_mask_embed": nrm((C,)),
        # --- mask decoder (one two-way block) ---
        "iou_token": nrm((1, C)),
        "mask_tokens": nrm((NUM_MASK_TOKENS, C)),
        "dec_attn_w": nrm((16, C, C)),                # [self q,k,v,proj | t2i | i2t | final]
        "dec_attn_b": jnp.zeros((16, C), jnp.float32),
        "dec_mlp1": lin(C, MLP_HID),
        "dec_mlp2": lin(MLP_HID, C),
        "dec_ln_w": jnp.ones((5, C), jnp.float32),
        "dec_ln_b": jnp.zeros((5, C), jnp.float32),
        "upscale": lin(C, C // 4),
        "hyper_w1": nrm((NUM_MASK_TOKENS, C, C)),
        "hyper_b1": jnp.zeros((NUM_MASK_TOKENS, C), jnp.float32),
        "hyper_w2": nrm((NUM_MASK_TOKENS, C, C // 4)),
        "hyper_b2": jnp.zeros((NUM_MASK_TOKENS, C // 4), jnp.float32),
        "iou_head1": lin(C, C),
        "iou_head2": lin(C, NUM_MASK_TOKENS),
        # --- cpp predictor (point-wise conv stack stand-in), channels-on-sublane layout ---
        # weight1 is (16, 3) zero-padded to (16, 8) so the contraction dim is a full sublane tile
        "cpp_w1": jnp.concatenate([nrm((16, 3)), jnp.zeros((16, 5), jnp.float32)], axis=1),
        "cpp_b1": jnp.zeros((16, 1), jnp.float32),
        "cpp_w2": nrm((16, 16)),
        "cpp_b2": jnp.zeros((16, 1), jnp.float32),
        "cpp_w3": nrm((1, 16)),
        "cpp_b3": jnp.zeros((1, 1), jnp.float32),
    }
    return p


# ============================ model sub-components ===========================
def image_encoder(p, image):
    """Tiny ViT: single fused Pallas kernel for the whole encoder."""
    bn = image.shape[0]
    x = image.reshape(bn, 1, G, PATCH, G, PATCH, G, PATCH)
    x = x.transpose(0, 2, 4, 6, 1, 3, 5, 7).reshape(bn * T_IMG, PATCH ** 3)
    pos2d = jnp.tile(p["pos_embed"], (bn, 1))
    emb2d = pl.pallas_call(
        partial(_encoder_kernel, bn=bn, t=T_IMG),
        out_shape=jax.ShapeDtypeStruct((bn * T_IMG, C), jnp.float32),
    )(x, pos2d,
      p["patch_embed"]["w"], p["patch_embed"]["b"].reshape(1, -1),
      p["enc_attn_w"], p["enc_attn_b"],
      p["enc_ln_w"], p["enc_ln_b"],
      p["enc_mlp1"]["w"], p["enc_mlp1"]["b"].reshape(1, -1),
      p["enc_mlp2"]["w"], p["enc_mlp2"]["b"].reshape(1, -1),
      p["channel_mapper"]["w"], p["channel_mapper"]["b"].reshape(1, -1))
    return emb2d.reshape(bn, T_IMG, C).transpose(0, 2, 1).reshape(bn, C, G, G, G)


def _pe_encoding(coords01, gaussian):
    proj = 2.0 * jnp.pi * (coords01 @ gaussian)
    return jnp.concatenate([jnp.sin(proj), jnp.cos(proj)], axis=-1)


def prompt_encoder(p, point_coords, point_labels):
    bn = point_coords.shape[0]
    coords01 = point_coords / jnp.array([W, H, D], jnp.float32)
    pe = _pe_encoding(coords01, p["pe_gaussian"])                       # (B, N, C)
    lbl_idx = jnp.where(point_labels < 0, 2, jnp.clip(point_labels, 0, 3))
    sparse = pe + p["point_embed"][lbl_idx]
    pad = jnp.broadcast_to(p["point_embed"][2][None, None], (bn, 1, C))  # not-a-point padding
    sparse = jnp.concatenate([sparse, pad], axis=1)                     # (B, N+1, C)
    dense = jnp.broadcast_to(p["no_mask_embed"][None, :, None, None, None], (bn, C, G, G, G))
    return sparse, dense


def get_dense_pe(p):
    g = (jnp.arange(G, dtype=jnp.float32) + 0.5) / G
    zz, yy, xx = jnp.meshgrid(g, g, g, indexing="ij")
    coords = jnp.stack([xx, yy, zz], axis=-1).reshape(-1, 3)
    pe = _pe_encoding(coords, p["pe_gaussian"])                         # (G^3, C)
    return pe.T.reshape(1, C, G, G, G)


def mask_decoder(p, image_embeddings, image_pe, sparse, dense, multimask_output):
    bn = sparse.shape[0]
    out_tokens = jnp.concatenate([p["iou_token"], p["mask_tokens"]], axis=0)   # (5, C)
    tokens = jnp.concatenate(
        [jnp.broadcast_to(out_tokens[None], (bn, 1 + NUM_MASK_TOKENS, C)), sparse], axis=1)
    tt = tokens.shape[1]

    src = (image_embeddings + dense).reshape(bn, C, -1).transpose(0, 2, 1)     # (B, Ts, C)
    ts = src.shape[1]
    pos = jnp.broadcast_to(image_pe.reshape(1, C, -1).transpose(0, 2, 1), src.shape)

    # ---- fused two-way transformer (one pallas_call) ----
    tok2d, src2d = pl.pallas_call(
        partial(_decoder_kernel, bn=bn, tt=tt, ts=ts),
        out_shape=(jax.ShapeDtypeStruct((bn * tt, C), jnp.float32),
                   jax.ShapeDtypeStruct((bn * ts, C), jnp.float32)),
    )(tokens.reshape(bn * tt, C), src.reshape(bn * ts, C), pos.reshape(bn * ts, C),
      p["dec_attn_w"], p["dec_attn_b"],
      p["dec_mlp1"]["w"], p["dec_mlp1"]["b"].reshape(1, -1),
      p["dec_mlp2"]["w"], p["dec_mlp2"]["b"].reshape(1, -1),
      p["dec_ln_w"], p["dec_ln_b"])

    # ---- fused decoder heads (one pallas_call) ----
    masks_low2d, iou_pred = pl.pallas_call(
        partial(_decoder_head_kernel, bn=bn, tt=tt, ts=ts),
        out_shape=(jax.ShapeDtypeStruct((bn * NUM_MASK_TOKENS, ts), jnp.float32),
                   jax.ShapeDtypeStruct((bn, NUM_MASK_TOKENS), jnp.float32)),
    )(tok2d, src2d,
      p["upscale"]["w"], p["upscale"]["b"].reshape(1, -1),
      p["hyper_w1"], p["hyper_b1"], p["hyper_w2"], p["hyper_b2"],
      p["iou_head1"]["w"], p["iou_head1"]["b"].reshape(1, -1),
      p["iou_head2"]["w"], p["iou_head2"]["b"].reshape(1, -1))

    masks_low = masks_low2d.reshape(bn, NUM_MASK_TOKENS, G, G, G)
    # TODO(synk): SAM upsamples via ConvTranspose3d; trilinear resize glue here.
    high_res = jax.image.resize(masks_low, (bn, NUM_MASK_TOKENS, D, H, W), method="trilinear")

    if multimask_output:
        return high_res[:, 1:], iou_pred[:, 1:]
    return high_res[:, :1], iou_pred[:, :1]


def cpp_predictor(p, images, masks_raw, images_crossed):
    # TODO(synk): full MONAI 3-D residual UNet replaced by a point-wise conv stack.
    k = images.shape[0]
    nv = k * D * H * W
    # channels-on-sublane, voxels-on-lane layout, padded to 8 sublanes
    x = jnp.concatenate([images.reshape(1, nv),
                         masks_raw.reshape(1, nv),          # raw logits; threshold fused in kernel
                         images_crossed.reshape(1, nv),
                         jnp.zeros((5, nv), jnp.float32)], axis=0)      # (8, nv)
    tn = 2048 if nv % 2048 == 0 else nv
    out = pl.pallas_call(
        _cpp_kernel,
        out_shape=jax.ShapeDtypeStruct((1, nv), jnp.float32),
        grid=(nv // tn,),
        in_specs=[pl.BlockSpec((8, tn), lambda i: (0, i)),
                  pl.BlockSpec((16, 8), lambda i: (0, 0)),
                  pl.BlockSpec((16, 1), lambda i: (0, 0)),
                  pl.BlockSpec((16, 16), lambda i: (0, 0)),
                  pl.BlockSpec((16, 1), lambda i: (0, 0)),
                  pl.BlockSpec((1, 16), lambda i: (0, 0)),
                  pl.BlockSpec((1, 1), lambda i: (0, 0))],
        out_specs=pl.BlockSpec((1, tn), lambda i: (0, i)),
        compiler_params=pltpu.CompilerParams(dimension_semantics=("parallel",)),
    )(x, p["cpp_w1"], p["cpp_b1"], p["cpp_w2"], p["cpp_b2"], p["cpp_w3"], p["cpp_b3"])
    return out.reshape(k, 1, D, H, W)


# ================================ Sam.forward ================================
@partial(jax.jit, static_argnames=("multimask_output",))
def _sam_single(params, image, point_coords, point_labels, multimask_output):
    emb = image_encoder(params, image)
    sparse, dense = prompt_encoder(params, point_coords, point_labels)
    image_pe = get_dense_pe(params)
    return mask_decoder(params, emb, image_pe, sparse, dense, multimask_output)


@jax.jit
def _cpp_cross(params, images, masks_raw, images_crossed):
    return cpp_predictor(params, images, masks_raw, images_crossed)


def sam_forward(params, batched_input, multimask_output):
    outputs = []
    for rec in batched_input:
        image = rec["image"]                                    # (B, 1, D, H, W)
        high_res_masks, iou_pred = _sam_single(params, image, rec["point_coords"],
                                               rec["point_labels"],
                                               multimask_output=multimask_output)

        heatmap_cross = None
        cross_supports = np.asarray(rec["cross_supports"])
        idx_np = np.where(cross_supports == 1)[0]
        if idx_np.shape[0] > 0:
            idx = jnp.asarray(idx_np)
            k = idx_np.shape[0]
            perm_np = np.arange(k)
            perm_np[0::2], perm_np[1::2] = np.arange(k)[1::2].copy(), np.arange(k)[0::2].copy()
            perm = jnp.asarray(perm_np)
            images = image[idx]                                 # (K, 1, D, H, W)
            images_crossed = images[perm]
            masks_sel = high_res_masks[idx]                     # raw logits; thresholded inside kernel
            cpp_out = _cpp_cross(params, images, masks_sel, images_crossed)
            heatmap_cross = cpp_out[perm]

        outputs.append({"masks": high_res_masks,
                        "heatmap_cross": heatmap_cross,
                        "iou_predictions": iou_pred})
    return outputs


# ==================================== main ===================================
if __name__ == "__main__":
    key = jax.random.PRNGKey(0)
    pkey, ikey, ckey = jax.random.split(key, 3)
    params = init_params(pkey)

    image = jax.random.normal(ikey, (B, 1, D, H, W), jnp.float32)
    point_coords = jax.random.uniform(ckey, (B, 1, 3), minval=0.0, maxval=float(D))
    point_labels = jnp.ones((B, 1), jnp.int32)

    batched_input = [{
        "image": image,
        "point_coords": point_coords,
        "point_labels": point_labels,
        "cross_supports": np.array([1, 1], dtype=np.int32),
    }]

    outs = sam_forward(params, batched_input, multimask_output=False)
    for o in outs:
        jax.block_until_ready(o["masks"])
        jax.block_until_ready(o["iou_predictions"])
        if o["heatmap_cross"] is not None:
            jax.block_until_ready(o["heatmap_cross"])

    assert outs[0]["masks"].shape == (B, 1, D, H, W)
    assert outs[0]["iou_predictions"].shape == (B, 1)
    assert outs[0]["heatmap_cross"].shape == (B, 1, D, H, W)
    print("KERNEL_OK")
</pallas_src>

<mosaic_0001>
module attributes {stable_mosaic.version = 11 : i64} {
  func.func @_encoder_kernel(%arg0: memref<16x512xf32, #tpu.memory_space<vmem>>, %arg1: memref<16x32xf32, #tpu.memory_space<vmem>>, %arg2: memref<512x32xf32, #tpu.memory_space<vmem>>, %arg3: memref<1x32xf32, #tpu.memory_space<vmem>>, %arg4: memref<4x32x32xf32, #tpu.memory_space<vmem>>, %arg5: memref<4x32xf32, #tpu.memory_space<vmem>>, %arg6: memref<2x32xf32, #tpu.memory_space<vmem>>, %arg7: memref<2x32xf32, #tpu.memory_space<vmem>>, %arg8: memref<32x64xf32, #tpu.memory_space<vmem>>, %arg9: memref<1x64xf32, #tpu.memory_space<vmem>>, %arg10: memref<64x32xf32, #tpu.memory_space<vmem>>, %arg11: memref<1x32xf32, #tpu.memory_space<vmem>>, %arg12: memref<32x32xf32, #tpu.memory_space<vmem>>, %arg13: memref<1x32xf32, #tpu.memory_space<vmem>>, %arg14: memref<16x32xf32, #tpu.memory_space<vmem>>) attributes {dimension_semantics = [], scalar_prefetch = 0 : i64, scratch_operands = 0 : i64, tpu.core_type = #tpu.core_type<tc>} {
    %c0 = arith.constant 0 : index
    %c0_0 = arith.constant 0 : index
    %0 = vector.load %arg0[%c0, %c0_0] : memref<16x512xf32, #tpu.memory_space<vmem>>, vector<16x512xf32>
    %c0_1 = arith.constant 0 : index
    %c0_2 = arith.constant 0 : index
    %1 = vector.load %arg2[%c0_1, %c0_2] : memref<512x32xf32, #tpu.memory_space<vmem>>, vector<512x32xf32>
    %cst = arith.constant dense<0.000000e+00> : vector<16x32xf32>
    %2 = tpu.matmul %0, %1, %cst {dimension_numbers = #tpu.dot_dimension_numbers<[1], [0], [0], [1], [0, 0, 1, 1], [], []>} : vector<16x512xf32>, vector<512x32xf32>, vector<16x32xf32> -> vector<16x32xf32>
    %c0_3 = arith.constant 0 : index
    %c0_4 = arith.constant 0 : index
    %3 = vector.load %arg3[%c0_3, %c0_4] : memref<1x32xf32, #tpu.memory_space<vmem>>, vector<1x32xf32>
    %4 = vector.broadcast %3 : vector<1x32xf32> to vector<16x32xf32>
    %5 = arith.addf %2, %4 : vector<16x32xf32>
    %c0_5 = arith.constant 0 : index
    %c0_6 = arith.constant 0 : index
    %6 = vector.load %arg1[%c0_5, %c0_6] : memref<16x32xf32, #tpu.memory_space<vmem>>, vector<16x32xf32>
    %7 = arith.addf %5, %6 : vector<16x32xf32>
    %c0_7 = arith.constant 0 : index
    %c0_8 = arith.constant 0 : index
    %8 = vector.load %arg6[%c0_7, %c0_8] : memref<2x32xf32, #tpu.memory_space<vmem>>, vector<1x32xf32>
    %c0_9 = arith.constant 0 : index
    %c0_10 = arith.constant 0 : index
    %9 = vector.load %arg7[%c0_9, %c0_10] : memref<2x32xf32, #tpu.memory_space<vmem>>, vector<1x32xf32>
    %cst_11 = arith.constant dense<0.000000e+00> : vector<16xf32>
    %10 = vector.multi_reduction <add>, %7, %cst_11 [1] : vector<16x32xf32> to vector<16xf32>
    %11 = vector.shape_cast %10 : vector<16xf32> to vector<16x1xf32>
    %cst_12 = arith.constant 3.200000e+01 : f32
    %12 = vector.broadcast %cst_12 : f32 to vector<16x1xf32>
    %13 = arith.divf %11, %12 : vector<16x1xf32>
    %14 = vector.broadcast %13 : vector<16x1xf32> to vector<16x32xf32>
    %15 = arith.subf %7, %14 : vector<16x32xf32>
    %16 = arith.mulf %15, %15 : vector<16x32xf32>
    %cst_13 = arith.constant dense<0.000000e+00> : vector<16xf32>
    %17 = vector.multi_reduction <add>, %16, %cst_13 [1] : vector<16x32xf32> to vector<16xf32>
    %18 = vector.shape_cast %17 : vector<16xf32> to vector<16x1xf32>
    %cst_14 = arith.constant 3.200000e+01 : f32
    %19 = vector.broadcast %cst_14 : f32 to vector<16x1xf32>
    %20 = arith.divf %18, %19 : vector<16x1xf32>
    %21 = vector.broadcast %13 : vector<16x1xf32> to vector<16x32xf32>
    %22 = arith.subf %7, %21 : vector<16x32xf32>
    %cst_15 = arith.constant 9.99999974E-6 : f32
    %23 = vector.broadcast %cst_15 : f32 to vector<16x1xf32>
    %24 = arith.addf %20, %23 : vector<16x1xf32>
    %25 = math.rsqrt %24 : vector<16x1xf32>
    %26 = vector.broadcast %25 : vector<16x1xf32> to vector<16x32xf32>
    %27 = arith.mulf %22, %26 : vector<16x32xf32>
    %28 = vector.broadcast %8 : vector<1x32xf32> to vector<16x32xf32>
    %29 = arith.mulf %27, %28 : vector<16x32xf32>
    %30 = vector.broadcast %9 : vector<1x32xf32> to vector<16x32xf32>
    %31 = arith.addf %29, %30 : vector<16x32xf32>
    %c0_16 = arith.constant 0 : index
    %c0_17 = arith.constant 0 : index
    %c0_18 = arith.constant 0 : index
    %32 = vector.load %arg4[%c0_16, %c0_17, %c0_18] : memref<4x32x32xf32, #tpu.memory_space<vmem>>, vector<1x32x32xf32>
    %33 = vector.shape_cast %32 : vector<1x32x32xf32> to vector<32x32xf32>
    %cst_19 = arith.constant dense<0.000000e+00> : vector<16x32xf32>
    %34 = tpu.matmul %31, %33, %cst_19 {dimension_numbers = #tpu.dot_dimension_numbers<[1], [0], [0], [1], [0, 0, 1, 1], [], []>} : vector<16x32xf32>, vector<32x32xf32>, vector<16x32xf32> -> vector<16x32xf32>
    %c0_20 = arith.constant 0 : index
    %c0_21 = arith.constant 0 : index
    %35 = vector.load %arg5[%c0_20, %c0_21] : memref<4x32xf32, #tpu.memory_space<vmem>>, vector<1x32xf32>
    %36 = vector.broadcast %35 : vector<1x32xf32> to vector<16x32xf32>
    %37 = arith.addf %34, %36 : vector<16x32xf32>
    %c1 = arith.constant 1 : index
    %c0_22 = arith.constant 0 : index
    %c0_23 = arith.constant 0 : index
    %38 = vector.load %arg4[%c1, %c0_22, %c0_23] : memref<4x32x32xf32, #tpu.memory_space<vmem>>, vector<1x32x32xf32>
    %39 = vector.shape_cast %38 : vector<1x32x32xf32> to vector<32x32xf32>
    %cst_24 = arith.constant dense<0.000000e+00> : vector<16x32xf32>
    %40 = tpu.matmul %31, %39, %cst_24 {dimension_numbers = #tpu.dot_dimension_numbers<[1], [0], [0], [1], [0, 0, 1, 1], [], []>} : vector<16x32xf32>, vector<32x32xf32>, vector<16x32xf32> -> vector<16x32xf32>
    %c1_25 = arith.constant 1 : index
    %c0_26 = arith.constant 0 : index
    %41 = vector.load %arg5[%c1_25, %c0_26] : memref<4x32xf32, #tpu.memory_space<vmem>>, vector<1x32xf32>
    %42 = vector.broadcast %41 : vector<1x32xf32> to vector<16x32xf32>
    %43 = arith.addf %40, %42 : vector<16x32xf32>
    %c2 = arith.constant 2 : index
    %c0_27 = arith.constant 0 : index
    %c0_28 = arith.constant 0 : index
    %44 = vector.load %arg4[%c2, %c0_27, %c0_28] : memref<4x32x32xf32, #tpu.memory_space<vmem>>, vector<1x32x32xf32>
    %45 = vector.shape_cast %44 : vector<1x32x32xf32> to vector<32x32xf32>
    %cst_29 = arith.constant dense<0.000000e+00> : vector<16x32xf32>
    %46 = tpu.matmul %31, %45, %cst_29 {dimension_numbers = #tpu.dot_dimension_numbers<[1], [0], [0], [1], [0, 0, 1, 1], [], []>} : vector<16x32xf32>, vector<32x32xf32>, vector<16x32xf32> -> vector<16x32xf32>
    %c2_30 = arith.constant 2 : index
    %c0_31 = arith.constant 0 : index
    %47 = vector.load %arg5[%c2_30, %c0_31] : memref<4x32xf32, #tpu.memory_space<vmem>>, vector<1x32xf32>
    %48 = vector.broadcast %47 : vector<1x32xf32> to vector<16x32xf32>
    %49 = arith.addf %46, %48 : vector<16x32xf32>
    %50 = vector.extract_strided_slice %37 {offsets = [0, 0], sizes = [8, 16], strides = [1, 1]} : vector<16x32xf32> to vector<8x16xf32>
    %51 = vector.extract_strided_slice %43 {offsets = [0, 0], sizes = [8, 16], strides = [1, 1]} : vector<16x32xf32> to vector<8x16xf32>
    %52 = vector.extract_strided_slice %49 {offsets = [0, 0], sizes = [8, 16], strides = [1, 1]} : vector<16x32xf32> to vector<8x16xf32>
    %cst_32 = arith.constant dense<0.000000e+00> : vector<8x8xf32>
    %53 = tpu.matmul %50, %51, %cst_32 {dimension_numbers = #tpu.dot_dimension_numbers<[1], [1], [0], [0], [0, 0, 1, 0], [], []>} : vector<8x16xf32>, vector<8x16xf32>, vector<8x8xf32> -> vector<8x8xf32>
    %cst_33 = arith.constant 2.500000e-01 : f32
    %54 = vector.broadcast %cst_33 : f32 to vector<8x8xf32>
    %55 = arith.mulf %53, %54 : vector<8x8xf32>
    %cst_34 = arith.constant dense<0xFF800000> : vector<8xf32>
    %56 = vector.multi_reduction <maximumf>, %55, %cst_34 [1] : vector<8x8xf32> to vector<8xf32>
    %57 = vector.shape_cast %56 : vector<8xf32> to vector<8x1xf32>
    %58 = vector.broadcast %57 : vector<8x1xf32> to vector<8x8xf32>
    %59 = arith.subf %55, %58 : vector<8x8xf32>
    %60 = math.exp %59 : vector<8x8xf32>
    %cst_35 = arith.constant dense<0.000000e+00> : vector<8xf32>
    %61 = vector.multi_reduction <add>, %60, %cst_35 [1] : vector<8x8xf32> to vector<8xf32>
    %62 = vector.shape_cast %61 : vector<8xf32> to vector<8x1xf32>
    %63 = tpu.reciprocal %62 {approx = true} : vector<8x1xf32> -> vector<8x1xf32>
    %64 = vector.broadcast %63 : vector<8x1xf32> to vector<8x8xf32>
    %65 = arith.mulf %60, %64 : vector<8x8xf32>
    %cst_36 = arith.constant dense<0.000000e+00> : vector<8x16xf32>
    %66 = tpu.matmul %65, %52, %cst_36 {dimension_numbers = #tpu.dot_dimension_numbers<[1], [0], [0], [1], [0, 0, 1, 1], [], []>} : vector<8x8xf32>, vector<8x16xf32>, vector<8x16xf32> -> vector<8x16xf32>
    %67 = vector.extract_strided_slice %37 {offsets = [0, 16], sizes = [8, 16], strides = [1, 1]} : vector<16x32xf32> to vector<8x16xf32>
    %68 = vector.extract_strided_slice %43 {offsets = [0, 16], sizes = [8, 16], strides = [1, 1]} : vector<16x32xf32> to vector<8x16xf32>
    %69 = vector.extract_strided_slice %49 {offsets = [0, 16], sizes = [8, 16], strides = [1, 1]} : vector<16x32xf32> to vector<8x16xf32>
    %cst_37 = arith.constant dense<0.000000e+00> : vector<8x8xf32>
    %70 = tpu.matmul %67, %68, %cst_37 {dimension_numbers = #tpu.dot_dimension_numbers<[1], [1], [0], [0], [0, 0, 1, 0], [], []>} : vector<8x16xf32>, vector<8x16xf32>, vector<8x8xf32> -> vector<8x8xf32>
    %cst_38 = arith.constant 2.500000e-01 : f32
    %71 = vector.broadcast %cst_38 : f32 to vector<8x8xf32>
    %72 = arith.mulf %70, %71 : vector<8x8xf32>
    %cst_39 = arith.constant dense<0xFF800000> : vector<8xf32>
    %73 = vector.multi_reduction <maximumf>, %72, %cst_39 [1] : vector<8x8xf32> to vector<8xf32>
    %74 = vector.shape_cast %73 : vector<8xf32> to vector<8x1xf32>
    %75 = vector.broadcast %74 : vector<8x1xf32> to vector<8x8xf32>
    %76 = arith.subf %72, %75 : vector<8x8xf32>
    %77 = math.exp %76 : vector<8x8xf32>
    %cst_40 = arith.constant dense<0.000000e+00> : vector<8xf32>
    %78 = vector.multi_reduction <add>, %77, %cst_40 [1] : vector<8x8xf32> to vector<8xf32>
    %79 = vector.shape_cast %78 : vector<8xf32> to vector<8x1xf32>
    %80 = tpu.reciprocal %79 {approx = true} : vector<8x1xf32> -> vector<8x1xf32>
    %81 = vector.broadcast %80 : vector<8x1xf32> to vector<8x8xf32>
    %82 = arith.mulf %77, %81 : vector<8x8xf32>
    %cst_41 = arith.constant dense<0.000000e+00> : vector<8x16xf32>
    %83 = tpu.matmul %82, %69, %cst_41 {dimension_numbers = #tpu.dot_dimension_numbers<[1], [0], [0], [1], [0, 0, 1, 1], [], []>} : vector<8x8xf32>, vector<8x16xf32>, vector<8x16xf32> -> vector<8x16xf32>
    %84 = tpu.concatenate %66, %83 in 1 : vector<8x16xf32>, vector<8x16xf32> -> vector<8x32xf32>
    %85 = vector.extract_strided_slice %37 {offsets = [8, 0], sizes = [8, 16], strides = [1, 1]} : vector<16x32xf32> to vector<8x16xf32>
    %86 = vector.extract_strided_slice %43 {offsets = [8, 0], sizes = [8, 16], strides = [1, 1]} : vector<16x32xf32> to vector<8x16xf32>
    %87 = vector.extract_strided_slice %49 {offsets = [8, 0], sizes = [8, 16], strides = [1, 1]} : vector<16x32xf32> to vector<8x16xf32>
    %cst_42 = arith.constant dense<0.000000e+00> : vector<8x8xf32>
    %88 = tpu.matmul %85, %86, %cst_42 {dimension_numbers = #tpu.dot_dimension_numbers<[1], [1], [0], [0], [0, 0, 1, 0], [], []>} : vector<8x16xf32>, vector<8x16xf32>, vector<8x8xf32> -> vector<8x8xf32>
    %cst_43 = arith.constant 2.500000e-01 : f32
    %89 = vector.broadcast %cst_43 : f32 to vector<8x8xf32>
    %90 = arith.mulf %88, %89 : vector<8x8xf32>
    %cst_44 = arith.constant dense<0xFF800000> : vector<8xf32>
    %91 = vector.multi_reduction <maximumf>, %90, %cst_44 [1] : vector<8x8xf32> to vector<8xf32>
    %92 = vector.shape_cast %91 : vector<8xf32> to vector<8x1xf32>
    %93 = vector.broadcast %92 : vector<8x1xf32> to vector<8x8xf32>
    %94 = arith.subf %90, %93 : vector<8x8xf32>
    %95 = math.exp %94 : vector<8x8xf32>
    %cst_45 = arith.constant dense<0.000000e+00> : vector<8xf32>
    %96 = vector.multi_reduction <add>, %95, %cst_45 [1] : vector<8x8xf32> to vector<8xf32>
    %97 = vector.shape_cast %96 : vector<8xf32> to vector<8x1xf32>
    %98 = tpu.reciprocal %97 {approx = true} : vector<8x1xf32> -> vector<8x1xf32>
    %99 = vector.broadcast %98 : vector<8x1xf32> to vector<8x8xf32>
    %100 = arith.mulf %95, %99 : vector<8x8xf32>
    %cst_46 = arith.constant dense<0.000000e+00> : vector<8x16xf32>
    %101 = tpu.matmul %100, %87, %cst_46 {dimension_numbers = #tpu.dot_dimension_numbers<[1], [0], [0], [1], [0, 0, 1, 1], [], []>} : vector<8x8xf32>, vector<8x16xf32>, vector<8x16xf32> -> vector<8x16xf32>
    %102 = vector.extract_strided_slice %37 {offsets = [8, 16], sizes = [8, 16], strides = [1, 1]} : vector<16x32xf32> to vector<8x16xf32>
    %103 = vector.extract_strided_slice %43 {offsets = [8, 16], sizes = [8, 16], strides = [1, 1]} : vector<16x32xf32> to vector<8x16xf32>
    %104 = vector.extract_strided_slice %49 {offsets = [8, 16], sizes = [8, 16], strides = [1, 1]} : vector<16x32xf32> to vector<8x16xf32>
    %cst_47 = arith.constant dense<0.000000e+00> : vector<8x8xf32>
    %105 = tpu.matmul %102, %103, %cst_47 {dimension_numbers = #tpu.dot_dimension_numbers<[1], [1], [0], [0], [0, 0, 1, 0], [], []>} : vector<8x16xf32>, vector<8x16xf32>, vector<8x8xf32> -> vector<8x8xf32>
    %cst_48 = arith.constant 2.500000e-01 : f32
    %106 = vector.broadcast %cst_48 : f32 to vector<8x8xf32>
    %107 = arith.mulf %105, %106 : vector<8x8xf32>
    %cst_49 = arith.constant dense<0xFF800000> : vector<8xf32>
    %108 = vector.multi_reduction <maximumf>, %107, %cst_49 [1] : vector<8x8xf32> to vector<8xf32>
    %109 = vector.shape_cast %108 : vector<8xf32> to vector<8x1xf32>
    %110 = vector.broadcast %109 : vector<8x1xf32> to vector<8x8xf32>
    %111 = arith.subf %107, %110 : vector<8x8xf32>
    %112 = math.exp %111 : vector<8x8xf32>
    %cst_50 = arith.constant dense<0.000000e+00> : vector<8xf32>
    %113 = vector.multi_reduction <add>, %112, %cst_50 [1] : vector<8x8xf32> to vector<8xf32>
    %114 = vector.shape_cast %113 : vector<8xf32> to vector<8x1xf32>
    %115 = tpu.reciprocal %114 {approx = true} : vector<8x1xf32> -> vector<8x1xf32>
    %116 = vector.broadcast %115 : vector<8x1xf32> to vector<8x8xf32>
    %117 = arith.mulf %112, %116 : vector<8x8xf32>
    %cst_51 = arith.constant dense<0.000000e+00> : vector<8x16xf32>
    %118 = tpu.matmul %117, %104, %cst_51 {dimension_numbers = #tpu.dot_dimension_numbers<[1], [0], [0], [1], [0, 0, 1, 1], [], []>} : vector<8x8xf32>, vector<8x16xf32>, vector<8x16xf32> -> vector<8x16xf32>
    %119 = tpu.concatenate %101, %118 in 1 : vector<8x16xf32>, vector<8x16xf32> -> vector<8x32xf32>
    %120 = tpu.concatenate %84, %119 in 0 : vector<8x32xf32>, vector<8x32xf32> -> vector<16x32xf32>
    %c3 = arith.constant 3 : index
    %c0_52 = arith.constant 0 : index
    %c0_53 = arith.constant 0 : index
    %121 = vector.load %arg4[%c3, %c0_52, %c0_53] : memref<4x32x32xf32, #tpu.memory_space<vmem>>, vector<1x32x32xf32>
    %122 = vector.shape_cast %121 : vector<1x32x32xf32> to vector<32x32xf32>
    %cst_54 = arith.constant dense<0.000000e+00> : vector<16x32xf32>
    %123 = tpu.matmul %120, %122, %cst_54 {dimension_numbers = #tpu.dot_dimension_numbers<[1], [0], [0], [1], [0, 0, 1, 1], [], []>} : vector<16x32xf32>, vector<32x32xf32>, vector<16x32xf32> -> vector<16x32xf32>
    %c3_55 = arith.constant 3 : index
    %c0_56 = arith.constant 0 : index
    %124 = vector.load %arg5[%c3_55, %c0_56] : memref<4x32xf32, #tpu.memory_space<vmem>>, vector<1x32xf32>
    %125 = vector.broadcast %124 : vector<1x32xf32> to vector<16x32xf32>
    %126 = arith.addf %123, %125 : vector<16x32xf32>
    %127 = arith.addf %7, %126 : vector<16x32xf32>
    %c1_57 = arith.constant 1 : index
    %c0_58 = arith.constant 0 : index
    %128 = vector.load %arg6[%c1_57, %c0_58] : memref<2x32xf32, #tpu.memory_space<vmem>>, vector<1x32xf32>
    %c1_59 = arith.constant 1 : index
    %c0_60 = arith.constant 0 : index
    %129 = vector.load %arg7[%c1_59, %c0_60] : memref<2x32xf32, #tpu.memory_space<vmem>>, vector<1x32xf32>
    %cst_61 = arith.constant dense<0.000000e+00> : vector<16xf32>
    %130 = vector.multi_reduction <add>, %127, %cst_61 [1] : vector<16x32xf32> to vector<16xf32>
    %131 = vector.shape_cast %130 : vector<16xf32> to vector<16x1xf32>
    %cst_62 = arith.constant 3.200000e+01 : f32
    %132 = vector.broadcast %cst_62 : f32 to vector<16x1xf32>
    %133 = arith.divf %131, %132 : vector<16x1xf32>
    %134 = vector.broadcast %133 : vector<16x1xf32> to vector<16x32xf32>
    %135 = arith.subf %127, %134 : vector<16x32xf32>
    %136 = arith.mulf %135, %135 : vector<16x32xf32>
    %cst_63 = arith.constant dense<0.000000e+00> : vector<16xf32>
    %137 = vector.multi_reduction <add>, %136, %cst_63 [1] : vector<16x32xf32> to vector<16xf32>
    %138 = vector.shape_cast %137 : vector<16xf32> to vector<16x1xf32>
    %cst_64 = arith.constant 3.200000e+01 : f32
    %139 = vector.broadcast %cst_64 : f32 to vector<16x1xf32>
    %140 = arith.divf %138, %139 : vector<16x1xf32>
    %141 = vector.broadcast %133 : vector<16x1xf32> to vector<16x32xf32>
    %142 = arith.subf %127, %141 : vector<16x32xf32>
    %cst_65 = arith.constant 9.99999974E-6 : f32
    %143 = vector.broadcast %cst_65 : f32 to vector<16x1xf32>
    %144 = arith.addf %140, %143 : vector<16x1xf32>
    %145 = math.rsqrt %144 : vector<16x1xf32>
    %146 = vector.broadcast %145 : vector<16x1xf32> to vector<16x32xf32>
    %147 = arith.mulf %142, %146 : vector<16x32xf32>
    %148 = vector.broadcast %128 : vector<1x32xf32> to vector<16x32xf32>
    %149 = arith.mulf %147, %148 : vector<16x32xf32>
    %150 = vector.broadcast %129 : vector<1x32xf32> to vector<16x32xf32>
    %151 = arith.addf %149, %150 : vector<16x32xf32>
    %c0_66 = arith.constant 0 : index
    %c0_67 = arith.constant 0 : index
    %152 = vector.load %arg8[%c0_66, %c0_67] : memref<32x64xf32, #tpu.memory_space<vmem>>, vector<32x64xf32>
    %cst_68 = arith.constant dense<0.000000e+00> : vector<16x64xf32>
    %153 = tpu.matmul %151, %152, %cst_68 {dimension_numbers = #tpu.dot_dimension_numbers<[1], [0], [0], [1], [0, 0, 1, 1], [], []>} : vector<16x32xf32>, vector<32x64xf32>, vector<16x64xf32> -> vector<16x64xf32>
    %c0_69 = arith.constant 0 : index
    %c0_70 = arith.constant 0 : index
    %154 = vector.load %arg9[%c0_69, %c0_70] : memref<1x64xf32, #tpu.memory_space<vmem>>, vector<1x64xf32>
    %155 = vector.broadcast %154 : vector<1x64xf32> to vector<16x64xf32>
    %156 = arith.addf %153, %155 : vector<16x64xf32>
    %157 = arith.mulf %156, %156 : vector<16x64xf32>
    %158 = arith.mulf %156, %157 : vector<16x64xf32>
    %cst_71 = arith.constant 4.471500e-02 : f32
    %159 = vector.broadcast %cst_71 : f32 to vector<16x64xf32>
    %160 = arith.mulf %159, %158 : vector<16x64xf32>
    %161 = arith.addf %156, %160 : vector<16x64xf32>
    %cst_72 = arith.constant 0.797884583 : f32
    %162 = vector.broadcast %cst_72 : f32 to vector<16x64xf32>
    %163 = arith.mulf %162, %161 : vector<16x64xf32>
    %164 = math.tanh %163 : vector<16x64xf32>
    %cst_73 = arith.constant 1.000000e+00 : f32
    %165 = vector.broadcast %cst_73 : f32 to vector<16x64xf32>
    %166 = arith.addf %165, %164 : vector<16x64xf32>
    %cst_74 = arith.constant 5.000000e-01 : f32
    %167 = vector.broadcast %cst_74 : f32 to vector<16x64xf32>
    %168 = arith.mulf %167, %166 : vector<16x64xf32>
    %169 = arith.mulf %156, %168 : vector<16x64xf32>
    %c0_75 = arith.constant 0 : index
    %c0_76 = arith.constant 0 : index
    %170 = vector.load %arg10[%c0_75, %c0_76] : memref<64x32xf32, #tpu.memory_space<vmem>>, vector<64x32xf32>
    %cst_77 = arith.constant dense<0.000000e+00> : vector<16x32xf32>
    %171 = tpu.matmul %169, %170, %cst_77 {dimension_numbers = #tpu.dot_dimension_numbers<[1], [0], [0], [1], [0, 0, 1, 1], [], []>} : vector<16x64xf32>, vector<64x32xf32>, vector<16x32xf32> -> vector<16x32xf32>
    %c0_78 = arith.constant 0 : index
    %c0_79 = arith.constant 0 : index
    %172 = vector.load %arg11[%c0_78, %c0_79] : memref<1x32xf32, #tpu.memory_space<vmem>>, vector<1x32xf32>
    %173 = vector.broadcast %172 : vector<1x32xf32> to vector<16x32xf32>
    %174 = arith.addf %171, %173 : vector<16x32xf32>
    %175 = arith.addf %127, %174 : vector<16x32xf32>
    %c0_80 = arith.constant 0 : index
    %c0_81 = arith.constant 0 : index
    %176 = vector.load %arg12[%c0_80, %c0_81] : memref<32x32xf32, #tpu.memory_space<vmem>>, vector<32x32xf32>
    %cst_82 = arith.constant dense<0.000000e+00> : vector<16x32xf32>
    %177 = tpu.matmul %175, %176, %cst_82 {dimension_numbers = #tpu.dot_dimension_numbers<[1], [0], [0], [1], [0, 0, 1, 1], [], []>} : vector<16x32xf32>, vector<32x32xf32>, vector<16x32xf32> -> vector<16x32xf32>
    %c0_83 = arith.constant 0 : index
    %c0_84 = arith.constant 0 : index
    %178 = vector.load %arg13[%c0_83, %c0_84] : memref<1x32xf32, #tpu.memory_space<vmem>>, vector<1x32xf32>
    %179 = vector.broadcast %178 : vector<1x32xf32> to vector<16x32xf32>
    %180 = arith.addf %177, %179 : vector<16x32xf32>
    %c0_85 = arith.constant 0 : index
    %c0_86 = arith.constant 0 : index
    %181 = vector.load %arg14[%c0_85, %c0_86] : memref<16x32xf32, #tpu.memory_space<vmem>>, vector<16x32xf32>
    tpu.vector_store %arg14[%c0_85, %c0_86], %180 {strides = array<i32>} : memref<16x32xf32, #tpu.memory_space<vmem>>, vector<16x32xf32>,
    return
  }
}

module attributes {stable_mosaic.version = 11 : i64} {
  func.func @_decoder_kernel(%arg0: memref<14x32xf32, #tpu.memory_space<vmem>>, %arg1: memref<16x32xf32, #tpu.memory_space<vmem>>, %arg2: memref<16x32xf32, #tpu.memory_space<vmem>>, %arg3: memref<16x32x32xf32, #tpu.memory_space<vmem>>, %arg4: memref<16x32xf32, #tpu.memory_space<vmem>>, %arg5: memref<32x64xf32, #tpu.memory_space<vmem>>, %arg6: memref<1x64xf32, #tpu.memory_space<vmem>>, %arg7: memref<64x32xf32, #tpu.memory_space<vmem>>, %arg8: memref<1x32xf32, #tpu.memory_space<vmem>>, %arg9: memref<5x32xf32, #tpu.memory_space<vmem>>, %arg10: memref<5x32xf32, #tpu.memory_space<vmem>>, %arg11: memref<14x32xf32, #tpu.memory_space<vmem>>, %arg12: memref<16x32xf32, #tpu.memory_space<vmem>>) attributes {dimension_semantics = [], scalar_prefetch = 0 : i64, scratch_operands = 0 : i64, tpu.core_type = #tpu.core_type<tc>} {
    %c0 = arith.constant 0 : index
    %c0_0 = arith.constant 0 : index
    %0 = vector.load %arg0[%c0, %c0_0] : memref<14x32xf32, #tpu.memory_space<vmem>>, vector<14x32xf32>
    %c0_1 = arith.constant 0 : index
    %c0_2 = arith.constant 0 : index
    %1 = vector.load %arg1[%c0_1, %c0_2] : memref<16x32xf32, #tpu.memory_space<vmem>>, vector<16x32xf32>
    %c0_3 = arith.constant 0 : index
    %c0_4 = arith.constant 0 : index
    %2 = vector.load %arg2[%c0_3, %c0_4] : memref<16x32xf32, #tpu.memory_space<vmem>>, vector<16x32xf32>
    %3 = arith.addf %1, %2 : vector<16x32xf32>
    %c0_5 = arith.constant 0 : index
    %c0_6 = arith.constant 0 : index
    %c0_7 = arith.constant 0 : index
    %4 = vector.load %arg3[%c0_5, %c0_6, %c0_7] : memref<16x32x32xf32, #tpu.memory_space<vmem>>, vector<1x32x32xf32>
    %5 = vector.shape_cast %4 : vector<1x32x32xf32> to vector<32x32xf32>
    %cst = arith.constant dense<0.000000e+00> : vector<14x32xf32>
    %6 = tpu.matmul %0, %5, %cst {dimension_numbers = #tpu.dot_dimension_numbers<[1], [0], [0], [1], [0, 0, 1, 1], [], []>} : vector<14x32xf32>, vector<32x32xf32>, vector<14x32xf32> -> vector<14x32xf32>
    %c0_8 = arith.constant 0 : index
    %c0_9 = arith.constant 0 : index
    %7 = vector.load %arg4[%c0_8, %c0_9] : memref<16x32xf32, #tpu.memory_space<vmem>>, vector<1x32xf32>
    %8 = vector.broadcast %7 : vector<1x32xf32> to vector<14x32xf32>
    %9 = arith.addf %6, %8 : vector<14x32xf32>
    %c1 = arith.constant 1 : index
    %c0_10 = arith.constant 0 : index
    %c0_11 = arith.constant 0 : index
    %10 = vector.load %arg3[%c1, %c0_10, %c0_11] : memref<16x32x32xf32, #tpu.memory_space<vmem>>, vector<1x32x32xf32>
    %11 = vector.shape_cast %10 : vector<1x32x32xf32> to vector<32x32xf32>
    %cst_12 = arith.constant dense<0.000000e+00> : vector<14x32xf32>
    %12 = tpu.matmul %0, %11, %cst_12 {dimension_numbers = #tpu.dot_dimension_numbers<[1], [0], [0], [1], [0, 0, 1, 1], [], []>} : vector<14x32xf32>, vector<32x32xf32>, vector<14x32xf32> -> vector<14x32xf32>
    %c1_13 = arith.constant 1 : index
    %c0_14 = arith.constant 0 : index
    %13 = vector.load %arg4[%c1_13, %c0_14] : memref<16x32xf32, #tpu.memory_space<vmem>>, vector<1x32xf32>
    %14 = vector.broadcast %13 : vector<1x32xf32> to vector<14x32xf32>
    %15 = arith.addf %12, %14 : vector<14x32xf32>
    %c2 = arith.constant 2 : index
    %c0_15 = arith.constant 0 : index
    %c0_16 = arith.constant 0 : index
    %16 = vector.load %arg3[%c2, %c0_15, %c0_16] : memref<16x32x32xf32, #tpu.memory_space<vmem>>, vector<1x32x32xf32>
    %17 = vector.shape_cast %16 : vector<1x32x32xf32> to vector<32x32xf32>
    %cst_17 = arith.constant dense<0.000000e+00> : vector<14x32xf32>
    %18 = tpu.matmul %0, %17, %cst_17 {dimension_numbers = #tpu.dot_dimension_numbers<[1], [0], [0], [1], [0, 0, 1, 1], [], []>} : vector<14x32xf32>, vector<32x32xf32>, vector<14x32xf32> -> vector<14x32xf32>
    %c2_18 = arith.constant 2 : index
    %c0_19 = arith.constant 0 : index
    %19 = vector.load %arg4[%c2_18, %c0_19] : memref<16x32xf32, #tpu.memory_space<vmem>>, vector<1x32xf32>
    %20 = vector.broadcast %19 : vector<1x32xf32> to vector<14x32xf32>
    %21 = arith.addf %18, %20 : vector<14x32xf32>
    %22 = vector.extract_strided_slice %9 {offsets = [0, 0], sizes = [7, 16], strides = [1, 1]} : vector<14x32xf32> to vector<7x16xf32>
    %23 = vector.extract_strided_slice %15 {offsets = [0, 0], sizes = [7, 16], strides = [1, 1]} : vector<14x32xf32> to vector<7x16xf32>
    %24 = vector.extract_strided_slice %21 {offsets = [0, 0], sizes = [7, 16], strides = [1, 1]} : vector<14x32xf32> to vector<7x16xf32>
    %cst_20 = arith.constant dense<0.000000e+00> : vector<7x7xf32>
    %25 = tpu.matmul %22, %23, %cst_20 {dimension_numbers = #tpu.dot_dimension_numbers<[1], [1], [0], [0], [0, 0, 1, 0], [], []>} : vector<7x16xf32>, vector<7x16xf32>, vector<7x7xf32> -> vector<7x7xf32>
    %cst_21 = arith.constant 2.500000e-01 : f32
    %26 = vector.broadcast %cst_21 : f32 to vector<7x7xf32>
    %27 = arith.mulf %25, %26 : vector<7x7xf32>
    %cst_22 = arith.constant dense<0xFF800000> : vector<7xf32>
    %28 = vector.multi_reduction <maximumf>, %27, %cst_22 [1] : vector<7x7xf32> to vector<7xf32>
    %29 = vector.shape_cast %28 : vector<7xf32> to vector<7x1xf32>
    %30 = vector.broadcast %29 : vector<7x1xf32> to vector<7x7xf32>
    %31 = arith.subf %27, %30 : vector<7x7xf32>
    %32 = math.exp %31 : vector<7x7xf32>
    %cst_23 = arith.constant dense<0.000000e+00> : vector<7xf32>
    %33 = vector.multi_reduction <add>, %32, %cst_23 [1] : vector<7x7xf32> to vector<7xf32>
    %34 = vector.shape_cast %33 : vector<7xf32> to vector<7x1xf32>
    %35 = tpu.reciprocal %34 {approx = true} : vector<7x1xf32> -> vector<7x1xf32>
    %36 = vector.broadcast %35 : vector<7x1xf32> to vector<7x7xf32>
    %37 = arith.mulf %32, %36 : vector<7x7xf32>
    %cst_24 = arith.constant dense<0.000000e+00> : vector<7x16xf32>
    %38 = tpu.matmul %37, %24, %cst_24 {dimension_numbers = #tpu.dot_dimension_numbers<[1], [0], [0], [1], [0, 0, 1, 1], [], []>} : vector<7x7xf32>, vector<7x16xf32>, vector<7x16xf32> -> vector<7x16xf32>
    %39 = vector.extract_strided_slice %9 {offsets = [0, 16], sizes = [7, 16], strides = [1, 1]} : vector<14x32xf32> to vector<7x16xf32>
    %40 = vector.extract_strided_slice %15 {offsets = [0, 16], sizes = [7, 16], strides = [1, 1]} : vector<14x32xf32> to vector<7x16xf32>
    %41 = vector.extract_strided_slice %21 {offsets = [0, 16], sizes = [7, 16], strides = [1, 1]} : vector<14x32xf32> to vector<7x16xf32>
    %cst_25 = arith.constant dense<0.000000e+00> : vector<7x7xf32>
    %42 = tpu.matmul %39, %40, %cst_25 {dimension_numbers = #tpu.dot_dimension_numbers<[1], [1], [0], [0], [0, 0, 1, 0], [], []>} : vector<7x16xf32>, vector<7x16xf32>, vector<7x7xf32> -> vector<7x7xf32>
    %cst_26 = arith.constant 2.500000e-01 : f32
    %43 = vector.broadcast %cst_26 : f32 to vector<7x7xf32>
    %44 = arith.mulf %42, %43 : vector<7x7xf32>
    %cst_27 = arith.constant dense<0xFF800000> : vector<7xf32>
    %45 = vector.multi_reduction <maximumf>, %44, %cst_27 [1] : vector<7x7xf32> to vector<7xf32>
    %46 = vector.shape_cast %45 : vector<7xf32> to vector<7x1xf32>
    %47 = vector.broadcast %46 : vector<7x1xf32> to vector<7x7xf32>
    %48 = arith.subf %44, %47 : vector<7x7xf32>
    %49 = math.exp %48 : vector<7x7xf32>
    %cst_28 = arith.constant dense<0.000000e+00> : vector<7xf32>
    %50 = vector.multi_reduction <add>, %49, %cst_28 [1] : vector<7x7xf32> to vector<7xf32>
    %51 = vector.shape_cast %50 : vector<7xf32> to vector<7x1xf32>
    %52 = tpu.reciprocal %51 {approx = true} : vector<7x1xf32> -> vector<7x1xf32>
    %53 = vector.broadcast %52 : vector<7x1xf32> to vector<7x7xf32>
    %54 = arith.mulf %49, %53 : vector<7x7xf32>
    %cst_29 = arith.constant dense<0.000000e+00> : vector<7x16xf32>
    %55 = tpu.matmul %54, %41, %cst_29 {dimension_numbers = #tpu.dot_dimension_numbers<[1], [0], [0], [1], [0, 0, 1, 1], [], []>} : vector<7x7xf32>, vector<7x16xf32>, vector<7x16xf32> -> vector<7x16xf32>
    %56 = tpu.concatenate %38, %55 in 1 : vector<7x16xf32>, vector<7x16xf32> -> vector<7x32xf32>
    %57 = vector.extract_strided_slice %9 {offsets = [7, 0], sizes = [7, 16], strides = [1, 1]} : vector<14x32xf32> to vector<7x16xf32>
    %58 = vector.extract_strided_slice %15 {offsets = [7, 0], sizes = [7, 16], strides = [1, 1]} : vector<14x32xf32> to vector<7x16xf32>
    %59 = vector.extract_strided_slice %21 {offsets = [7, 0], sizes = [7, 16], strides = [1, 1]} : vector<14x32xf32> to vector<7x16xf32>
    %cst_30 = arith.constant dense<0.000000e+00> : vector<7x7xf32>
    %60 = tpu.matmul %57, %58, %cst_30 {dimension_numbers = #tpu.dot_dimension_numbers<[1], [1], [0], [0], [0, 0, 1, 0], [], []>} : vector<7x16xf32>, vector<7x16xf32>, vector<7x7xf32> -> vector<7x7xf32>
    %cst_31 = arith.constant 2.500000e-01 : f32
    %61 = vector.broadcast %cst_31 : f32 to vector<7x7xf32>
    %62 = arith.mulf %60, %61 : vector<7x7xf32>
    %cst_32 = arith.constant dense<0xFF800000> : vector<7xf32>
    %63 = vector.multi_reduction <maximumf>, %62, %cst_32 [1] : vector<7x7xf32> to vector<7xf32>
    %64 = vector.shape_cast %63 : vector<7xf32> to vector<7x1xf32>
    %65 = vector.broadcast %64 : vector<7x1xf32> to vector<7x7xf32>
    %66 = arith.subf %62, %65 : vector<7x7xf32>
    %67 = math.exp %66 : vector<7x7xf32>
    %cst_33 = arith.constant dense<0.000000e+00> : vector<7xf32>
    %68 = vector.multi_reduction <add>, %67, %cst_33 [1] : vector<7x7xf32> to vector<7xf32>
    %69 = vector.shape_cast %68 : vector<7xf32> to vector<7x1xf32>
    %70 = tpu.reciprocal %69 {approx = true} : vector<7x1xf32> -> vector<7x1xf32>
    %71 = vector.broadcast %70 : vector<7x1xf32> to vector<7x7xf32>
    %72 = arith.mulf %67, %71 : vector<7x7xf32>
    %cst_34 = arith.constant dense<0.000000e+00> : vector<7x16xf32>
    %73 = tpu.matmul %72, %59, %cst_34 {dimension_numbers = #tpu.dot_dimension_numbers<[1], [0], [0], [1], [0, 0, 1, 1], [], []>} : vector<7x7xf32>, vector<7x16xf32>, vector<7x16xf32> -> vector<7x16xf32>
    %74 = vector.extract_strided_slice %9 {offsets = [7, 16], sizes = [7, 16], strides = [1, 1]} : vector<14x32xf32> to vector<7x16xf32>
    %75 = vector.extract_strided_slice %15 {offsets = [7, 16], sizes = [7, 16], strides = [1, 1]} : vector<14x32xf32> to vector<7x16xf32>
    %76 = vector.extract_strided_slice %21 {offsets = [7, 16], sizes = [7, 16], strides = [1, 1]} : vector<14x32xf32> to vector<7x16xf32>
    %cst_35 = arith.constant dense<0.000000e+00> : vector<7x7xf32>
    %77 = tpu.matmul %74, %75, %cst_35 {dimension_numbers = #tpu.dot_dimension_numbers<[1], [1], [0], [0], [0, 0, 1, 0], [], []>} : vector<7x16xf32>, vector<7x16xf32>, vector<7x7xf32> -> vector<7x7xf32>
    %cst_36 = arith.constant 2.500000e-01 : f32
    %78 = vector.broadcast %cst_36 : f32 to vector<7x7xf32>
    %79 = arith.mulf %77, %78 : vector<7x7xf32>
    %cst_37 = arith.constant dense<0xFF800000> : vector<7xf32>
    %80 = vector.multi_reduction <maximumf>, %79, %cst_37 [1] : vector<7x7xf32> to vector<7xf32>
    %81 = vector.shape_cast %80 : vector<7xf32> to vector<7x1xf32>
    %82 = vector.broadcast %81 : vector<7x1xf32> to vector<7x7xf32>
    %83 = arith.subf %79, %82 : vector<7x7xf32>
    %84 = math.exp %83 : vector<7x7xf32>
    %cst_38 = arith.constant dense<0.000000e+00> : vector<7xf32>
    %85 = vector.multi_reduction <add>, %84, %cst_38 [1] : vector<7x7xf32> to vector<7xf32>
    %86 = vector.shape_cast %85 : vector<7xf32> to vector<7x1xf32>
    %87 = tpu.reciprocal %86 {approx = true} : vector<7x1xf32> -> vector<7x1xf32>
    %88 = vector.broadcast %87 : vector<7x1xf32> to vector<7x7xf32>
    %89 = arith.mulf %84, %88 : vector<7x7xf32>
    %cst_39 = arith.constant dense<0.000000e+00> : vector<7x16xf32>
    %90 = tpu.matmul %89, %76, %cst_39 {dimension_numbers = #tpu.dot_dimension_numbers<[1], [0], [0], [1], [0, 0, 1, 1], [], []>} : vector<7x7xf32>, vector<7x16xf32>, vector<7x16xf32> -> vector<7x16xf32>
    %91 = tpu.concatenate %73, %90 in 1 : vector<7x16xf32>, vector<7x16xf32> -> vector<7x32xf32>
    %92 = tpu.concatenate %56, %91 in 0 : vector<7x32xf32>, vector<7x32xf32> -> vector<14x32xf32>
    %c3 = arith.constant 3 : index
    %c0_40 = arith.constant 0 : index
    %c0_41 = arith.constant 0 : index
    %93 = vector.load %arg3[%c3, %c0_40, %c0_41] : memref<16x32x32xf32, #tpu.memory_space<vmem>>, vector<1x32x32xf32>
    %94 = vector.shape_cast %93 : vector<1x32x32xf32> to vector<32x32xf32>
    %cst_42 = arith.constant dense<0.000000e+00> : vector<14x32xf32>
    %95 = tpu.matmul %92, %94, %cst_42 {dimension_numbers = #tpu.dot_dimension_numbers<[1], [0], [0], [1], [0, 0, 1, 1], [], []>} : vector<14x32xf32>, vector<32x32xf32>, vector<14x32xf32> -> vector<14x32xf32>
    %c3_43 = arith.constant 3 : index
    %c0_44 = arith.constant 0 : index
    %96 = vector.load %arg4[%c3_43, %c0_44] : memref<16x32xf32, #tpu.memory_space<vmem>>, vector<1x32xf32>
    %97 = vector.broadcast %96 : vector<1x32xf32> to vector<14x32xf32>
    %98 = arith.addf %95, %97 : vector<14x32xf32>
    %99 = arith.addf %0, %98 : vector<14x32xf32>
    %c0_45 = arith.constant 0 : index
    %c0_46 = arith.constant 0 : index
    %100 = vector.load %arg9[%c0_45, %c0_46] : memref<5x32xf32, #tpu.memory_space<vmem>>, vector<1x32xf32>
    %c0_47 = arith.constant 0 : index
    %c0_48 = arith.constant 0 : index
    %101 = vector.load %arg10[%c0_47, %c0_48] : memref<5x32xf32, #tpu.memory_space<vmem>>, vector<1x32xf32>
    %cst_49 = arith.constant dense<0.000000e+00> : vector<14xf32>
    %102 = vector.multi_reduction <add>, %99, %cst_49 [1] : vector<14x32xf32> to vector<14xf32>
    %103 = vector.shape_cast %102 : vector<14xf32> to vector<14x1xf32>
    %cst_50 = arith.constant 3.200000e+01 : f32
    %104 = vector.broadcast %cst_50 : f32 to vector<14x1xf32>
    %105 = arith.divf %103, %104 : vector<14x1xf32>
    %106 = vector.broadcast %105 : vector<14x1xf32> to vector<14x32xf32>
    %107 = arith.subf %99, %106 : vector<14x32xf32>
    %108 = arith.mulf %107, %107 : vector<14x32xf32>
    %cst_51 = arith.constant dense<0.000000e+00> : vector<14xf32>
    %109 = vector.multi_reduction <add>, %108, %cst_51 [1] : vector<14x32xf32> to vector<14xf32>
    %110 = vector.shape_cast %109 : vector<14xf32> to vector<14x1xf32>
    %cst_52 = arith.constant 3.200000e+01 : f32
    %111 = vector.broadcast %cst_52 : f32 to vector<14x1xf32>
    %112 = arith.divf %110, %111 : vector<14x1xf32>
    %113 = vector.broadcast %105 : vector<14x1xf32> to vector<14x32xf32>
    %114 = arith.subf %99, %113 : vector<14x32xf32>
    %cst_53 = arith.constant 9.99999974E-6 : f32
    %115 = vector.broadcast %cst_53 : f32 to vector<14x1xf32>
    %116 = arith.addf %112, %115 : vector<14x1xf32>
    %117 = math.rsqrt %116 : vector<14x1xf32>
    %118 = vector.broadcast %117 : vector<14x1xf32> to vector<14x32xf32>
    %119 = arith.mulf %114, %118 : vector<14x32xf32>
    %120 = vector.broadcast %100 : vector<1x32xf32> to vector<14x32xf32>
    %121 = arith.mulf %119, %120 : vector<14x32xf32>
    %122 = vector.broadcast %101 : vector<1x32xf32> to vector<14x32xf32>
    %123 = arith.addf %121, %122 : vector<14x32xf32>
    %c4 = arith.constant 4 : index
    %c0_54 = arith.constant 0 : index
    %c0_55 = arith.constant 0 : index
    %124 = vector.load %arg3[%c4, %c0_54, %c0_55] : memref<16x32x32xf32, #tpu.memory_space<vmem>>, vector<1x32x32xf32>
    %125 = vector.shape_cast %124 : vector<1x32x32xf32> to vector<32x32xf32>
    %cst_56 = arith.constant dense<0.000000e+00> : vector<14x32xf32>
    %126 = tpu.matmul %123, %125, %cst_56 {dimension_numbers = #tpu.dot_dimension_numbers<[1], [0], [0], [1], [0, 0, 1, 1], [], []>} : vector<14x32xf32>, vector<32x32xf32>, vector<14x32xf32> -> vector<14x32xf32>
    %c4_57 = arith.constant 4 : index
    %c0_58 = arith.constant 0 : index
    %127 = vector.load %arg4[%c4_57, %c0_58] : memref<16x32xf32, #tpu.memory_space<vmem>>, vector<1x32xf32>
    %128 = vector.broadcast %127 : vector<1x32xf32> to vector<14x32xf32>
    %129 = arith.addf %126, %128 : vector<14x32xf32>
    %c5 = arith.constant 5 : index
    %c0_59 = arith.constant 0 : index
    %c0_60 = arith.constant 0 : index
    %130 = vector.load %arg3[%c5, %c0_59, %c0_60] : memref<16x32x32xf32, #tpu.memory_space<vmem>>, vector<1x32x32xf32>
    %131 = vector.shape_cast %130 : vector<1x32x32xf32> to vector<32x32xf32>
    %cst_61 = arith.constant dense<0.000000e+00> : vector<16x32xf32>
    %132 = tpu.matmul %3, %131, %cst_61 {dimension_numbers = #tpu.dot_dimension_numbers<[1], [0], [0], [1], [0, 0, 1, 1], [], []>} : vector<16x32xf32>, vector<32x32xf32>, vector<16x32xf32> -> vector<16x32xf32>
    %c5_62 = arith.constant 5 : index
    %c0_63 = arith.constant 0 : index
    %133 = vector.load %arg4[%c5_62, %c0_63] : memref<16x32xf32, #tpu.memory_space<vmem>>, vector<1x32xf32>
    %134 = vector.broadcast %133 : vector<1x32xf32> to vector<16x32xf32>
    %135 = arith.addf %132, %134 : vector<16x32xf32>
    %c6 = arith.constant 6 : index
    %c0_64 = arith.constant 0 : index
    %c0_65 = arith.constant 0 : index
    %136 = vector.load %arg3[%c6, %c0_64, %c0_65] : memref<16x32x32xf32, #tpu.memory_space<vmem>>, vector<1x32x32xf32>
    %137 = vector.shape_cast %136 : vector<1x32x32xf32> to vector<32x32xf32>
    %cst_66 = arith.constant dense<0.000000e+00> : vector<16x32xf32>
    %138 = tpu.matmul %1, %137, %cst_66 {dimension_numbers = #tpu.dot_dimension_numbers<[1], [0], [0], [1], [0, 0, 1, 1], [], []>} : vector<16x32xf32>, vector<32x32xf32>, vector<16x32xf32> -> vector<16x32xf32>
    %c6_67 = arith.constant 6 : index
    %c0_68 = arith.constant 0 : index
    %139 = vector.load %arg4[%c6_67, %c0_68] : memref<16x32xf32, #tpu.memory_space<vmem>>, vector<1x32xf32>
    %140 = vector.broadcast %139 : vector<1x32xf32> to vector<16x32xf32>
    %141 = arith.addf %138, %140 : vector<16x32xf32>
    %142 = vector.extract_strided_slice %129 {offsets = [0, 0], sizes = [7, 16], strides = [1, 1]} : vector<14x32xf32> to vector<7x16xf32>
    %143 = vector.extract_strided_slice %135 {offsets = [0, 0], sizes = [8, 16], strides = [1, 1]} : vector<16x32xf32> to vector<8x16xf32>
    %144 = vector.extract_strided_slice %141 {offsets = [0, 0], sizes = [8, 16], strides = [1, 1]} : vector<16x32xf32> to vector<8x16xf32>
    %cst_69 = arith.constant dense<0.000000e+00> : vector<7x8xf32>
    %145 = tpu.matmul %142, %143, %cst_69 {dimension_numbers = #tpu.dot_dimension_numbers<[1], [1], [0], [0], [0, 0, 1, 0], [], []>} : vector<7x16xf32>, vector<8x16xf32>, vector<7x8xf32> -> vector<7x8xf32>
    %cst_70 = arith.constant 2.500000e-01 : f32
    %146 = vector.broadcast %cst_70 : f32 to vector<7x8xf32>
    %147 = arith.mulf %145, %146 : vector<7x8xf32>
    %cst_71 = arith.constant dense<0xFF800000> : vector<7xf32>
    %148 = vector.multi_reduction <maximumf>, %147, %cst_71 [1] : vector<7x8xf32> to vector<7xf32>
    %149 = vector.shape_cast %148 : vector<7xf32> to vector<7x1xf32>
    %150 = vector.broadcast %149 : vector<7x1xf32> to vector<7x8xf32>
    %151 = arith.subf %147, %150 : vector<7x8xf32>
    %152 = math.exp %151 : vector<7x8xf32>
    %cst_72 = arith.constant dense<0.000000e+00> : vector<7xf32>
    %153 = vector.multi_reduction <add>, %152, %cst_72 [1] : vector<7x8xf32> to vector<7xf32>
    %154 = vector.shape_cast %153 : vector<7xf32> to vector<7x1xf32>
    %155 = tpu.reciprocal %154 {approx = true} : vector<7x1xf32> -> vector<7x1xf32>
    %156 = vector.broadcast %155 : vector<7x1xf32> to vector<7x8xf32>
    %157 = arith.mulf %152, %156 : vector<7x8xf32>
    %cst_73 = arith.constant dense<0.000000e+00> : vector<7x16xf32>
    %158 = tpu.matmul %157, %144, %cst_73 {dimension_numbers = #tpu.dot_dimension_numbers<[1], [0], [0], [1], [0, 0, 1, 1], [], []>} : vector<7x8xf32>, vector<8x16xf32>, vector<7x16xf32> -> vector<7x16xf32>
    %159 = vector.extract_strided_slice %129 {offsets = [0, 16], sizes = [7, 16], strides = [1, 1]} : vector<14x32xf32> to vector<7x16xf32>
    %160 = vector.extract_strided_slice %135 {offsets = [0, 16], sizes = [8, 16], strides = [1, 1]} : vector<16x32xf32> to vector<8x16xf32>
    %161 = vector.extract_strided_slice %141 {offsets = [0, 16], sizes = [8, 16], strides = [1, 1]} : vector<16x32xf32> to vector<8x16xf32>
    %cst_74 = arith.constant dense<0.000000e+00> : vector<7x8xf32>
    %162 = tpu.matmul %159, %160, %cst_74 {dimension_numbers = #tpu.dot_dimension_numbers<[1], [1], [0], [0], [0, 0, 1, 0], [], []>} : vector<7x16xf32>, vector<8x16xf32>, vector<7x8xf32> -> vector<7x8xf32>
    %cst_75 = arith.constant 2.500000e-01 : f32
    %163 = vector.broadcast %cst_75 : f32 to vector<7x8xf32>
    %164 = arith.mulf %162, %163 : vector<7x8xf32>
    %cst_76 = arith.constant dense<0xFF800000> : vector<7xf32>
    %165 = vector.multi_reduction <maximumf>, %164, %cst_76 [1] : vector<7x8xf32> to vector<7xf32>
    %166 = vector.shape_cast %165 : vector<7xf32> to vector<7x1xf32>
    %167 = vector.broadcast %166 : vector<7x1xf32> to vector<7x8xf32>
    %168 = arith.subf %164, %167 : vector<7x8xf32>
    %169 = math.exp %168 : vector<7x8xf32>
    %cst_77 = arith.constant dense<0.000000e+00> : vector<7xf32>
    %170 = vector.multi_reduction <add>, %169, %cst_77 [1] : vector<7x8xf32> to vector<7xf32>
    %171 = vector.shape_cast %170 : vector<7xf32> to vector<7x1xf32>
    %172 = tpu.reciprocal %171 {approx = true} : vector<7x1xf32> -> vector<7x1xf32>
    %173 = vector.broadcast %172 : vector<7x1xf32> to vector<7x8xf32>
    %174 = arith.mulf %169, %173 : vector<7x8xf32>
    %cst_78 = arith.constant dense<0.000000e+00> : vector<7x16xf32>
    %175 = tpu.matmul %174, %161, %cst_78 {dimension_numbers = #tpu.dot_dimension_numbers<[1], [0], [0], [1], [0, 0, 1, 1], [], []>} : vector<7x8xf32>, vector<8x16xf32>, vector<7x16xf32> -> vector<7x16xf32>
    %176 = tpu.concatenate %158, %175 in 1 : vector<7x16xf32>, vector<7x16xf32> -> vector<7x32xf32>
    %177 = vector.extract_strided_slice %129 {offsets = [7, 0], sizes = [7, 16], strides = [1, 1]} : vector<14x32xf32> to vector<7x16xf32>
    %178 = vector.extract_strided_slice %135 {offsets = [8, 0], sizes = [8, 16], strides = [1, 1]} : vector<16x32xf32> to vector<8x16xf32>
    %179 = vector.extract_strided_slice %141 {offsets = [8, 0], sizes = [8, 16], strides = [1, 1]} : vector<16x32xf32> to vector<8x16xf32>
    %cst_79 = arith.constant dense<0.000000e+00> : vector<7x8xf32>
    %180 = tpu.matmul %177, %178, %cst_79 {dimension_numbers = #tpu.dot_dimension_numbers<[1], [1], [0], [0], [0, 0, 1, 0], [], []>} : vector<7x16xf32>, vector<8x16xf32>, vector<7x8xf32> -> vector<7x8xf32>
    %cst_80 = arith.constant 2.500000e-01 : f32
    %181 = vector.broadcast %cst_80 : f32 to vector<7x8xf32>
    %182 = arith.mulf %180, %181 : vector<7x8xf32>
    %cst_81 = arith.constant dense<0xFF800000> : vector<7xf32>
    %183 = vector.multi_reduction <maximumf>, %182, %cst_81 [1] : vector<7x8xf32> to vector<7xf32>
    %184 = vector.shape_cast %183 : vector<7xf32> to vector<7x1xf32>
    %185 = vector.broadcast %184 : vector<7x1xf32> to vector<7x8xf32>
    %186 = arith.subf %182, %185 : vector<7x8xf32>
    %187 = math.exp %186 : vector<7x8xf32>
    %cst_82 = arith.constant dense<0.000000e+00> : vector<7xf32>
    %188 = vector.multi_reduction <add>, %187, %cst_82 [1] : vector<7x8xf32> to vector<7xf32>
    %189 = vector.shape_cast %188 : vector<7xf32> to vector<7x1xf32>
    %190 = tpu.reciprocal %189 {approx = true} : vector<7x1xf32> -> vector<7x1xf32>
    %191 = vector.broadcast %190 : vector<7x1xf32> to vector<7x8xf32>
    %192 = arith.mulf %187, %191 : vector<7x8xf32>
    %cst_83 = arith.constant dense<0.000000e+00> : vector<7x16xf32>
    %193 = tpu.matmul %192, %179, %cst_83 {dimension_numbers = #tpu.dot_dimension_numbers<[1], [0], [0], [1], [0, 0, 1, 1], [], []>} : vector<7x8xf32>, vector<8x16xf32>, vector<7x16xf32> -> vector<7x16xf32>
    %194 = vector.extract_strided_slice %129 {offsets = [7, 16], sizes = [7, 16], strides = [1, 1]} : vector<14x32xf32> to vector<7x16xf32>
    %195 = vector.extract_strided_slice %135 {offsets = [8, 16], sizes = [8, 16], strides = [1, 1]} : vector<16x32xf32> to vector<8x16xf32>
    %196 = vector.extract_strided_slice %141 {offsets = [8, 16], sizes = [8, 16], strides = [1, 1]} : vector<16x32xf32> to vector<8x16xf32>
    %cst_84 = arith.constant dense<0.000000e+00> : vector<7x8xf32>
    %197 = tpu.matmul %194, %195, %cst_84 {dimension_numbers = #tpu.dot_dimension_numbers<[1], [1], [0], [0], [0, 0, 1, 0], [], []>} : vector<7x16xf32>, vector<8x16xf32>, vector<7x8xf32> -> vector<7x8xf32>
    %cst_85 = arith.constant 2.500000e-01 : f32
    %198 = vector.broadcast %cst_85 : f32 to vector<7x8xf32>
    %199 = arith.mulf %197, %198 : vector<7x8xf32>
    %cst_86 = arith.constant dense<0xFF800000> : vector<7xf32>
    %200 = vector.multi_reduction <maximumf>, %199, %cst_86 [1] : vector<7x8xf32> to vector<7xf32>
    %201 = vector.shape_cast %200 : vector<7xf32> to vector<7x1xf32>
    %202 = vector.broadcast %201 : vector<7x1xf32> to vector<7x8xf32>
    %203 = arith.subf %199, %202 : vector<7x8xf32>
    %204 = math.exp %203 : vector<7x8xf32>
    %cst_87 = arith.constant dense<0.000000e+00> : vector<7xf32>
    %205 = vector.multi_reduction <add>, %204, %cst_87 [1] : vector<7x8xf32> to vector<7xf32>
    %206 = vector.shape_cast %205 : vector<7xf32> to vector<7x1xf32>
    %207 = tpu.reciprocal %206 {approx = true} : vector<7x1xf32> -> vector<7x1xf32>
    %208 = vector.broadcast %207 : vector<7x1xf32> to vector<7x8xf32>
    %209 = arith.mulf %204, %208 : vector<7x8xf32>
    %cst_88 = arith.constant dense<0.000000e+00> : vector<7x16xf32>
    %210 = tpu.matmul %209, %196, %cst_88 {dimension_numbers = #tpu.dot_dimension_numbers<[1], [0], [0], [1], [0, 0, 1, 1], [], []>} : vector<7x8xf32>, vector<8x16xf32>, vector<7x16xf32> -> vector<7x16xf32>
    %211 = tpu.concatenate %193, %210 in 1 : vector<7x16xf32>, vector<7x16xf32> -> vector<7x32xf32>
    %212 = tpu.concatenate %176, %211 in 0 : vector<7x32xf32>, vector<7x32xf32> -> vector<14x32xf32>
    %c7 = arith.constant 7 : index
    %c0_89 = arith.constant 0 : index
    %c0_90 = arith.constant 0 : index
    %213 = vector.load %arg3[%c7, %c0_89, %c0_90] : memref<16x32x32xf32, #tpu.memory_space<vmem>>, vector<1x32x32xf32>
    %214 = vector.shape_cast %213 : vector<1x32x32xf32> to vector<32x32xf32>
    %cst_91 = arith.constant dense<0.000000e+00> : vector<14x32xf32>
    %215 = tpu.matmul %212, %214, %cst_91 {dimension_numbers = #tpu.dot_dimension_numbers<[1], [0], [0], [1], [0, 0, 1, 1], [], []>} : vector<14x32xf32>, vector<32x32xf32>, vector<14x32xf32> -> vector<14x32xf32>
    %c7_92 = arith.constant 7 : index
    %c0_93 = arith.constant 0 : index
    %216 = vector.load %arg4[%c7_92, %c0_93] : memref<16x32xf32, #tpu.memory_space<vmem>>, vector<1x32xf32>
    %217 = vector.broadcast %216 : vector<1x32xf32> to vector<14x32xf32>
    %218 = arith.addf %215, %217 : vector<14x32xf32>
    %219 = arith.addf %123, %218 : vector<14x32xf32>
    %c1_94 = arith.constant 1 : index
    %c0_95 = arith.constant 0 : index
    %220 = vector.load %arg9[%c1_94, %c0_95] : memref<5x32xf32, #tpu.memory_space<vmem>>, vector<1x32xf32>
    %c1_96 = arith.constant 1 : index
    %c0_97 = arith.constant 0 : index
    %221 = vector.load %arg10[%c1_96, %c0_97] : memref<5x32xf32, #tpu.memory_space<vmem>>, vector<1x32xf32>
    %cst_98 = arith.constant dense<0.000000e+00> : vector<14xf32>
    %222 = vector.multi_reduction <add>, %219, %cst_98 [1] : vector<14x32xf32> to vector<14xf32>
    %223 = vector.shape_cast %222 : vector<14xf32> to vector<14x1xf32>
    %cst_99 = arith.constant 3.200000e+01 : f32
    %224 = vector.broadcast %cst_99 : f32 to vector<14x1xf32>
    %225 = arith.divf %223, %224 : vector<14x1xf32>
    %226 = vector.broadcast %225 : vector<14x1xf32> to vector<14x32xf32>
    %227 = arith.subf %219, %226 : vector<14x32xf32>
    %228 = arith.mulf %227, %227 : vector<14x32xf32>
    %cst_100 = arith.constant dense<0.000000e+00> : vector<14xf32>
    %229 = vector.multi_reduction <add>, %228, %cst_100 [1] : vector<14x32xf32> to vector<14xf32>
    %230 = vector.shape_cast %229 : vector<14xf32> to vector<14x1xf32>
    %cst_101 = arith.constant 3.200000e+01 : f32
    %231 = vector.broadcast %cst_101 : f32 to vector<14x1xf32>
    %232 = arith.divf %230, %231 : vector<14x1xf32>
    %233 = vector.broadcast %225 : vector<14x1xf32> to vector<14x32xf32>
    %234 = arith.subf %219, %233 : vector<14x32xf32>
    %cst_102 = arith.constant 9.99999974E-6 : f32
    %235 = vector.broadcast %cst_102 : f32 to vector<14x1xf32>
    %236 = arith.addf %232, %235 : vector<14x1xf32>
    %237 = math.rsqrt %236 : vector<14x1xf32>
    %238 = vector.broadcast %237 : vector<14x1xf32> to vector<14x32xf32>
    %239 = arith.mulf %234, %238 : vector<14x32xf32>
    %240 = vector.broadcast %220 : vector<1x32xf32> to vector<14x32xf32>
    %241 = arith.mulf %239, %240 : vector<14x32xf32>
    %242 = vector.broadcast %221 : vector<1x32xf32> to vector<14x32xf32>
    %243 = arith.addf %241, %242 : vector<14x32xf32>
    %c0_103 = arith.constant 0 : index
    %c0_104 = arith.constant 0 : index
    %244 = vector.load %arg5[%c0_103, %c0_104] : memref<32x64xf32, #tpu.memory_space<vmem>>, vector<32x64xf32>
    %cst_105 = arith.constant dense<0.000000e+00> : vector<14x64xf32>
    %245 = tpu.matmul %243, %244, %cst_105 {dimension_numbers = #tpu.dot_dimension_numbers<[1], [0], [0], [1], [0, 0, 1, 1], [], []>} : vector<14x32xf32>, vector<32x64xf32>, vector<14x64xf32> -> vector<14x64xf32>
    %c0_106 = arith.constant 0 : index
    %c0_107 = arith.constant 0 : index
    %246 = vector.load %arg6[%c0_106, %c0_107] : memref<1x64xf32, #tpu.memory_space<vmem>>, vector<1x64xf32>
    %247 = vector.broadcast %246 : vector<1x64xf32> to vector<14x64xf32>
    %248 = arith.addf %245, %247 : vector<14x64xf32>
    %249 = arith.mulf %248, %248 : vector<14x64xf32>
    %250 = arith.mulf %248, %249 : vector<14x64xf32>
    %cst_108 = arith.constant 4.471500e-02 : f32
    %251 = vector.broadcast %cst_108 : f32 to vector<14x64xf32>
    %252 = arith.mulf %251, %250 : vector<14x64xf32>
    %253 = arith.addf %248, %252 : vector<14x64xf32>
    %cst_109 = arith.constant 0.797884583 : f32
    %254 = vector.broadcast %cst_109 : f32 to vector<14x64xf32>
    %255 = arith.mulf %254, %253 : vector<14x64xf32>
    %256 = math.tanh %255 : vector<14x64xf32>
    %cst_110 = arith.constant 1.000000e+00 : f32
    %257 = vector.broadcast %cst_110 : f32 to vector<14x64xf32>
    %258 = arith.addf %257, %256 : vector<14x64xf32>
    %cst_111 = arith.constant 5.000000e-01 : f32
    %259 = vector.broadcast %cst_111 : f32 to vector<14x64xf32>
    %260 = arith.mulf %259, %258 : vector<14x64xf32>
    %261 = arith.mulf %248, %260 : vector<14x64xf32>
    %c0_112 = arith.constant 0 : index
    %c0_113 = arith.constant 0 : index
    %262 = vector.load %arg7[%c0_112, %c0_113] : memref<64x32xf32, #tpu.memory_space<vmem>>, vector<64x32xf32>
    %cst_114 = arith.constant dense<0.000000e+00> : vector<14x32xf32>
    %263 = tpu.matmul %261, %262, %cst_114 {dimension_numbers = #tpu.dot_dimension_numbers<[1], [0], [0], [1], [0, 0, 1, 1], [], []>} : vector<14x64xf32>, vector<64x32xf32>, vector<14x32xf32> -> vector<14x32xf32>
    %c0_115 = arith.constant 0 : index
    %c0_116 = arith.constant 0 : index
    %264 = vector.load %arg8[%c0_115, %c0_116] : memref<1x32xf32, #tpu.memory_space<vmem>>, vector<1x32xf32>
    %265 = vector.broadcast %264 : vector<1x32xf32> to vector<14x32xf32>
    %266 = arith.addf %263, %265 : vector<14x32xf32>
    %267 = arith.addf %243, %266 : vector<14x32xf32>
    %c2_117 = arith.constant 2 : index
    %c0_118 = arith.constant 0 : index
    %268 = vector.load %arg9[%c2_117, %c0_118] : memref<5x32xf32, #tpu.memory_space<vmem>>, vector<1x32xf32>
    %c2_119 = arith.constant 2 : index
    %c0_120 = arith.constant 0 : index
    %269 = vector.load %arg10[%c2_119, %c0_120] : memref<5x32xf32, #tpu.memory_space<vmem>>, vector<1x32xf32>
    %cst_121 = arith.constant dense<0.000000e+00> : vector<14xf32>
    %270 = vector.multi_reduction <add>, %267, %cst_121 [1] : vector<14x32xf32> to vector<14xf32>
    %271 = vector.shape_cast %270 : vector<14xf32> to vector<14x1xf32>
    %cst_122 = arith.constant 3.200000e+01 : f32
    %272 = vector.broadcast %cst_122 : f32 to vector<14x1xf32>
    %273 = arith.divf %271, %272 : vector<14x1xf32>
    %274 = vector.broadcast %273 : vector<14x1xf32> to vector<14x32xf32>
    %275 = arith.subf %267, %274 : vector<14x32xf32>
    %276 = arith.mulf %275, %275 : vector<14x32xf32>
    %cst_123 = arith.constant dense<0.000000e+00> : vector<14xf32>
    %277 = vector.multi_reduction <add>, %276, %cst_123 [1] : vector<14x32xf32> to vector<14xf32>
    %278 = vector.shape_cast %277 : vector<14xf32> to vector<14x1xf32>
    %cst_124 = arith.constant 3.200000e+01 : f32
    %279 = vector.broadcast %cst_124 : f32 to vector<14x1xf32>
    %280 = arith.divf %278, %279 : vector<14x1xf32>
    %281 = vector.broadcast %273 : vector<14x1xf32> to vector<14x32xf32>
    %282 = arith.subf %267, %281 : vector<14x32xf32>
    %cst_125 = arith.constant 9.99999974E-6 : f32
    %283 = vector.broadcast %cst_125 : f32 to vector<14x1xf32>
    %284 = arith.addf %280, %283 : vector<14x1xf32>
    %285 = math.rsqrt %284 : vector<14x1xf32>
    %286 = vector.broadcast %285 : vector<14x1xf32> to vector<14x32xf32>
    %287 = arith.mulf %282, %286 : vector<14x32xf32>
    %288 = vector.broadcast %268 : vector<1x32xf32> to vector<14x32xf32>
    %289 = arith.mulf %287, %288 : vector<14x32xf32>
    %290 = vector.broadcast %269 : vector<1x32xf32> to vector<14x32xf32>
    %291 = arith.addf %289, %290 : vector<14x32xf32>
    %c8 = arith.constant 8 : index
    %c0_126 = arith.constant 0 : index
    %c0_127 = arith.constant 0 : index
    %292 = vector.load %arg3[%c8, %c0_126, %c0_127] : memref<16x32x32xf32, #tpu.memory_space<vmem>>, vector<1x32x32xf32>
    %293 = vector.shape_cast %292 : vector<1x32x32xf32> to vector<32x32xf32>
    %cst_128 = arith.constant dense<0.000000e+00> : vector<16x32xf32>
    %294 = tpu.matmul %3, %293, %cst_128 {dimension_numbers = #tpu.dot_dimension_numbers<[1], [0], [0], [1], [0, 0, 1, 1], [], []>} : vector<16x32xf32>, vector<32x32xf32>, vector<16x32xf32> -> vector<16x32xf32>
    %c8_129 = arith.constant 8 : index
    %c0_130 = arith.constant 0 : index
    %295 = vector.load %arg4[%c8_129, %c0_130] : memref<16x32xf32, #tpu.memory_space<vmem>>, vector<1x32xf32>
    %296 = vector.broadcast %295 : vector<1x32xf32> to vector<16x32xf32>
    %297 = arith.addf %294, %296 : vector<16x32xf32>
    %c9 = arith.constant 9 : index
    %c0_131 = arith.constant 0 : index
    %c0_132 = arith.constant 0 : index
    %298 = vector.load %arg3[%c9, %c0_131, %c0_132] : memref<16x32x32xf32, #tpu.memory_space<vmem>>, vector<1x32x32xf32>
    %299 = vector.shape_cast %298 : vector<1x32x32xf32> to vector<32x32xf32>
    %cst_133 = arith.constant dense<0.000000e+00> : vector<14x32xf32>
    %300 = tpu.matmul %291, %299, %cst_133 {dimension_numbers = #tpu.dot_dimension_numbers<[1], [0], [0], [1], [0, 0, 1, 1], [], []>} : vector<14x32xf32>, vector<32x32xf32>, vector<14x32xf32> -> vector<14x32xf32>
    %c9_134 = arith.constant 9 : index
    %c0_135 = arith.constant 0 : index
    %301 = vector.load %arg4[%c9_134, %c0_135] : memref<16x32xf32, #tpu.memory_space<vmem>>, vector<1x32xf32>
    %302 = vector.broadcast %301 : vector<1x32xf32> to vector<14x32xf32>
    %303 = arith.addf %300, %302 : vector<14x32xf32>
    %c10 = arith.constant 10 : index
    %c0_136 = arith.constant 0 : index
    %c0_137 = arith.constant 0 : index
    %304 = vector.load %arg3[%c10, %c0_136, %c0_137] : memref<16x32x32xf32, #tpu.memory_space<vmem>>, vector<1x32x32xf32>
    %305 = vector.shape_cast %304 : vector<1x32x32xf32> to vector<32x32xf32>
    %cst_138 = arith.constant dense<0.000000e+00> : vector<14x32xf32>
    %306 = tpu.matmul %291, %305, %cst_138 {dimension_numbers = #tpu.dot_dimension_numbers<[1], [0], [0], [1], [0, 0, 1, 1], [], []>} : vector<14x32xf32>, vector<32x32xf32>, vector<14x32xf32> -> vector<14x32xf32>
    %c10_139 = arith.constant 10 : index
    %c0_140 = arith.constant 0 : index
    %307 = vector.load %arg4[%c10_139, %c0_140] : memref<16x32xf32, #tpu.memory_space<vmem>>, vector<1x32xf32>
    %308 = vector.broadcast %307 : vector<1x32xf32> to vector<14x32xf32>
    %309 = arith.addf %306, %308 : vector<14x32xf32>
    %310 = vector.extract_strided_slice %297 {offsets = [0, 0], sizes = [8, 16], strides = [1, 1]} : vector<16x32xf32> to vector<8x16xf32>
    %311 = vector.extract_strided_slice %303 {offsets = [0, 0], sizes = [7, 16], strides = [1, 1]} : vector<14x32xf32> to vector<7x16xf32>
    %312 = vector.extract_strided_slice %309 {offsets = [0, 0], sizes = [7, 16], strides = [1, 1]} : vector<14x32xf32> to vector<7x16xf32>
    %cst_141 = arith.constant dense<0.000000e+00> : vector<8x7xf32>
    %313 = tpu.matmul %310, %311, %cst_141 {dimension_numbers = #tpu.dot_dimension_numbers<[1], [1], [0], [0], [0, 0, 1, 0], [], []>} : vector<8x16xf32>, vector<7x16xf32>, vector<8x7xf32> -> vector<8x7xf32>
    %cst_142 = arith.constant 2.500000e-01 : f32
    %314 = vector.broadcast %cst_142 : f32 to vector<8x7xf32>
    %315 = arith.mulf %313, %314 : vector<8x7xf32>
    %cst_143 = arith.constant dense<0xFF800000> : vector<8xf32>
    %316 = vector.multi_reduction <maximumf>, %315, %cst_143 [1] : vector<8x7xf32> to vector<8xf32>
    %317 = vector.shape_cast %316 : vector<8xf32> to vector<8x1xf32>
    %318 = vector.broadcast %317 : vector<8x1xf32> to vector<8x7xf32>
    %319 = arith.subf %315, %318 : vector<8x7xf32>
    %320 = math.exp %319 : vector<8x7xf32>
    %cst_144 = arith.constant dense<0.000000e+00> : vector<8xf32>
    %321 = vector.multi_reduction <add>, %320, %cst_144 [1] : vector<8x7xf32> to vector<8xf32>
    %322 = vector.shape_cast %321 : vector<8xf32> to vector<8x1xf32>
    %323 = tpu.reciprocal %322 {approx = true} : vector<8x1xf32> -> vector<8x1xf32>
    %324 = vector.broadcast %323 : vector<8x1xf32> to vector<8x7xf32>
    %325 = arith.mulf %320, %324 : vector<8x7xf32>
    %cst_145 = arith.constant dense<0.000000e+00> : vector<8x16xf32>
    %326 = tpu.matmul %325, %312, %cst_145 {dimension_numbers = #tpu.dot_dimension_numbers<[1], [0], [0], [1], [0, 0, 1, 1], [], []>} : vector<8x7xf32>, vector<7x16xf32>, vector<8x16xf32> -> vector<8x16xf32>
    %327 = vector.extract_strided_slice %297 {offsets = [0, 16], sizes = [8, 16], strides = [1, 1]} : vector<16x32xf32> to vector<8x16xf32>
    %328 = vector.extract_strided_slice %303 {offsets = [0, 16], sizes = [7, 16], strides = [1, 1]} : vector<14x32xf32> to vector<7x16xf32>
    %329 = vector.extract_strided_slice %309 {offsets = [0, 16], sizes = [7, 16], strides = [1, 1]} : vector<14x32xf32> to vector<7x16xf32>
    %cst_146 = arith.constant dense<0.000000e+00> : vector<8x7xf32>
    %330 = tpu.matmul %327, %328, %cst_146 {dimension_numbers = #tpu.dot_dimension_numbers<[1], [1], [0], [0], [0, 0, 1, 0], [], []>} : vector<8x16xf32>, vector<7x16xf32>, vector<8x7xf32> -> vector<8x7xf32>
    %cst_147 = arith.constant 2.500000e-01 : f32
    %331 = vector.broadcast %cst_147 : f32 to vector<8x7xf32>
    %332 = arith.mulf %330, %331 : vector<8x7xf32>
    %cst_148 = arith.constant dense<0xFF800000> : vector<8xf32>
    %333 = vector.multi_reduction <maximumf>, %332, %cst_148 [1] : vector<8x7xf32> to vector<8xf32>
    %334 = vector.shape_cast %333 : vector<8xf32> to vector<8x1xf32>
    %335 = vector.broadcast %334 : vector<8x1xf32> to vector<8x7xf32>
    %336 = arith.subf %332, %335 : vector<8x7xf32>
    %337 = math.exp %336 : vector<8x7xf32>
    %cst_149 = arith.constant dense<0.000000e+00> : vector<8xf32>
    %338 = vector.multi_reduction <add>, %337, %cst_149 [1] : vector<8x7xf32> to vector<8xf32>
    %339 = vector.shape_cast %338 : vector<8xf32> to vector<8x1xf32>
    %340 = tpu.reciprocal %339 {approx = true} : vector<8x1xf32> -> vector<8x1xf32>
    %341 = vector.broadcast %340 : vector<8x1xf32> to vector<8x7xf32>
    %342 = arith.mulf %337, %341 : vector<8x7xf32>
    %cst_150 = arith.constant dense<0.000000e+00> : vector<8x16xf32>
    %343 = tpu.matmul %342, %329, %cst_150 {dimension_numbers = #tpu.dot_dimension_numbers<[1], [0], [0], [1], [0, 0, 1, 1], [], []>} : vector<8x7xf32>, vector<7x16xf32>, vector<8x16xf32> -> vector<8x16xf32>
    %344 = tpu.concatenate %326, %343 in 1 : vector<8x16xf32>, vector<8x16xf32> -> vector<8x32xf32>
    %345 = vector.extract_strided_slice %297 {offsets = [8, 0], sizes = [8, 16], strides = [1, 1]} : vector<16x32xf32> to vector<8x16xf32>
    %346 = vector.extract_strided_slice %303 {offsets = [7, 0], sizes = [7, 16], strides = [1, 1]} : vector<14x32xf32> to vector<7x16xf32>
    %347 = vector.extract_strided_slice %309 {offsets = [7, 0], sizes = [7, 16], strides = [1, 1]} : vector<14x32xf32> to vector<7x16xf32>
    %cst_151 = arith.constant dense<0.000000e+00> : vector<8x7xf32>
    %348 = tpu.matmul %345, %346, %cst_151 {dimension_numbers = #tpu.dot_dimension_numbers<[1], [1], [0], [0], [0, 0, 1, 0], [], []>} : vector<8x16xf32>, vector<7x16xf32>, vector<8x7xf32> -> vector<8x7xf32>
    %cst_152 = arith.constant 2.500000e-01 : f32
    %349 = vector.broadcast %cst_152 : f32 to vector<8x7xf32>
    %350 = arith.mulf %348, %349 : vector<8x7xf32>
    %cst_153 = arith.constant dense<0xFF800000> : vector<8xf32>
    %351 = vector.multi_reduction <maximumf>, %350, %cst_153 [1] : vector<8x7xf32> to vector<8xf32>
    %352 = vector.shape_cast %351 : vector<8xf32> to vector<8x1xf32>
    %353 = vector.broadcast %352 : vector<8x1xf32> to vector<8x7xf32>
    %354 = arith.subf %350, %353 : vector<8x7xf32>
    %355 = math.exp %354 : vector<8x7xf32>
    %cst_154 = arith.constant dense<0.000000e+00> : vector<8xf32>
    %356 = vector.multi_reduction <add>, %355, %cst_154 [1] : vector<8x7xf32> to vector<8xf32>
    %357 = vector.shape_cast %356 : vector<8xf32> to vector<8x1xf32>
    %358 = tpu.reciprocal %357 {approx = true} : vector<8x1xf32> -> vector<8x1xf32>
    %359 = vector.broadcast %358 : vector<8x1xf32> to vector<8x7xf32>
    %360 = arith.mulf %355, %359 : vector<8x7xf32>
    %cst_155 = arith.constant dense<0.000000e+00> : vector<8x16xf32>
    %361 = tpu.matmul %360, %347, %cst_155 {dimension_numbers = #tpu.dot_dimension_numbers<[1], [0], [0], [1], [0, 0, 1, 1], [], []>} : vector<8x7xf32>, vector<7x16xf32>, vector<8x16xf32> -> vector<8x16xf32>
    %362 = vector.extract_strided_slice %297 {offsets = [8, 16], sizes = [8, 16], strides = [1, 1]} : vector<16x32xf32> to vector<8x16xf32>
    %363 = vector.extract_strided_slice %303 {offsets = [7, 16], sizes = [7, 16], strides = [1, 1]} : vector<14x32xf32> to vector<7x16xf32>
    %364 = vector.extract_strided_slice %309 {offsets = [7, 16], sizes = [7, 16], strides = [1, 1]} : vector<14x32xf32> to vector<7x16xf32>
    %cst_156 = arith.constant dense<0.000000e+00> : vector<8x7xf32>
    %365 = tpu.matmul %362, %363, %cst_156 {dimension_numbers = #tpu.dot_dimension_numbers<[1], [1], [0], [0], [0, 0, 1, 0], [], []>} : vector<8x16xf32>, vector<7x16xf32>, vector<8x7xf32> -> vector<8x7xf32>
    %cst_157 = arith.constant 2.500000e-01 : f32
    %366 = vector.broadcast %cst_157 : f32 to vector<8x7xf32>
    %367 = arith.mulf %365, %366 : vector<8x7xf32>
    %cst_158 = arith.constant dense<0xFF800000> : vector<8xf32>
    %368 = vector.multi_reduction <maximumf>, %367, %cst_158 [1] : vector<8x7xf32> to vector<8xf32>
    %369 = vector.shape_cast %368 : vector<8xf32> to vector<8x1xf32>
    %370 = vector.broadcast %369 : vector<8x1xf32> to vector<8x7xf32>
    %371 = arith.subf %367, %370 : vector<8x7xf32>
    %372 = math.exp %371 : vector<8x7xf32>
    %cst_159 = arith.constant dense<0.000000e+00> : vector<8xf32>
    %373 = vector.multi_reduction <add>, %372, %cst_159 [1] : vector<8x7xf32> to vector<8xf32>
    %374 = vector.shape_cast %373 : vector<8xf32> to vector<8x1xf32>
    %375 = tpu.reciprocal %374 {approx = true} : vector<8x1xf32> -> vector<8x1xf32>
    %376 = vector.broadcast %375 : vector<8x1xf32> to vector<8x7xf32>
    %377 = arith.mulf %372, %376 : vector<8x7xf32>
    %cst_160 = arith.constant dense<0.000000e+00> : vector<8x16xf32>
    %378 = tpu.matmul %377, %364, %cst_160 {dimension_numbers = #tpu.dot_dimension_numbers<[1], [0], [0], [1], [0, 0, 1, 1], [], []>} : vector<8x7xf32>, vector<7x16xf32>, vector<8x16xf32> -> vector<8x16xf32>
    %379 = tpu.concatenate %361, %378 in 1 : vector<8x16xf32>, vector<8x16xf32> -> vector<8x32xf32>
    %380 = tpu.concatenate %344, %379 in 0 : vector<8x32xf32>, vector<8x32xf32> -> vector<16x32xf32>
    %c11 = arith.constant 11 : index
    %c0_161 = arith.constant 0 : index
    %c0_162 = arith.constant 0 : index
    %381 = vector.load %arg3[%c11, %c0_161, %c0_162] : memref<16x32x32xf32, #tpu.memory_space<vmem>>, vector<1x32x32xf32>
    %382 = vector.shape_cast %381 : vector<1x32x32xf32> to vector<32x32xf32>
    %cst_163 = arith.constant dense<0.000000e+00> : vector<16x32xf32>
    %383 = tpu.matmul %380, %382, %cst_163 {dimension_numbers = #tpu.dot_dimension_numbers<[1], [0], [0], [1], [0, 0, 1, 1], [], []>} : vector<16x32xf32>, vector<32x32xf32>, vector<16x32xf32> -> vector<16x32xf32>
    %c11_164 = arith.constant 11 : index
    %c0_165 = arith.constant 0 : index
    %384 = vector.load %arg4[%c11_164, %c0_165] : memref<16x32xf32, #tpu.memory_space<vmem>>, vector<1x32xf32>
    %385 = vector.broadcast %384 : vector<1x32xf32> to vector<16x32xf32>
    %386 = arith.addf %383, %385 : vector<16x32xf32>
    %387 = arith.addf %1, %386 : vector<16x32xf32>
    %c3_166 = arith.constant 3 : index
    %c0_167 = arith.constant 0 : index
    %388 = vector.load %arg9[%c3_166, %c0_167] : memref<5x32xf32, #tpu.memory_space<vmem>>, vector<1x32xf32>
    %c3_168 = arith.constant 3 : index
    %c0_169 = arith.constant 0 : index
    %389 = vector.load %arg10[%c3_168, %c0_169] : memref<5x32xf32, #tpu.memory_space<vmem>>, vector<1x32xf32>
    %cst_170 = arith.constant dense<0.000000e+00> : vector<16xf32>
    %390 = vector.multi_reduction <add>, %387, %cst_170 [1] : vector<16x32xf32> to vector<16xf32>
    %391 = vector.shape_cast %390 : vector<16xf32> to vector<16x1xf32>
    %cst_171 = arith.constant 3.200000e+01 : f32
    %392 = vector.broadcast %cst_171 : f32 to vector<16x1xf32>
    %393 = arith.divf %391, %392 : vector<16x1xf32>
    %394 = vector.broadcast %393 : vector<16x1xf32> to vector<16x32xf32>
    %395 = arith.subf %387, %394 : vector<16x32xf32>
    %396 = arith.mulf %395, %395 : vector<16x32xf32>
    %cst_172 = arith.constant dense<0.000000e+00> : vector<16xf32>
    %397 = vector.multi_reduction <add>, %396, %cst_172 [1] : vector<16x32xf32> to vector<16xf32>
    %398 = vector.shape_cast %397 : vector<16xf32> to vector<16x1xf32>
    %cst_173 = arith.constant 3.200000e+01 : f32
    %399 = vector.broadcast %cst_173 : f32 to vector<16x1xf32>
    %400 = arith.divf %398, %399 : vector<16x1xf32>
    %401 = vector.broadcast %393 : vector<16x1xf32> to vector<16x32xf32>
    %402 = arith.subf %387, %401 : vector<16x32xf32>
    %cst_174 = arith.constant 9.99999974E-6 : f32
    %403 = vector.broadcast %cst_174 : f32 to vector<16x1xf32>
    %404 = arith.addf %400, %403 : vector<16x1xf32>
    %405 = math.rsqrt %404 : vector<16x1xf32>
    %406 = vector.broadcast %405 : vector<16x1xf32> to vector<16x32xf32>
    %407 = arith.mulf %402, %406 : vector<16x32xf32>
    %408 = vector.broadcast %388 : vector<1x32xf32> to vector<16x32xf32>
    %409 = arith.mulf %407, %408 : vector<16x32xf32>
    %410 = vector.broadcast %389 : vector<1x32xf32> to vector<16x32xf32>
    %411 = arith.addf %409, %410 : vector<16x32xf32>
    %412 = arith.addf %411, %2 : vector<16x32xf32>
    %c12 = arith.constant 12 : index
    %c0_175 = arith.constant 0 : index
    %c0_176 = arith.constant 0 : index
    %413 = vector.load %arg3[%c12, %c0_175, %c0_176] : memref<16x32x32xf32, #tpu.memory_space<vmem>>, vector<1x32x32xf32>
    %414 = vector.shape_cast %413 : vector<1x32x32xf32> to vector<32x32xf32>
    %cst_177 = arith.constant dense<0.000000e+00> : vector<14x32xf32>
    %415 = tpu.matmul %291, %414, %cst_177 {dimension_numbers = #tpu.dot_dimension_numbers<[1], [0], [0], [1], [0, 0, 1, 1], [], []>} : vector<14x32xf32>, vector<32x32xf32>, vector<14x32xf32> -> vector<14x32xf32>
    %c12_178 = arith.constant 12 : index
    %c0_179 = arith.constant 0 : index
    %416 = vector.load %arg4[%c12_178, %c0_179] : memref<16x32xf32, #tpu.memory_space<vmem>>, vector<1x32xf32>
    %417 = vector.broadcast %416 : vector<1x32xf32> to vector<14x32xf32>
    %418 = arith.addf %415, %417 : vector<14x32xf32>
    %c13 = arith.constant 13 : index
    %c0_180 = arith.constant 0 : index
    %c0_181 = arith.constant 0 : index
    %419 = vector.load %arg3[%c13, %c0_180, %c0_181] : memref<16x32x32xf32, #tpu.memory_space<vmem>>, vector<1x32x32xf32>
    %420 = vector.shape_cast %419 : vector<1x32x32xf32> to vector<32x32xf32>
    %cst_182 = arith.constant dense<0.000000e+00> : vector<16x32xf32>
    %421 = tpu.matmul %412, %420, %cst_182 {dimension_numbers = #tpu.dot_dimension_numbers<[1], [0], [0], [1], [0, 0, 1, 1], [], []>} : vector<16x32xf32>, vector<32x32xf32>, vector<16x32xf32> -> vector<16x32xf32>
    %c13_183 = arith.constant 13 : index
    %c0_184 = arith.constant 0 : index
    %422 = vector.load %arg4[%c13_183, %c0_184] : memref<16x32xf32, #tpu.memory_space<vmem>>, vector<1x32xf32>
    %423 = vector.broadcast %422 : vector<1x32xf32> to vector<16x32xf32>
    %424 = arith.addf %421, %423 : vector<16x32xf32>
    %c14 = arith.constant 14 : index
    %c0_185 = arith.constant 0 : index
    %c0_186 = arith.constant 0 : index
    %425 = vector.load %arg3[%c14, %c0_185, %c0_186] : memref<16x32x32xf32, #tpu.memory_space<vmem>>, vector<1x32x32xf32>
    %426 = vector.shape_cast %425 : vector<1x32x32xf32> to vector<32x32xf32>
    %cst_187 = arith.constant dense<0.000000e+00> : vector<16x32xf32>
    %427 = tpu.matmul %411, %426, %cst_187 {dimension_numbers = #tpu.dot_dimension_numbers<[1], [0], [0], [1], [0, 0, 1, 1], [], []>} : vector<16x32xf32>, vector<32x32xf32>, vector<16x32xf32> -> vector<16x32xf32>
    %c14_188 = arith.constant 14 : index
    %c0_189 = arith.constant 0 : index
    %428 = vector.load %arg4[%c14_188, %c0_189] : memref<16x32xf32, #tpu.memory_space<vmem>>, vector<1x32xf32>
    %429 = vector.broadcast %428 : vector<1x32xf32> to vector<16x32xf32>
    %430 = arith.addf %427, %429 : vector<16x32xf32>
    %431 = vector.extract_strided_slice %418 {offsets = [0, 0], sizes = [7, 16], strides = [1, 1]} : vector<14x32xf32> to vector<7x16xf32>
    %432 = vector.extract_strided_slice %424 {offsets = [0, 0], sizes = [8, 16], strides = [1, 1]} : vector<16x32xf32> to vector<8x16xf32>
    %433 = vector.extract_strided_slice %430 {offsets = [0, 0], sizes = [8, 16], strides = [1, 1]} : vector<16x32xf32> to vector<8x16xf32>
    %cst_190 = arith.constant dense<0.000000e+00> : vector<7x8xf32>
    %434 = tpu.matmul %431, %432, %cst_190 {dimension_numbers = #tpu.dot_dimension_numbers<[1], [1], [0], [0], [0, 0, 1, 0], [], []>} : vector<7x16xf32>, vector<8x16xf32>, vector<7x8xf32> -> vector<7x8xf32>
    %cst_191 = arith.constant 2.500000e-01 : f32
    %435 = vector.broadcast %cst_191 : f32 to vector<7x8xf32>
    %436 = arith.mulf %434, %435 : vector<7x8xf32>
    %cst_192 = arith.constant dense<0xFF800000> : vector<7xf32>
    %437 = vector.multi_reduction <maximumf>, %436, %cst_192 [1] : vector<7x8xf32> to vector<7xf32>
    %438 = vector.shape_cast %437 : vector<7xf32> to vector<7x1xf32>
    %439 = vector.broadcast %438 : vector<7x1xf32> to vector<7x8xf32>
    %440 = arith.subf %436, %439 : vector<7x8xf32>
    %441 = math.exp %440 : vector<7x8xf32>
    %cst_193 = arith.constant dense<0.000000e+00> : vector<7xf32>
    %442 = vector.multi_reduction <add>, %441, %cst_193 [1] : vector<7x8xf32> to vector<7xf32>
    %443 = vector.shape_cast %442 : vector<7xf32> to vector<7x1xf32>
    %444 = tpu.reciprocal %443 {approx = true} : vector<7x1xf32> -> vector<7x1xf32>
    %445 = vector.broadcast %444 : vector<7x1xf32> to vector<7x8xf32>
    %446 = arith.mulf %441, %445 : vector<7x8xf32>
    %cst_194 = arith.constant dense<0.000000e+00> : vector<7x16xf32>
    %447 = tpu.matmul %446, %433, %cst_194 {dimension_numbers = #tpu.dot_dimension_numbers<[1], [0], [0], [1], [0, 0, 1, 1], [], []>} : vector<7x8xf32>, vector<8x16xf32>, vector<7x16xf32> -> vector<7x16xf32>
    %448 = vector.extract_strided_slice %418 {offsets = [0, 16], sizes = [7, 16], strides = [1, 1]} : vector<14x32xf32> to vector<7x16xf32>
    %449 = vector.extract_strided_slice %424 {offsets = [0, 16], sizes = [8, 16], strides = [1, 1]} : vector<16x32xf32> to vector<8x16xf32>
    %450 = vector.extract_strided_slice %430 {offsets = [0, 16], sizes = [8, 16], strides = [1, 1]} : vector<16x32xf32> to vector<8x16xf32>
    %cst_195 = arith.constant dense<0.000000e+00> : vector<7x8xf32>
    %451 = tpu.matmul %448, %449, %cst_195 {dimension_numbers = #tpu.dot_dimension_numbers<[1], [1], [0], [0], [0, 0, 1, 0], [], []>} : vector<7x16xf32>, vector<8x16xf32>, vector<7x8xf32> -> vector<7x8xf32>
    %cst_196 = arith.constant 2.500000e-01 : f32
    %452 = vector.broadcast %cst_196 : f32 to vector<7x8xf32>
    %453 = arith.mulf %451, %452 : vector<7x8xf32>
    %cst_197 = arith.constant dense<0xFF800000> : vector<7xf32>
    %454 = vector.multi_reduction <maximumf>, %453, %cst_197 [1] : vector<7x8xf32> to vector<7xf32>
    %455 = vector.shape_cast %454 : vector<7xf32> to vector<7x1xf32>
    %456 = vector.broadcast %455 : vector<7x1xf32> to vector<7x8xf32>
    %457 = arith.subf %453, %456 : vector<7x8xf32>
    %458 = math.exp %457 : vector<7x8xf32>
    %cst_198 = arith.constant dense<0.000000e+00> : vector<7xf32>
    %459 = vector.multi_reduction <add>, %458, %cst_198 [1] : vector<7x8xf32> to vector<7xf32>
    %460 = vector.shape_cast %459 : vector<7xf32> to vector<7x1xf32>
    %461 = tpu.reciprocal %460 {approx = true} : vector<7x1xf32> -> vector<7x1xf32>
    %462 = vector.broadcast %461 : vector<7x1xf32> to vector<7x8xf32>
    %463 = arith.mulf %458, %462 : vector<7x8xf32>
    %cst_199 = arith.constant dense<0.000000e+00> : vector<7x16xf32>
    %464 = tpu.matmul %463, %450, %cst_199 {dimension_numbers = #tpu.dot_dimension_numbers<[1], [0], [0], [1], [0, 0, 1, 1], [], []>} : vector<7x8xf32>, vector<8x16xf32>, vector<7x16xf32> -> vector<7x16xf32>
    %465 = tpu.concatenate %447, %464 in 1 : vector<7x16xf32>, vector<7x16xf32> -> vector<7x32xf32>
    %466 = vector.extract_strided_slice %418 {offsets = [7, 0], sizes = [7, 16], strides = [1, 1]} : vector<14x32xf32> to vector<7x16xf32>
    %467 = vector.extract_strided_slice %424 {offsets = [8, 0], sizes = [8, 16], strides = [1, 1]} : vector<16x32xf32> to vector<8x16xf32>
    %468 = vector.extract_strided_slice %430 {offsets = [8, 0], sizes = [8, 16], strides = [1, 1]} : vector<16x32xf32> to vector<8x16xf32>
    %cst_200 = arith.constant dense<0.000000e+00> : vector<7x8xf32>
    %469 = tpu.matmul %466, %467, %cst_200 {dimension_numbers = #tpu.dot_dimension_numbers<[1], [1], [0], [0], [0, 0, 1, 0], [], []>} : vector<7x16xf32>, vector<8x16xf32>, vector<7x8xf32> -> vector<7x8xf32>
    %cst_201 = arith.constant 2.500000e-01 : f32
    %470 = vector.broadcast %cst_201 : f32 to vector<7x8xf32>
    %471 = arith.mulf %469, %470 : vector<7x8xf32>
    %cst_202 = arith.constant dense<0xFF800000> : vector<7xf32>
    %472 = vector.multi_reduction <maximumf>, %471, %cst_202 [1] : vector<7x8xf32> to vector<7xf32>
    %473 = vector.shape_cast %472 : vector<7xf32> to vector<7x1xf32>
    %474 = vector.broadcast %473 : vector<7x1xf32> to vector<7x8xf32>
    %475 = arith.subf %471, %474 : vector<7x8xf32>
    %476 = math.exp %475 : vector<7x8xf32>
    %cst_203 = arith.constant dense<0.000000e+00> : vector<7xf32>
    %477 = vector.multi_reduction <add>, %476, %cst_203 [1] : vector<7x8xf32> to vector<7xf32>
    %478 = vector.shape_cast %477 : vector<7xf32> to vector<7x1xf32>
    %479 = tpu.reciprocal %478 {approx = true} : vector<7x1xf32> -> vector<7x1xf32>
    %480 = vector.broadcast %479 : vector<7x1xf32> to vector<7x8xf32>
    %481 = arith.mulf %476, %480 : vector<7x8xf32>
    %cst_204 = arith.constant dense<0.000000e+00> : vector<7x16xf32>
    %482 = tpu.matmul %481, %468, %cst_204 {dimension_numbers = #tpu.dot_dimension_numbers<[1], [0], [0], [1], [0, 0, 1, 1], [], []>} : vector<7x8xf32>, vector<8x16xf32>, vector<7x16xf32> -> vector<7x16xf32>
    %483 = vector.extract_strided_slice %418 {offsets = [7, 16], sizes = [7, 16], strides = [1, 1]} : vector<14x32xf32> to vector<7x16xf32>
    %484 = vector.extract_strided_slice %424 {offsets = [8, 16], sizes = [8, 16], strides = [1, 1]} : vector<16x32xf32> to vector<8x16xf32>
    %485 = vector.extract_strided_slice %430 {offsets = [8, 16], sizes = [8, 16], strides = [1, 1]} : vector<16x32xf32> to vector<8x16xf32>
    %cst_205 = arith.constant dense<0.000000e+00> : vector<7x8xf32>
    %486 = tpu.matmul %483, %484, %cst_205 {dimension_numbers = #tpu.dot_dimension_numbers<[1], [1], [0], [0], [0, 0, 1, 0], [], []>} : vector<7x16xf32>, vector<8x16xf32>, vector<7x8xf32> -> vector<7x8xf32>
    %cst_206 = arith.constant 2.500000e-01 : f32
    %487 = vector.broadcast %cst_206 : f32 to vector<7x8xf32>
    %488 = arith.mulf %486, %487 : vector<7x8xf32>
    %cst_207 = arith.constant dense<0xFF800000> : vector<7xf32>
    %489 = vector.multi_reduction <maximumf>, %488, %cst_207 [1] : vector<7x8xf32> to vector<7xf32>
    %490 = vector.shape_cast %489 : vector<7xf32> to vector<7x1xf32>
    %491 = vector.broadcast %490 : vector<7x1xf32> to vector<7x8xf32>
    %492 = arith.subf %488, %491 : vector<7x8xf32>
    %493 = math.exp %492 : vector<7x8xf32>
    %cst_208 = arith.constant dense<0.000000e+00> : vector<7xf32>
    %494 = vector.multi_reduction <add>, %493, %cst_208 [1] : vector<7x8xf32> to vector<7xf32>
    %495 = vector.shape_cast %494 : vector<7xf32> to vector<7x1xf32>
    %496 = tpu.reciprocal %495 {approx = true} : vector<7x1xf32> -> vector<7x1xf32>
    %497 = vector.broadcast %496 : vector<7x1xf32> to vector<7x8xf32>
    %498 = arith.mulf %493, %497 : vector<7x8xf32>
    %cst_209 = arith.constant dense<0.000000e+00> : vector<7x16xf32>
    %499 = tpu.matmul %498, %485, %cst_209 {dimension_numbers = #tpu.dot_dimension_numbers<[1], [0], [0], [1], [0, 0, 1, 1], [], []>} : vector<7x8xf32>, vector<8x16xf32>, vector<7x16xf32> -> vector<7x16xf32>
    %500 = tpu.concatenate %482, %499 in 1 : vector<7x16xf32>, vector<7x16xf32> -> vector<7x32xf32>
    %501 = tpu.concatenate %465, %500 in 0 : vector<7x32xf32>, vector<7x32xf32> -> vector<14x32xf32>
    %c15 = arith.constant 15 : index
    %c0_210 = arith.constant 0 : index
    %c0_211 = arith.constant 0 : index
    %502 = vector.load %arg3[%c15, %c0_210, %c0_211] : memref<16x32x32xf32, #tpu.memory_space<vmem>>, vector<1x32x32xf32>
    %503 = vector.shape_cast %502 : vector<1x32x32xf32> to vector<32x32xf32>
    %cst_212 = arith.constant dense<0.000000e+00> : vector<14x32xf32>
    %504 = tpu.matmul %501, %503, %cst_212 {dimension_numbers = #tpu.dot_dimension_numbers<[1], [0], [0], [1], [0, 0, 1, 1], [], []>} : vector<14x32xf32>, vector<32x32xf32>, vector<14x32xf32> -> vector<14x32xf32>
    %c15_213 = arith.constant 15 : index
    %c0_214 = arith.constant 0 : index
    %505 = vector.load %arg4[%c15_213, %c0_214] : memref<16x32xf32, #tpu.memory_space<vmem>>, vector<1x32xf32>
    %506 = vector.broadcast %505 : vector<1x32xf32> to vector<14x32xf32>
    %507 = arith.addf %504, %506 : vector<14x32xf32>
    %508 = arith.addf %291, %507 : vector<14x32xf32>
    %c4_215 = arith.constant 4 : index
    %c0_216 = arith.constant 0 : index
    %509 = vector.load %arg9[%c4_215, %c0_216] : memref<5x32xf32, #tpu.memory_space<vmem>>, vector<1x32xf32>
    %c4_217 = arith.constant 4 : index
    %c0_218 = arith.constant 0 : index
    %510 = vector.load %arg10[%c4_217, %c0_218] : memref<5x32xf32, #tpu.memory_space<vmem>>, vector<1x32xf32>
    %cst_219 = arith.constant dense<0.000000e+00> : vector<14xf32>
    %511 = vector.multi_reduction <add>, %508, %cst_219 [1] : vector<14x32xf32> to vector<14xf32>
    %512 = vector.shape_cast %511 : vector<14xf32> to vector<14x1xf32>
    %cst_220 = arith.constant 3.200000e+01 : f32
    %513 = vector.broadcast %cst_220 : f32 to vector<14x1xf32>
    %514 = arith.divf %512, %513 : vector<14x1xf32>
    %515 = vector.broadcast %514 : vector<14x1xf32> to vector<14x32xf32>
    %516 = arith.subf %508, %515 : vector<14x32xf32>
    %517 = arith.mulf %516, %516 : vector<14x32xf32>
    %cst_221 = arith.constant dense<0.000000e+00> : vector<14xf32>
    %518 = vector.multi_reduction <add>, %517, %cst_221 [1] : vector<14x32xf32> to vector<14xf32>
    %519 = vector.shape_cast %518 : vector<14xf32> to vector<14x1xf32>
    %cst_222 = arith.constant 3.200000e+01 : f32
    %520 = vector.broadcast %cst_222 : f32 to vector<14x1xf32>
    %521 = arith.divf %519, %520 : vector<14x1xf32>
    %522 = vector.broadcast %514 : vector<14x1xf32> to vector<14x32xf32>
    %523 = arith.subf %508, %522 : vector<14x32xf32>
    %cst_223 = arith.constant 9.99999974E-6 : f32
    %524 = vector.broadcast %cst_223 : f32 to vector<14x1xf32>
    %525 = arith.addf %521, %524 : vector<14x1xf32>
    %526 = math.rsqrt %525 : vector<14x1xf32>
    %527 = vector.broadcast %526 : vector<14x1xf32> to vector<14x32xf32>
    %528 = arith.mulf %523, %527 : vector<14x32xf32>
    %529 = vector.broadcast %509 : vector<1x32xf32> to vector<14x32xf32>
    %530 = arith.mulf %528, %529 : vector<14x32xf32>
    %531 = vector.broadcast %510 : vector<1x32xf32> to vector<14x32xf32>
    %532 = arith.addf %530, %531 : vector<14x32xf32>
    %c0_224 = arith.constant 0 : index
    %c0_225 = arith.constant 0 : index
    %533 = vector.load %arg11[%c0_224, %c0_225] : memref<14x32xf32, #tpu.memory_space<vmem>>, vector<14x32xf32>
    tpu.vector_store %arg11[%c0_224, %c0_225], %532 {strides = array<i32>} : memref<14x32xf32, #tpu.memory_space<vmem>>, vector<14x32xf32>,
    %c0_226 = arith.constant 0 : index
    %c0_227 = arith.constant 0 : index
    %534 = vector.load %arg12[%c0_226, %c0_227] : memref<16x32xf32, #tpu.memory_space<vmem>>, vector<16x32xf32>
    tpu.vector_store %arg12[%c0_226, %c0_227], %411 {strides = array<i32>} : memref<16x32xf32, #tpu.memory_space<vmem>>, vector<16x32xf32>,
    return
  }
}

module attributes {stable_mosaic.version = 11 : i64} {
  func.func @_decoder_head_kernel(%arg0: memref<14x32xf32, #tpu.memory_space<vmem>>, %arg1: memref<16x32xf32, #tpu.memory_space<vmem>>, %arg2: memref<32x8xf32, #tpu.memory_space<vmem>>, %arg3: memref<1x8xf32, #tpu.memory_space<vmem>>, %arg4: memref<4x32x32xf32, #tpu.memory_space<vmem>>, %arg5: memref<4x32xf32, #tpu.memory_space<vmem>>, %arg6: memref<4x32x8xf32, #tpu.memory_space<vmem>>, %arg7: memref<4x8xf32, #tpu.memory_space<vmem>>, %arg8: memref<32x32xf32, #tpu.memory_space<vmem>>, %arg9: memref<1x32xf32, #tpu.memory_space<vmem>>, %arg10: memref<32x4xf32, #tpu.memory_space<vmem>>, %arg11: memref<1x4xf32, #tpu.memory_space<vmem>>, %arg12: memref<8x8xf32, #tpu.memory_space<vmem>>, %arg13: memref<2x4xf32, #tpu.memory_space<vmem>>) attributes {dimension_semantics = [], scalar_prefetch = 0 : i64, scratch_operands = 0 : i64, tpu.core_type = #tpu.core_type<tc>} {
    %c0 = arith.constant 0 : index
    %c0_0 = arith.constant 0 : index
    %0 = vector.load %arg0[%c0, %c0_0] : memref<14x32xf32, #tpu.memory_space<vmem>>, vector<14x32xf32>
    %c0_1 = arith.constant 0 : index
    %c0_2 = arith.constant 0 : index
    %1 = vector.load %arg1[%c0_1, %c0_2] : memref<16x32xf32, #tpu.memory_space<vmem>>, vector<16x32xf32>
    %c0_3 = arith.constant 0 : index
    %c0_4 = arith.constant 0 : index
    %2 = vector.load %arg2[%c0_3, %c0_4] : memref<32x8xf32, #tpu.memory_space<vmem>>, vector<32x8xf32>
    %cst = arith.constant dense<0.000000e+00> : vector<16x8xf32>
    %3 = tpu.matmul %1, %2, %cst {dimension_numbers = #tpu.dot_dimension_numbers<[1], [0], [0], [1], [0, 0, 1, 1], [], []>} : vector<16x32xf32>, vector<32x8xf32>, vector<16x8xf32> -> vector<16x8xf32>
    %c0_5 = arith.constant 0 : index
    %c0_6 = arith.constant 0 : index
    %4 = vector.load %arg3[%c0_5, %c0_6] : memref<1x8xf32, #tpu.memory_space<vmem>>, vector<1x8xf32>
    %5 = vector.broadcast %4 : vector<1x8xf32> to vector<16x8xf32>
    %6 = arith.addf %3, %5 : vector<16x8xf32>
    %7 = arith.mulf %6, %6 : vector<16x8xf32>
    %8 = arith.mulf %6, %7 : vector<16x8xf32>
    %cst_7 = arith.constant 4.471500e-02 : f32
    %9 = vector.broadcast %cst_7 : f32 to vector<16x8xf32>
    %10 = arith.mulf %9, %8 : vector<16x8xf32>
    %11 = arith.addf %6, %10 : vector<16x8xf32>
    %cst_8 = arith.constant 0.797884583 : f32
    %12 = vector.broadcast %cst_8 : f32 to vector<16x8xf32>
    %13 = arith.mulf %12, %11 : vector<16x8xf32>
    %14 = math.tanh %13 : vector<16x8xf32>
    %cst_9 = arith.constant 1.000000e+00 : f32
    %15 = vector.broadcast %cst_9 : f32 to vector<16x8xf32>
    %16 = arith.addf %15, %14 : vector<16x8xf32>
    %cst_10 = arith.constant 5.000000e-01 : f32
    %17 = vector.broadcast %cst_10 : f32 to vector<16x8xf32>
    %18 = arith.mulf %17, %16 : vector<16x8xf32>
    %19 = arith.mulf %6, %18 : vector<16x8xf32>
    %20 = vector.extract_strided_slice %19 {offsets = [0, 0], sizes = [8, 8], strides = [1, 1]} : vector<16x8xf32> to vector<8x8xf32>
    %21 = vector.extract_strided_slice %0 {offsets = [0, 0], sizes = [1, 32], strides = [1, 1]} : vector<14x32xf32> to vector<1x32xf32>
    %22 = vector.extract_strided_slice %0 {offsets = [1, 0], sizes = [1, 32], strides = [1, 1]} : vector<14x32xf32> to vector<1x32xf32>
    %c0_11 = arith.constant 0 : index
    %c0_12 = arith.constant 0 : index
    %c0_13 = arith.constant 0 : index
    %23 = vector.load %arg4[%c0_11, %c0_12, %c0_13] : memref<4x32x32xf32, #tpu.memory_space<vmem>>, vector<1x32x32xf32>
    %24 = vector.shape_cast %23 : vector<1x32x32xf32> to vector<32x32xf32>
    %cst_14 = arith.constant dense<0.000000e+00> : vector<1x32xf32>
    %25 = tpu.matmul %22, %24, %cst_14 {dimension_numbers = #tpu.dot_dimension_numbers<[1], [0], [0], [1], [0, 0, 1, 1], [], []>} : vector<1x32xf32>, vector<32x32xf32>, vector<1x32xf32> -> vector<1x32xf32>
    %c0_15 = arith.constant 0 : index
    %c0_16 = arith.constant 0 : index
    %26 = vector.load %arg5[%c0_15, %c0_16] : memref<4x32xf32, #tpu.memory_space<vmem>>, vector<1x32xf32>
    %27 = arith.addf %25, %26 : vector<1x32xf32>
    %cst_17 = arith.constant 0.000000e+00 : f32
    %28 = vector.broadcast %cst_17 : f32 to vector<1x32xf32>
    %29 = arith.maximumf %27, %28 : vector<1x32xf32>
    %c0_18 = arith.constant 0 : index
    %c0_19 = arith.constant 0 : index
    %c0_20 = arith.constant 0 : index
    %30 = vector.load %arg6[%c0_18, %c0_19, %c0_20] : memref<4x32x8xf32, #tpu.memory_space<vmem>>, vector<1x32x8xf32>
    %31 = vector.shape_cast %30 : vector<1x32x8xf32> to vector<32x8xf32>
    %cst_21 = arith.constant dense<0.000000e+00> : vector<1x8xf32>
    %32 = tpu.matmul %29, %31, %cst_21 {dimension_numbers = #tpu.dot_dimension_numbers<[1], [0], [0], [1], [0, 0, 1, 1], [], []>} : vector<1x32xf32>, vector<32x8xf32>, vector<1x8xf32> -> vector<1x8xf32>
    %c0_22 = arith.constant 0 : index
    %c0_23 = arith.constant 0 : index
    %33 = vector.load %arg7[%c0_22, %c0_23] : memref<4x8xf32, #tpu.memory_space<vmem>>, vector<1x8xf32>
    %34 = arith.addf %32, %33 : vector<1x8xf32>
    %cst_24 = arith.constant dense<0.000000e+00> : vector<1x8xf32>
    %35 = tpu.matmul %34, %20, %cst_24 {dimension_numbers = #tpu.dot_dimension_numbers<[1], [1], [0], [0], [0, 0, 1, 0], [], []>} : vector<1x8xf32>, vector<8x8xf32>, vector<1x8xf32> -> vector<1x8xf32>
    %36 = vector.extract_strided_slice %0 {offsets = [2, 0], sizes = [1, 32], strides = [1, 1]} : vector<14x32xf32> to vector<1x32xf32>
    %c1 = arith.constant 1 : index
    %c0_25 = arith.constant 0 : index
    %c0_26 = arith.constant 0 : index
    %37 = vector.load %arg4[%c1, %c0_25, %c0_26] : memref<4x32x32xf32, #tpu.memory_space<vmem>>, vector<1x32x32xf32>
    %38 = vector.shape_cast %37 : vector<1x32x32xf32> to vector<32x32xf32>
    %cst_27 = arith.constant dense<0.000000e+00> : vector<1x32xf32>
    %39 = tpu.matmul %36, %38, %cst_27 {dimension_numbers = #tpu.dot_dimension_numbers<[1], [0], [0], [1], [0, 0, 1, 1], [], []>} : vector<1x32xf32>, vector<32x32xf32>, vector<1x32xf32> -> vector<1x32xf32>
    %c1_28 = arith.constant 1 : index
    %c0_29 = arith.constant 0 : index
    %40 = vector.load %arg5[%c1_28, %c0_29] : memref<4x32xf32, #tpu.memory_space<vmem>>, vector<1x32xf32>
    %41 = arith.addf %39, %40 : vector<1x32xf32>
    %cst_30 = arith.constant 0.000000e+00 : f32
    %42 = vector.broadcast %cst_30 : f32 to vector<1x32xf32>
    %43 = arith.maximumf %41, %42 : vector<1x32xf32>
    %c1_31 = arith.constant 1 : index
    %c0_32 = arith.constant 0 : index
    %c0_33 = arith.constant 0 : index
    %44 = vector.load %arg6[%c1_31, %c0_32, %c0_33] : memref<4x32x8xf32, #tpu.memory_space<vmem>>, vector<1x32x8xf32>
    %45 = vector.shape_cast %44 : vector<1x32x8xf32> to vector<32x8xf32>
    %cst_34 = arith.constant dense<0.000000e+00> : vector<1x8xf32>
    %46 = tpu.matmul %43, %45, %cst_34 {dimension_numbers = #tpu.dot_dimension_numbers<[1], [0], [0], [1], [0, 0, 1, 1], [], []>} : vector<1x32xf32>, vector<32x8xf32>, vector<1x8xf32> -> vector<1x8xf32>
    %c1_35 = arith.constant 1 : index
    %c0_36 = arith.constant 0 : index
    %47 = vector.load %arg7[%c1_35, %c0_36] : memref<4x8xf32, #tpu.memory_space<vmem>>, vector<1x8xf32>
    %48 = arith.addf %46, %47 : vector<1x8xf32>
    %cst_37 = arith.constant dense<0.000000e+00> : vector<1x8xf32>
    %49 = tpu.matmul %48, %20, %cst_37 {dimension_numbers = #tpu.dot_dimension_numbers<[1], [1], [0], [0], [0, 0, 1, 0], [], []>} : vector<1x8xf32>, vector<8x8xf32>, vector<1x8xf32> -> vector<1x8xf32>
    %50 = vector.extract_strided_slice %0 {offsets = [3, 0], sizes = [1, 32], strides = [1, 1]} : vector<14x32xf32> to vector<1x32xf32>
    %c2 = arith.constant 2 : index
    %c0_38 = arith.constant 0 : index
    %c0_39 = arith.constant 0 : index
    %51 = vector.load %arg4[%c2, %c0_38, %c0_39] : memref<4x32x32xf32, #tpu.memory_space<vmem>>, vector<1x32x32xf32>
    %52 = vector.shape_cast %51 : vector<1x32x32xf32> to vector<32x32xf32>
    %cst_40 = arith.constant dense<0.000000e+00> : vector<1x32xf32>
    %53 = tpu.matmul %50, %52, %cst_40 {dimension_numbers = #tpu.dot_dimension_numbers<[1], [0], [0], [1], [0, 0, 1, 1], [], []>} : vector<1x32xf32>, vector<32x32xf32>, vector<1x32xf32> -> vector<1x32xf32>
    %c2_41 = arith.constant 2 : index
    %c0_42 = arith.constant 0 : index
    %54 = vector.load %arg5[%c2_41, %c0_42] : memref<4x32xf32, #tpu.memory_space<vmem>>, vector<1x32xf32>
    %55 = arith.addf %53, %54 : vector<1x32xf32>
    %cst_43 = arith.constant 0.000000e+00 : f32
    %56 = vector.broadcast %cst_43 : f32 to vector<1x32xf32>
    %57 = arith.maximumf %55, %56 : vector<1x32xf32>
    %c2_44 = arith.constant 2 : index
    %c0_45 = arith.constant 0 : index
    %c0_46 = arith.constant 0 : index
    %58 = vector.load %arg6[%c2_44, %c0_45, %c0_46] : memref<4x32x8xf32, #tpu.memory_space<vmem>>, vector<1x32x8xf32>
    %59 = vector.shape_cast %58 : vector<1x32x8xf32> to vector<32x8xf32>
    %cst_47 = arith.constant dense<0.000000e+00> : vector<1x8xf32>
    %60 = tpu.matmul %57, %59, %cst_47 {dimension_numbers = #tpu.dot_dimension_numbers<[1], [0], [0], [1], [0, 0, 1, 1], [], []>} : vector<1x32xf32>, vector<32x8xf32>, vector<1x8xf32> -> vector<1x8xf32>
    %c2_48 = arith.constant 2 : index
    %c0_49 = arith.constant 0 : index
    %61 = vector.load %arg7[%c2_48, %c0_49] : memref<4x8xf32, #tpu.memory_space<vmem>>, vector<1x8xf32>
    %62 = arith.addf %60, %61 : vector<1x8xf32>
    %cst_50 = arith.constant dense<0.000000e+00> : vector<1x8xf32>
    %63 = tpu.matmul %62, %20, %cst_50 {dimension_numbers = #tpu.dot_dimension_numbers<[1], [1], [0], [0], [0, 0, 1, 0], [], []>} : vector<1x8xf32>, vector<8x8xf32>, vector<1x8xf32> -> vector<1x8xf32>
    %64 = vector.extract_strided_slice %0 {offsets = [4, 0], sizes = [1, 32], strides = [1, 1]} : vector<14x32xf32> to vector<1x32xf32>
    %c3 = arith.constant 3 : index
    %c0_51 = arith.constant 0 : index
    %c0_52 = arith.constant 0 : index
    %65 = vector.load %arg4[%c3, %c0_51, %c0_52] : memref<4x32x32xf32, #tpu.memory_space<vmem>>, vector<1x32x32xf32>
    %66 = vector.shape_cast %65 : vector<1x32x32xf32> to vector<32x32xf32>
    %cst_53 = arith.constant dense<0.000000e+00> : vector<1x32xf32>
    %67 = tpu.matmul %64, %66, %cst_53 {dimension_numbers = #tpu.dot_dimension_numbers<[1], [0], [0], [1], [0, 0, 1, 1], [], []>} : vector<1x32xf32>, vector<32x32xf32>, vector<1x32xf32> -> vector<1x32xf32>
    %c3_54 = arith.constant 3 : index
    %c0_55 = arith.constant 0 : index
    %68 = vector.load %arg5[%c3_54, %c0_55] : memref<4x32xf32, #tpu.memory_space<vmem>>, vector<1x32xf32>
    %69 = arith.addf %67, %68 : vector<1x32xf32>
    %cst_56 = arith.constant 0.000000e+00 : f32
    %70 = vector.broadcast %cst_56 : f32 to vector<1x32xf32>
    %71 = arith.maximumf %69, %70 : vector<1x32xf32>
    %c3_57 = arith.constant 3 : index
    %c0_58 = arith.constant 0 : index
    %c0_59 = arith.constant 0 : index
    %72 = vector.load %arg6[%c3_57, %c0_58, %c0_59] : memref<4x32x8xf32, #tpu.memory_space<vmem>>, vector<1x32x8xf32>
    %73 = vector.shape_cast %72 : vector<1x32x8xf32> to vector<32x8xf32>
    %cst_60 = arith.constant dense<0.000000e+00> : vector<1x8xf32>
    %74 = tpu.matmul %71, %73, %cst_60 {dimension_numbers = #tpu.dot_dimension_numbers<[1], [0], [0], [1], [0, 0, 1, 1], [], []>} : vector<1x32xf32>, vector<32x8xf32>, vector<1x8xf32> -> vector<1x8xf32>
    %c3_61 = arith.constant 3 : index
    %c0_62 = arith.constant 0 : index
    %75 = vector.load %arg7[%c3_61, %c0_62] : memref<4x8xf32, #tpu.memory_space<vmem>>, vector<1x8xf32>
    %76 = arith.addf %74, %75 : vector<1x8xf32>
    %cst_63 = arith.constant dense<0.000000e+00> : vector<1x8xf32>
    %77 = tpu.matmul %76, %20, %cst_63 {dimension_numbers = #tpu.dot_dimension_numbers<[1], [1], [0], [0], [0, 0, 1, 0], [], []>} : vector<1x8xf32>, vector<8x8xf32>, vector<1x8xf32> -> vector<1x8xf32>
    %c0_64 = arith.constant 0 : index
    %c0_65 = arith.constant 0 : index
    %78 = vector.load %arg8[%c0_64, %c0_65] : memref<32x32xf32, #tpu.memory_space<vmem>>, vector<32x32xf32>
    %cst_66 = arith.constant dense<0.000000e+00> : vector<1x32xf32>
    %79 = tpu.matmul %21, %78, %cst_66 {dimension_numbers = #tpu.dot_dimension_numbers<[1], [0], [0], [1], [0, 0, 1, 1], [], []>} : vector<1x32xf32>, vector<32x32xf32>, vector<1x32xf32> -> vector<1x32xf32>
    %c0_67 = arith.constant 0 : index
    %c0_68 = arith.constant 0 : index
    %80 = vector.load %arg9[%c0_67, %c0_68] : memref<1x32xf32, #tpu.memory_space<vmem>>, vector<1x32xf32>
    %81 = arith.addf %79, %80 : vector<1x32xf32>
    %cst_69 = arith.constant 0.000000e+00 : f32
    %82 = vector.broadcast %cst_69 : f32 to vector<1x32xf32>
    %83 = arith.maximumf %81, %82 : vector<1x32xf32>
    %c0_70 = arith.constant 0 : index
    %c0_71 = arith.constant 0 : index
    %84 = vector.load %arg10[%c0_70, %c0_71] : memref<32x4xf32, #tpu.memory_space<vmem>>, vector<32x4xf32>
    %cst_72 = arith.constant dense<0.000000e+00> : vector<1x4xf32>
    %85 = tpu.matmul %83, %84, %cst_72 {dimension_numbers = #tpu.dot_dimension_numbers<[1], [0], [0], [1], [0, 0, 1, 1], [], []>} : vector<1x32xf32>, vector<32x4xf32>, vector<1x4xf32> -> vector<1x4xf32>
    %c0_73 = arith.constant 0 : index
    %c0_74 = arith.constant 0 : index
    %86 = vector.load %arg11[%c0_73, %c0_74] : memref<1x4xf32, #tpu.memory_space<vmem>>, vector<1x4xf32>
    %87 = arith.addf %85, %86 : vector<1x4xf32>
    %88 = vector.extract_strided_slice %19 {offsets = [8, 0], sizes = [8, 8], strides = [1, 1]} : vector<16x8xf32> to vector<8x8xf32>
    %89 = vector.extract_strided_slice %0 {offsets = [7, 0], sizes = [1, 32], strides = [1, 1]} : vector<14x32xf32> to vector<1x32xf32>
    %90 = vector.extract_strided_slice %0 {offsets = [8, 0], sizes = [1, 32], strides = [1, 1]} : vector<14x32xf32> to vector<1x32xf32>
    %c0_75 = arith.constant 0 : index
    %c0_76 = arith.constant 0 : index
    %c0_77 = arith.constant 0 : index
    %91 = vector.load %arg4[%c0_75, %c0_76, %c0_77] : memref<4x32x32xf32, #tpu.memory_space<vmem>>, vector<1x32x32xf32>
    %92 = vector.shape_cast %91 : vector<1x32x32xf32> to vector<32x32xf32>
    %cst_78 = arith.constant dense<0.000000e+00> : vector<1x32xf32>
    %93 = tpu.matmul %90, %92, %cst_78 {dimension_numbers = #tpu.dot_dimension_numbers<[1], [0], [0], [1], [0, 0, 1, 1], [], []>} : vector<1x32xf32>, vector<32x32xf32>, vector<1x32xf32> -> vector<1x32xf32>
    %c0_79 = arith.constant 0 : index
    %c0_80 = arith.constant 0 : index
    %94 = vector.load %arg5[%c0_79, %c0_80] : memref<4x32xf32, #tpu.memory_space<vmem>>, vector<1x32xf32>
    %95 = arith.addf %93, %94 : vector<1x32xf32>
    %cst_81 = arith.constant 0.000000e+00 : f32
    %96 = vector.broadcast %cst_81 : f32 to vector<1x32xf32>
    %97 = arith.maximumf %95, %96 : vector<1x32xf32>
    %c0_82 = arith.constant 0 : index
    %c0_83 = arith.constant 0 : index
    %c0_84 = arith.constant 0 : index
    %98 = vector.load %arg6[%c0_82, %c0_83, %c0_84] : memref<4x32x8xf32, #tpu.memory_space<vmem>>, vector<1x32x8xf32>
    %99 = vector.shape_cast %98 : vector<1x32x8xf32> to vector<32x8xf32>
    %cst_85 = arith.constant dense<0.000000e+00> : vector<1x8xf32>
    %100 = tpu.matmul %97, %99, %cst_85 {dimension_numbers = #tpu.dot_dimension_numbers<[1], [0], [0], [1], [0, 0, 1, 1], [], []>} : vector<1x32xf32>, vector<32x8xf32>, vector<1x8xf32> -> vector<1x8xf32>
    %c0_86 = arith.constant 0 : index
    %c0_87 = arith.constant 0 : index
    %101 = vector.load %arg7[%c0_86, %c0_87] : memref<4x8xf32, #tpu.memory_space<vmem>>, vector<1x8xf32>
    %102 = arith.addf %100, %101 : vector<1x8xf32>
    %cst_88 = arith.constant dense<0.000000e+00> : vector<1x8xf32>
    %103 = tpu.matmul %102, %88, %cst_88 {dimension_numbers = #tpu.dot_dimension_numbers<[1], [1], [0], [0], [0, 0, 1, 0], [], []>} : vector<1x8xf32>, vector<8x8xf32>, vector<1x8xf32> -> vector<1x8xf32>
    %104 = vector.extract_strided_slice %0 {offsets = [9, 0], sizes = [1, 32], strides = [1, 1]} : vector<14x32xf32> to vector<1x32xf32>
    %c1_89 = arith.constant 1 : index
    %c0_90 = arith.constant 0 : index
    %c0_91 = arith.constant 0 : index
    %105 = vector.load %arg4[%c1_89, %c0_90, %c0_91] : memref<4x32x32xf32, #tpu.memory_space<vmem>>, vector<1x32x32xf32>
    %106 = vector.shape_cast %105 : vector<1x32x32xf32> to vector<32x32xf32>
    %cst_92 = arith.constant dense<0.000000e+00> : vector<1x32xf32>
    %107 = tpu.matmul %104, %106, %cst_92 {dimension_numbers = #tpu.dot_dimension_numbers<[1], [0], [0], [1], [0, 0, 1, 1], [], []>} : vector<1x32xf32>, vector<32x32xf32>, vector<1x32xf32> -> vector<1x32xf32>
    %c1_93 = arith.constant 1 : index
    %c0_94 = arith.constant 0 : index
    %108 = vector.load %arg5[%c1_93, %c0_94] : memref<4x32xf32, #tpu.memory_space<vmem>>, vector<1x32xf32>
    %109 = arith.addf %107, %108 : vector<1x32xf32>
    %cst_95 = arith.constant 0.000000e+00 : f32
    %110 = vector.broadcast %cst_95 : f32 to vector<1x32xf32>
    %111 = arith.maximumf %109, %110 : vector<1x32xf32>
    %c1_96 = arith.constant 1 : index
    %c0_97 = arith.constant 0 : index
    %c0_98 = arith.constant 0 : index
    %112 = vector.load %arg6[%c1_96, %c0_97, %c0_98] : memref<4x32x8xf32, #tpu.memory_space<vmem>>, vector<1x32x8xf32>
    %113 = vector.shape_cast %112 : vector<1x32x8xf32> to vector<32x8xf32>
    %cst_99 = arith.constant dense<0.000000e+00> : vector<1x8xf32>
    %114 = tpu.matmul %111, %113, %cst_99 {dimension_numbers = #tpu.dot_dimension_numbers<[1], [0], [0], [1], [0, 0, 1, 1], [], []>} : vector<1x32xf32>, vector<32x8xf32>, vector<1x8xf32> -> vector<1x8xf32>
    %c1_100 = arith.constant 1 : index
    %c0_101 = arith.constant 0 : index
    %115 = vector.load %arg7[%c1_100, %c0_101] : memref<4x8xf32, #tpu.memory_space<vmem>>, vector<1x8xf32>
    %116 = arith.addf %114, %115 : vector<1x8xf32>
    %cst_102 = arith.constant dense<0.000000e+00> : vector<1x8xf32>
    %117 = tpu.matmul %116, %88, %cst_102 {dimension_numbers = #tpu.dot_dimension_numbers<[1], [1], [0], [0], [0, 0, 1, 0], [], []>} : vector<1x8xf32>, vector<8x8xf32>, vector<1x8xf32> -> vector<1x8xf32>
    %118 = vector.extract_strided_slice %0 {offsets = [10, 0], sizes = [1, 32], strides = [1, 1]} : vector<14x32xf32> to vector<1x32xf32>
    %c2_103 = arith.constant 2 : index
    %c0_104 = arith.constant 0 : index
    %c0_105 = arith.constant 0 : index
    %119 = vector.load %arg4[%c2_103, %c0_104, %c0_105] : memref<4x32x32xf32, #tpu.memory_space<vmem>>, vector<1x32x32xf32>
    %120 = vector.shape_cast %119 : vector<1x32x32xf32> to vector<32x32xf32>
    %cst_106 = arith.constant dense<0.000000e+00> : vector<1x32xf32>
    %121 = tpu.matmul %118, %120, %cst_106 {dimension_numbers = #tpu.dot_dimension_numbers<[1], [0], [0], [1], [0, 0, 1, 1], [], []>} : vector<1x32xf32>, vector<32x32xf32>, vector<1x32xf32> -> vector<1x32xf32>
    %c2_107 = arith.constant 2 : index
    %c0_108 = arith.constant 0 : index
    %122 = vector.load %arg5[%c2_107, %c0_108] : memref<4x32xf32, #tpu.memory_space<vmem>>, vector<1x32xf32>
    %123 = arith.addf %121, %122 : vector<1x32xf32>
    %cst_109 = arith.constant 0.000000e+00 : f32
    %124 = vector.broadcast %cst_109 : f32 to vector<1x32xf32>
    %125 = arith.maximumf %123, %124 : vector<1x32xf32>
    %c2_110 = arith.constant 2 : index
    %c0_111 = arith.constant 0 : index
    %c0_112 = arith.constant 0 : index
    %126 = vector.load %arg6[%c2_110, %c0_111, %c0_112] : memref<4x32x8xf32, #tpu.memory_space<vmem>>, vector<1x32x8xf32>
    %127 = vector.shape_cast %126 : vector<1x32x8xf32> to vector<32x8xf32>
    %cst_113 = arith.constant dense<0.000000e+00> : vector<1x8xf32>
    %128 = tpu.matmul %125, %127, %cst_113 {dimension_numbers = #tpu.dot_dimension_numbers<[1], [0], [0], [1], [0, 0, 1, 1], [], []>} : vector<1x32xf32>, vector<32x8xf32>, vector<1x8xf32> -> vector<1x8xf32>
    %c2_114 = arith.constant 2 : index
    %c0_115 = arith.constant 0 : index
    %129 = vector.load %arg7[%c2_114, %c0_115] : memref<4x8xf32, #tpu.memory_space<vmem>>, vector<1x8xf32>
    %130 = arith.addf %128, %129 : vector<1x8xf32>
    %cst_116 = arith.constant dense<0.000000e+00> : vector<1x8xf32>
    %131 = tpu.matmul %130, %88, %cst_116 {dimension_numbers = #tpu.dot_dimension_numbers<[1], [1], [0], [0], [0, 0, 1, 0], [], []>} : vector<1x8xf32>, vector<8x8xf32>, vector<1x8xf32> -> vector<1x8xf32>
    %132 = vector.extract_strided_slice %0 {offsets = [11, 0], sizes = [1, 32], strides = [1, 1]} : vector<14x32xf32> to vector<1x32xf32>
    %c3_117 = arith.constant 3 : index
    %c0_118 = arith.constant 0 : index
    %c0_119 = arith.constant 0 : index
    %133 = vector.load %arg4[%c3_117, %c0_118, %c0_119] : memref<4x32x32xf32, #tpu.memory_space<vmem>>, vector<1x32x32xf32>
    %134 = vector.shape_cast %133 : vector<1x32x32xf32> to vector<32x32xf32>
    %cst_120 = arith.constant dense<0.000000e+00> : vector<1x32xf32>
    %135 = tpu.matmul %132, %134, %cst_120 {dimension_numbers = #tpu.dot_dimension_numbers<[1], [0], [0], [1], [0, 0, 1, 1], [], []>} : vector<1x32xf32>, vector<32x32xf32>, vector<1x32xf32> -> vector<1x32xf32>
    %c3_121 = arith.constant 3 : index
    %c0_122 = arith.constant 0 : index
    %136 = vector.load %arg5[%c3_121, %c0_122] : memref<4x32xf32, #tpu.memory_space<vmem>>, vector<1x32xf32>
    %137 = arith.addf %135, %136 : vector<1x32xf32>
    %cst_123 = arith.constant 0.000000e+00 : f32
    %138 = vector.broadcast %cst_123 : f32 to vector<1x32xf32>
    %139 = arith.maximumf %137, %138 : vector<1x32xf32>
    %c3_124 = arith.constant 3 : index
    %c0_125 = arith.constant 0 : index
    %c0_126 = arith.constant 0 : index
    %140 = vector.load %arg6[%c3_124, %c0_125, %c0_126] : memref<4x32x8xf32, #tpu.memory_space<vmem>>, vector<1x32x8xf32>
    %141 = vector.shape_cast %140 : vector<1x32x8xf32> to vector<32x8xf32>
    %cst_127 = arith.constant dense<0.000000e+00> : vector<1x8xf32>
    %142 = tpu.matmul %139, %141, %cst_127 {dimension_numbers = #tpu.dot_dimension_numbers<[1], [0], [0], [1], [0, 0, 1, 1], [], []>} : vector<1x32xf32>, vector<32x8xf32>, vector<1x8xf32> -> vector<1x8xf32>
    %c3_128 = arith.constant 3 : index
    %c0_129 = arith.constant 0 : index
    %143 = vector.load %arg7[%c3_128, %c0_129] : memref<4x8xf32, #tpu.memory_space<vmem>>, vector<1x8xf32>
    %144 = arith.addf %142, %143 : vector<1x8xf32>
    %cst_130 = arith.constant dense<0.000000e+00> : vector<1x8xf32>
    %145 = tpu.matmul %144, %88, %cst_130 {dimension_numbers = #tpu.dot_dimension_numbers<[1], [1], [0], [0], [0, 0, 1, 0], [], []>} : vector<1x8xf32>, vector<8x8xf32>, vector<1x8xf32> -> vector<1x8xf32>
    %c0_131 = arith.constant 0 : index
    %c0_132 = arith.constant 0 : index
    %146 = vector.load %arg8[%c0_131, %c0_132] : memref<32x32xf32, #tpu.memory_space<vmem>>, vector<32x32xf32>
    %cst_133 = arith.constant dense<0.000000e+00> : vector<1x32xf32>
    %147 = tpu.matmul %89, %146, %cst_133 {dimension_numbers = #tpu.dot_dimension_numbers<[1], [0], [0], [1], [0, 0, 1, 1], [], []>} : vector<1x32xf32>, vector<32x32xf32>, vector<1x32xf32> -> vector<1x32xf32>
    %c0_134 = arith.constant 0 : index
    %c0_135 = arith.constant 0 : index
    %148 = vector.load %arg9[%c0_134, %c0_135] : memref<1x32xf32, #tpu.memory_space<vmem>>, vector<1x32xf32>
    %149 = arith.addf %147, %148 : vector<1x32xf32>
    %cst_136 = arith.constant 0.000000e+00 : f32
    %150 = vector.broadcast %cst_136 : f32 to vector<1x32xf32>
    %151 = arith.maximumf %149, %150 : vector<1x32xf32>
    %c0_137 = arith.constant 0 : index
    %c0_138 = arith.constant 0 : index
    %152 = vector.load %arg10[%c0_137, %c0_138] : memref<32x4xf32, #tpu.memory_space<vmem>>, vector<32x4xf32>
    %cst_139 = arith.constant dense<0.000000e+00> : vector<1x4xf32>
    %153 = tpu.matmul %151, %152, %cst_139 {dimension_numbers = #tpu.dot_dimension_numbers<[1], [0], [0], [1], [0, 0, 1, 1], [], []>} : vector<1x32xf32>, vector<32x4xf32>, vector<1x4xf32> -> vector<1x4xf32>
    %c0_140 = arith.constant 0 : index
    %c0_141 = arith.constant 0 : index
    %154 = vector.load %arg11[%c0_140, %c0_141] : memref<1x4xf32, #tpu.memory_space<vmem>>, vector<1x4xf32>
    %155 = arith.addf %153, %154 : vector<1x4xf32>
    %156 = tpu.concatenate %35, %49, %63, %77, %103, %117, %131, %145 in 0 : vector<1x8xf32>, vector<1x8xf32>, vector<1x8xf32>, vector<1x8xf32>, vector<1x8xf32>, vector<1x8xf32>, vector<1x8xf32>, vector<1x8xf32> -> vector<8x8xf32>
    %c0_142 = arith.constant 0 : index
    %c0_143 = arith.constant 0 : index
    %157 = vector.load %arg12[%c0_142, %c0_143] : memref<8x8xf32, #tpu.memory_space<vmem>>, vector<8x8xf32>
    tpu.vector_store %arg12[%c0_142, %c0_143], %156 {strides = array<i32>} : memref<8x8xf32, #tpu.memory_space<vmem>>, vector<8x8xf32>,
    %158 = tpu.concatenate %87, %155 in 0 : vector<1x4xf32>, vector<1x4xf32> -> vector<2x4xf32>
    %c0_144 = arith.constant 0 : index
    %c0_145 = arith.constant 0 : index
    %159 = vector.load %arg13[%c0_144, %c0_145] : memref<2x4xf32, #tpu.memory_space<vmem>>, vector<2x4xf32>
    tpu.vector_store %arg13[%c0_144, %c0_145], %158 {strides = array<i32>} : memref<2x4xf32, #tpu.memory_space<vmem>>, vector<2x4xf32>,
    return
  }
}

</mosaic_0001>

<bundles_post_ra>
// kernel: _sam_single.3
= control target key start
LH: loop header
LB: loop body
LE: loop exit
PB: predicated region body
PF: predicated region fallthrough
CT: control target
= control target key end

     0   :  { %vm221_vm0 = vcmask 261120   ;;  %vm374_vm8 = vcmask 130048   ;;  %s962_s26 = smov 112   ;;  %vm402_vm9 = vcmask 64512   ;;  %s1491_s2 = inlined_call_operand.vmem [shape: f32[512,32], index: 2, kind: input, shape index: {}]   ;;  %s1492_s3 = inlined_call_operand.vmem [shape: f32[1,32], index: 3, kind: input, shape index: {}]   ;;  %s1493_s0 = inlined_call_operand.vmem [shape: f32[16,512], index: 0, kind: input, shape index: {}]   ;;  %s1494_s1 = inlined_call_operand.vmem [shape: f32[16,32], index: 1, kind: input, shape index: {}]   ;;  %s1495_s6 = inlined_call_operand.vmem [shape: f32[2,32], index: 6, kind: input, shape index: {}]   ;;  %s1496_s7 = inlined_call_operand.vmem [shape: f32[2,32], index: 7, kind: input, shape index: {}]   ;;  %s1497_s5 = inlined_call_operand.vmem [shape: f32[4,32], index: 5, kind: input, shape index: {}]   ;;  %s1498_s4 = inlined_call_operand.vmem [shape: f32[4,32,32], index: 4, kind: input, shape index: {}]   ;;  %s1499_s9 = inlined_call_operand.vmem [shape: f32[1,64], index: 9, kind: input, shape index: {}]   ;;  %s1500_s8 = inlined_call_operand.vmem [shape: f32[32,64], index: 8, kind: input, shape index: {}]   ;;  %s1501_s11 = inlined_call_operand.vmem [shape: f32[1,32], index: 11, kind: input, shape index: {}]   ;;  %s1502_s10 = inlined_call_operand.vmem [shape: f32[64,32], index: 10, kind: input, shape index: {}]   ;;  %s1503_s12 = inlined_call_operand.vmem [shape: f32[32,32], index: 12, kind: input, shape index: {}]   ;;  %s1504_s13 = inlined_call_operand.vmem [shape: f32[1,32], index: 13, kind: input, shape index: {}]   ;;  %s1505_s14 = inlined_call_operand.vmem [shape: f32[16,32], index: 14, kind: output, shape index: {}]  }
   0x1   :  { %v102_v0 = vld [vmem:[%s1491_s2 + $0x178] sm:$0xff]  ;;  %v101_v2 = vld [vmem:[%s1491_s2 + $0x170] sm:$0xff]  ;;  %v100_v6 = vld [vmem:[%s1491_s2 + $0x168] sm:$0xff] }
   0x2   :  { %v70_v1 = vld [vmem:[%s1491_s2 + $0x78] sm:$0xff]  ;;  %169 = vmatpush.msra.mxu2 %v102_v0  ;;  %v69_v4 = vld [vmem:[%s1491_s2 + $0x70] sm:$0xff]  ;;  %v68_v8 = vld [vmem:[%s1491_s2 + $0x68] sm:$0xff] }
   0x3   :  { %123 = vmatpush.msra.mxu0 %v70_v1  ;;  %v118_v3 = vld [vmem:[%s1491_s2 + $0x1f8] sm:$0xff]  ;;  %v117_v7 = vld [vmem:[%s1491_s2 + $0x1f0] sm:$0xff]  ;;  %v116_v10 = vld [vmem:[%s1491_s2 + $0x1e8] sm:$0xff] }
   0x4   :  { %v86_v5 = vld [vmem:[%s1491_s2 + $0xf8] sm:$0xff]  ;;  %192 = vmatpush.msra.mxu3 %v118_v3  ;;  %170 = vmatpush.msra.mxu2 %v101_v2  ;;  %v85_v9 = vld [vmem:[%s1491_s2 + $0xf0] sm:$0xff]  ;;  %v99_v11 = vld [vmem:[%s1491_s2 + $0x160] sm:$0xff] }
   0x5   :  { %146 = vmatpush.msra.mxu1 %v86_v5  ;;  %124 = vmatpush.msra.mxu0 %v69_v4  ;;  %v67_v12 = vld [vmem:[%s1491_s2 + $0x60] sm:$0xff]  ;;  %v84_v13 = vld [vmem:[%s1491_s2 + $0xe8] sm:$0xff]  ;;  %v98_v16 = vld [vmem:[%s1491_s2 + $0x158] sm:$0xff] }
   0x6   :  { %193 = vmatpush.msra.mxu3 %v117_v7  ;;  %171 = vmatpush.msra.mxu2 %v100_v6  ;;  %v115_v14 = vld [vmem:[%s1491_s2 + $0x1e0] sm:$0xff]  ;;  %v66_v17 = vld [vmem:[%s1491_s2 + $0x58] sm:$0xff]  ;;  %v97_v20 = vld [vmem:[%s1491_s2 + $0x150] sm:$0xff] }
   0x7   :  { %147 = vmatpush.msra.mxu1 %v85_v9  ;;  %125 = vmatpush.msra.mxu0 %v68_v8  ;;  %v83_v15 = vld [vmem:[%s1491_s2 + $0xe0] sm:$0xff]  ;;  %v114_v18 = vld [vmem:[%s1491_s2 + $0x1d8] sm:$0xff]  ;;  %v65_v21 = vld [vmem:[%s1491_s2 + $0x50] sm:$0xff] }
   0x8   :  { %194 = vmatpush.msra.mxu3 %v116_v10  ;;  %172 = vmatpush.msra.mxu2 %v99_v11  ;;  %v82_v19 = vld [vmem:[%s1491_s2 + $0xd8] sm:$0xff]  ;;  %v113_v22 = vld [vmem:[%s1491_s2 + $0x1d0] sm:$0xff]  ;;  %v96_v24 = vld [vmem:[%s1491_s2 + $0x148] sm:$0xff] }
   0x9   :  { %148 = vmatpush.msra.mxu1 %v84_v13  ;;  %126 = vmatpush.msra.mxu0 %v67_v12  ;;  %v81_v23 = vld [vmem:[%s1491_s2 + $0xd0] sm:$0xff]  ;;  %v64_v25 = vld [vmem:[%s1491_s2 + $0x48] sm:$0xff]  ;;  %v95_v28 = vld [vmem:[%s1491_s2 + $0x140] sm:$0xff] }
   0xa   :  { %195 = vmatpush.msra.mxu3 %v115_v14  ;;  %173 = vmatpush.msra.mxu2 %v98_v16  ;;  %v112_v26 = vld [vmem:[%s1491_s2 + $0x1c8] sm:$0xff]  ;;  %v63_v29 = vld [vmem:[%s1491_s2 + $0x40] sm:$0xff]  ;;  %v94_v32 = vld [vmem:[%s1491_s2 + $0x138] sm:$0xff] }
   0xb   :  { %149 = vmatpush.msra.mxu1 %v83_v15  ;;  %127 = vmatpush.msra.mxu0 %v66_v17  ;;  %v80_v27 = vld [vmem:[%s1491_s2 + $0xc8] sm:$0xff]  ;;  %v111_v30 = vld [vmem:[%s1491_s2 + $0x1c0] sm:$0xff]  ;;  %v62_v33 = vld [vmem:[%s1491_s2 + $0x38] sm:$0xff] }
   0xc   :  { %196 = vmatpush.msra.mxu3 %v114_v18  ;;  %174 = vmatpush.msra.mxu2 %v97_v20  ;;  %v79_v31 = vld [vmem:[%s1491_s2 + $0xc0] sm:$0xff]  ;;  %v110_v34 = vld [vmem:[%s1491_s2 + $0x1b8] sm:$0xff]  ;;  %v93_v36 = vld [vmem:[%s1491_s2 + $0x130] sm:$0xff] }
   0xd   :  { %150 = vmatpush.msra.mxu1 %v82_v19  ;;  %128 = vmatpush.msra.mxu0 %v65_v21  ;;  %v78_v35 = vld [vmem:[%s1491_s2 + $0xb8] sm:$0xff]  ;;  %v61_v37 = vld [vmem:[%s1491_s2 + $0x30] sm:$0xff]  ;;  %v92_v40 = vld [vmem:[%s1491_s2 + $0x128] sm:$0xff] }
   0xe   :  { %197 = vmatpush.msra.mxu3 %v113_v22  ;;  %175 = vmatpush.msra.mxu2 %v96_v24  ;;  %v109_v38 = vld [vmem:[%s1491_s2 + $0x1b0] sm:$0xff]  ;;  %v60_v41 = vld [vmem:[%s1491_s2 + $0x28] sm:$0xff]  ;;  %v91_v44 = vld [vmem:[%s1491_s2 + $0x120] sm:$0xff] }
   0xf   :  { %151 = vmatpush.msra.mxu1 %v81_v23  ;;  %129 = vmatpush.msra.mxu0 %v64_v25  ;;  %v77_v39 = vld [vmem:[%s1491_s2 + $0xb0] sm:$0xff]  ;;  %v108_v42 = vld [vmem:[%s1491_s2 + $0x1a8] sm:$0xff]  ;;  %v59_v45 = vld [vmem:[%s1491_s2 + $0x20] sm:$0xff] }
  0x10   :  { %198 = vmatpush.msra.mxu3 %v112_v26  ;;  %176 = vmatpush.msra.mxu2 %v95_v28  ;;  %v76_v43 = vld [vmem:[%s1491_s2 + $0xa8] sm:$0xff]  ;;  %v107_v46 = vld [vmem:[%s1491_s2 + $0x1a0] sm:$0xff]  ;;  %v90_v48 = vld [vmem:[%s1491_s2 + $0x118] sm:$0xff] }
  0x11   :  { %152 = vmatpush.msra.mxu1 %v80_v27  ;;  %130 = vmatpush.msra.mxu0 %v63_v29  ;;  %v75_v47 = vld [vmem:[%s1491_s2 + $0xa0] sm:$0xff]  ;;  %v58_v49 = vld [vmem:[%s1491_s2 + $0x18] sm:$0xff]  ;;  %v89_v52 = vld [vmem:[%s1491_s2 + $0x110] sm:$0xff] }
  0x12   :  { %199 = vmatpush.msra.mxu3 %v111_v30  ;;  %177 = vmatpush.msra.mxu2 %v94_v32  ;;  %v106_v50 = vld [vmem:[%s1491_s2 + $0x198] sm:$0xff]  ;;  %v57_v53 = vld [vmem:[%s1491_s2 + $0x10] sm:$0xff]  ;;  %v88_v56 = vld [vmem:[%s1491_s2 + $0x108] sm:$0xff] }
  0x13   :  { %153 = vmatpush.msra.mxu1 %v79_v31  ;;  %131 = vmatpush.msra.mxu0 %v62_v33  ;;  %v74_v51 = vld [vmem:[%s1491_s2 + $0x98] sm:$0xff]  ;;  %v105_v54 = vld [vmem:[%s1491_s2 + $0x190] sm:$0xff]  ;;  %v56_v57 = vld [vmem:[%s1491_s2 + $0x8] sm:$0xff]  ;;  %v961_v31 = vmov 32.0  }
  0x14   :  { %200 = vmatpush.msra.mxu3 %v110_v34  ;;  %178 = vmatpush.msra.mxu2 %v93_v36  ;;  %v73_v55 = vld [vmem:[%s1491_s2 + $0x90] sm:$0xff]  ;;  %v104_v58 = vld [vmem:[%s1491_s2 + $0x188] sm:$0xff]  ;;  %v87_v60 = vld [vmem:[%s1491_s2 + $0x100] sm:$0xff]  ;;  %931 = vrcp.f32 %v961_v31 }
  0x15   :  { %154 = vmatpush.msra.mxu1 %v78_v35  ;;  %132 = vmatpush.msra.mxu0 %v61_v37  ;;  %v72_v59 = vld [vmem:[%s1491_s2 + $0x88] sm:$0xff]  ;;  %v55_v61 = vld [vmem:[%s1491_s2] sm:$0xff]  ;;  %v49_v62 = vld [vmem:[%s1493_s0 + $0x10] sm:$0xff] }
  0x16   :  { %201 = vmatpush.msra.mxu3 %v109_v38  ;;  %179 = vmatpush.msra.mxu2 %v92_v40  ;;  %v103_v63 = vld [vmem:[%s1491_s2 + $0x180] sm:$0xff]  ;;  %v50_v1 = vld [vmem:[%s1493_s0 + $0x18] sm:$0xff]  ;;  %v48_v3 = vld [vmem:[%s1493_s0 + $0x8] sm:$0xff] }
  0x17   :  { %155 = vmatpush.msra.mxu1 %v77_v39  ;;  %133 = vmatpush.msra.mxu0 %v60_v41  ;;  %v47_v0 = vld [vmem:[%s1493_s0] sm:$0xff]  ;;  %v53_v4 = vld [vmem:[%s1493_s0 + $0x30] sm:$0xff]  ;;  %v54_v6 = vld [vmem:[%s1493_s0 + $0x38] sm:$0xff] }
  0x18   :  { %202 = vmatpush.msra.mxu3 %v108_v42  ;;  %180 = vmatpush.msra.mxu2 %v91_v44  ;;  %v71_v2 = vld [vmem:[%s1491_s2 + $0x80] sm:$0xff]  ;;  %v52_v7 = vld [vmem:[%s1493_s0 + $0x28] sm:$0xff] }
  0x19   :  { %156 = vmatpush.msra.mxu1 %v76_v43  ;;  %134 = vmatpush.msra.mxu0 %v59_v45  ;;  %v51_v5 = vld [vmem:[%s1493_s0 + $0x20] sm:$0xff]  ;;  %v216_v27 = vld [vmem:[%s1494_s1 + $0x8] sm:$0xff] }
  0x1a   :  { %203 = vmatpush.msra.mxu3 %v107_v46  ;;  %181 = vmatpush.msra.mxu2 %v90_v48  ;;  %v919_v8 = vld [vmem:[%s1492_s3] ss:$0 sm:$0xff]  ;;  %v932_v32 = vpop.eup %931  ;;  %v282_v48 = vld [vmem:[%s1498_s4 + $0x18] sm:$0xff]  ;;  %s963_s3 = smov 16  }
  0x1b   :  { %157 = vmatpush.msra.mxu1 %v75_v47  ;;  %135 = vmatpush.msra.mxu0 %v58_v49  ;;  %v215_v16 = vld [vmem:[%s1494_s1] sm:$0xff]  ;;  %v229_v33 = vmul.f32 32.0, %v932_v32  ;;  %vm233_vm1 = vweird.f32 %v932_v32  ;;  %v879_v49 = vld [vmem:[%s1498_s4 + $0x38] sm:$0xff] }
  0x1c   :  { %204 = vmatpush.msra.mxu3 %v106_v50  ;;  %182 = vmatpush.msra.mxu2 %v89_v52  ;;  %v281_v50 = vld [vmem:[%s1498_s4 + $0x10] sm:$0xff]  ;;  %v280_v52 = vld [vmem:[%s1498_s4 + $0x8] sm:$0xff] }
  0x1d   :  { %158 = vmatpush.msra.mxu1 %v74_v51  ;;  %136 = vmatpush.msra.mxu0 %v57_v53  ;;  %v230_v34 = vsub.f32 1.0, %v229_v33  ;;  %v878_v51 = vld [vmem:[%s1498_s4 + $0x30] sm:$0xff]  ;;  %v877_v53 = vld [vmem:[%s1498_s4 + $0x28] sm:$0xff] }
  0x1e   :  { %205 = vmatpush.msra.mxu3 %v105_v54  ;;  %183 = vmatpush.msra.mxu2 %v88_v56  ;;  %v279_v54 = vld [vmem:[%s1498_s4] sm:$0xff] }
  0x1f   :  { %159 = vmatpush.msra.mxu1 %v73_v55  ;;  %137 = vmatpush.msra.mxu0 %v56_v57  ;;  %v231_v35 = vmul.f32 %v932_v32, %v230_v34  ;;  %v876_v55 = vld [vmem:[%s1498_s4 + $0x20] sm:$0xff] }
  0x20   :  { %206 = vmatpush.msra.mxu3 %v104_v58  ;;  %184 = vmatpush.msra.mxu2 %v87_v60  ;;  %v884_v60 = vld [vmem:[%s1498_s4 + $0x50] sm:$0xff] }
  0x21   :  { %160 = vmatpush.msra.mxu1 %v72_v59  ;;  %138 = vmatpush.msra.mxu0 %v55_v61  ;;  %v232_v36 = vadd.f32 %v932_v32, %v231_v35  ;;  %v885_v59 = vld [vmem:[%s1498_s4 + $0x58] sm:$0xff]  ;;  %v883_v61 = vld [vmem:[%s1498_s4 + $0x48] sm:$0xff] }
  0x22   :  { %185 = vmatmul.f32.vlgmr.msra.gmra.mxu2 %v49_v62  ;;  %207 = vmatpush.msra.mxu3 %v103_v63 }
  0x23   :  { %139 = vmatmul.f32.vlgmr.msra.gmra.mxu0 %v47_v0  ;;  %208 = vmatmul.f32.vlgmr.msra.gmra.mxu3 %v50_v1  ;;  %v1272_v37 = vsel %vm233_vm1, %v932_v32, %v232_v36  ;;  %v882_v0 = vld [vmem:[%s1498_s4 + $0x40] sm:$0xff]  ;;  %vm799_vm1 = vcmask 523264  }
  0x24   :  { %161 = vmatpush.msra.mxu1 %v71_v2  ;;  %303 = vmatpush.msrb.mxu0 %v282_v48  ;;  %v925_v36 = vld [vmem:[%s1497_s5 + $0x2] ss:$0 sm:$0xff] }
  0x25   :  { %162 = vmatmul.f32.vlgmr.msra.gmra.mxu1 %v48_v3  ;;  %912 = vmatpush.msrb.mxu2 %v282_v48 }
  0x26   :  { %333 = vmatpush.msrb.mxu1 %v879_v49  ;;  %304 = vmatpush.msrb.mxu0 %v281_v50 }
  0x27   :  { %913 = vmatpush.msrb.mxu2 %v281_v50 }
  0x28   :  { %334 = vmatpush.msrb.mxu1 %v878_v51  ;;  %305 = vmatpush.msrb.mxu0 %v280_v52 }
  0x29   :  { %914 = vmatpush.msrb.mxu2 %v280_v52 }
  0x2a   :  { %188 = vmatmul.f32.gmra.mxu2 %v53_v4  ;;  %335 = vmatpush.msrb.mxu1 %v877_v53 }
  0x2b   :  { %142 = vmatmul.f32.gmra.mxu0 %v51_v5  ;;  %211 = vmatmul.f32.gmra.mxu3 %v54_v6 }
  0x2c   :  { %306 = vmatpush.msrb.mxu0 %v279_v54  ;;  %336 = vmatpush.msrb.mxu1 %v876_v55 }
  0x2d   :  { %165 = vmatmul.f32.gmra.mxu1 %v52_v7  ;;  %915 = vmatpush.msrb.mxu2 %v279_v54 }
  0x2f   :  { %363 = vmatpush.msra.mxu2 %v885_v59 }
  0x31   :  { %364 = vmatpush.msra.mxu2 %v884_v60 }
  0x33   :  { %365 = vmatpush.msra.mxu2 %v883_v61 }
  0x35   :  { %366 = vmatpush.msra.mxu2 %v882_v0 }
  0xa0   :  { %v140_v9 = vpop.f32.mrf.mxu0 }
  0xa1   :  { %v141_v10 = vadd.f32 %v919_v8, %v140_v9 }
  0xa2   :  { %v163_v11 = vpop.f32.mrf.mxu1 }
  0xa3   :  { %v164_v12 = vadd.f32 %v163_v11, %v141_v10  ;;  %v920_v10 = vld [vmem:[%s1495_s6] ss:$0 sm:$0xff] }
  0xa5   :  { %v186_v13 = vpop.f32.mrf.mxu2 }
  0xa6   :  { %v187_v14 = vadd.f32 %v186_v13, %v164_v12  ;;  %v209_v15 = vpop.f32.mrf.mxu3 }
  0xa8   :  { %v210_v17 = vadd.f32 %v209_v15, %v187_v14  ;;  %v143_v18 = vpop.f32.mrf.mxu0  ;;  %v921_v14 = vld [vmem:[%s1496_s7] ss:$0 sm:$0xff] }
  0xa9   :  { %v144_v19 = vadd.f32 %v919_v8, %v143_v18 }
  0xaa   :  { %v1261_v20 = vadd.f32 %v215_v16, %v210_v17  ;;  %v166_v21 = vpop.f32.mrf.mxu1 }
  0xab   :  { %v167_v22 = vadd.f32 %v166_v21, %v144_v19 }
  0xac   :  { %v222_v23 = vsel %vm221_vm0, %v1261_v20, 0.0 }
  0xad   :  { %v189_v24 = vpop.f32.mrf.mxu2  ;;  %223 = vadd.xlane.f32.xlu0 %v222_v23 }
  0xae   :  { %v190_v25 = vadd.f32 %v189_v24, %v167_v22  ;;  %v212_v26 = vpop.f32.mrf.mxu3 }
  0xb0   :  { %v213_v28 = vadd.f32 %v212_v26, %v190_v25  ;;  %v924_v25 = vld [vmem:[%s1497_s5 + $0x1] ss:$0 sm:$0xff]  ;;  %v923_v26 = vld [vmem:[%s1497_s5] ss:$0 sm:$0xff] }
  0xb2   :  { %v1268_v29 = vadd.f32 %v216_v27, %v213_v28 }
  0xb4   :  { %v225_v30 = vsel %vm221_vm0, %v1268_v29, 0.0 }
  0xb5   :  { %226 = vadd.xlane.f32.xlu0 %v225_v30 }
 0x120   :  { %v224_v38 = vpop.xlane.xlu0 %223 }
 0x121   :  { %v235_v39 = vmul.f32 %v1272_v37, %v224_v38 }
 0x123   :  { %v1276_v40 = vsub.f32 %v1261_v20, %v235_v39 }
 0x125   :  { %v239_v41 = vmul.f32 %v1276_v40, %v1276_v40 }
 0x127   :  { %v241_v42 = vsel %vm221_vm0, %v239_v41, 0.0 }
 0x128   :  { %242 = vadd.xlane.f32.xlu1 %v241_v42  ;;  %v227_v43 = vpop.xlane.xlu0 %226 }
 0x129   :  { %v236_v44 = vmul.f32 %v1272_v37, %v227_v43 }
 0x12b   :  { %v1283_v45 = vsub.f32 %v1268_v29, %v236_v44 }
 0x12d   :  { %v240_v46 = vmul.f32 %v1283_v45, %v1283_v45 }
 0x12f   :  { %v244_v47 = vsel %vm221_vm0, %v240_v46, 0.0 }
 0x130   :  { %245 = vadd.xlane.f32.xlu1 %v244_v47 }
 0x19b   :  { %v243_v56 = vpop.xlane.xlu1 %242 }
 0x19c   :  { %v247_v57 = vmul.f32 %v243_v56, %v1272_v37 }
 0x19e   :  { %v249_v58 = vadd.f32 1e-05, %v247_v57 }
 0x1a0   :  { %933 = vrsqrt.f32 %v249_v58  ;;  %vm257_vm3 = vweird.f32 %v249_v58 }
 0x1a3   :  { %v246_v62 = vpop.xlane.xlu1 %245 }
 0x1a4   :  { %v248_v63 = vmul.f32 %v246_v62, %v1272_v37 }
 0x1a6   :  { %v934_v1 = vpop.eup %933  ;;  %v250_v2 = vadd.f32 1e-05, %v248_v63 }
 0x1a7   :  { %v252_v3 = vmul.f32 %v934_v1, %v249_v58  ;;  %vm258_vm2 = vweird.f32 %v934_v1 }
 0x1a8   :  { %935 = vrsqrt.f32 %v250_v2  ;;  %vm259_vm4 = vmor %vm257_vm3, %vm258_vm2  ;;  %vm267_vm6 = vweird.f32 %v250_v2 }
 0x1a9   :  { %v253_v4 = vmul.f32 %v934_v1, %v252_v3 }
 0x1ab   :  { %v254_v5 = vmul.f32 0.5, %v253_v4 }
 0x1ad   :  { %v255_v6 = vsub.f32 1.5, %v254_v5 }
 0x1ae   :  { %v936_v7 = vpop.eup %935 }
 0x1af   :  { %v256_v8 = vmul.f32 %v934_v1, %v255_v6  ;;  %v262_v9 = vmul.f32 %v936_v7, %v250_v2  ;;  %vm268_vm5 = vweird.f32 %v936_v7 }
 0x1b0   :  { %vm269_vm7 = vmor %vm267_vm6, %vm268_vm5 }
 0x1b1   :  { %v260_v11 = vsel %vm259_vm4, %v934_v1, %v256_v8  ;;  %v263_v12 = vmul.f32 %v936_v7, %v262_v9 }
 0x1b2   :  { %v271_v13 = vmul.f32 %v260_v11, %v1276_v40 }
 0x1b3   :  { %v264_v15 = vmul.f32 0.5, %v263_v12 }
 0x1b4   :  { %v274_v16 = vmul.f32 %v920_v10, %v271_v13 }
 0x1b5   :  { %v265_v17 = vsub.f32 1.5, %v264_v15 }
 0x1b6   :  { %v277_v18 = vadd.f32 %v921_v14, %v274_v16 }
 0x1b7   :  { %v266_v19 = vmul.f32 %v936_v7, %v265_v17 }
 0x1b8   :  { %874 = vmatmul.msk.f32.vlgmr.msrb.gmra.mxu0 %vm221_vm0, %v277_v18  ;;  %880 = vmatmul.msk.f32.vlgmr.msrb.gmra.mxu1 %vm221_vm0, %v277_v18 }
 0x1b9   :  { %v270_v21 = vsel %vm269_vm7, %v936_v7, %v266_v19 }
 0x1ba   :  { %v272_v22 = vmul.f32 %v270_v21, %v1283_v45 }
 0x1bc   :  { %v275_v23 = vmul.f32 %v920_v10, %v272_v22 }
 0x1be   :  { %v278_v24 = vadd.f32 %v921_v14, %v275_v23 }
 0x1c0   :  { %875 = vmatmul.msk.f32.vlgmr.msrb.gmra.mxu2 %vm221_vm0, %v278_v24  ;;  %881 = vmatmul.msk.f32.gmra.mxu1 %vm221_vm0, %v278_v24 }
 0x1c8   :  { %886 = vmatmul.msk.f32.vlgmr.msra.gmra.mxu2 %vm221_vm0, %v277_v18 }
 0x1d0   :  { %887 = vmatmul.msk.f32.gmra.mxu2 %vm221_vm0, %v278_v24 }
 0x235   :  { %v338_v27 = vpop.f32.mrf.mxu1  ;;  %v308_v28 = vpop.f32.mrf.mxu0 }
 0x236   :  { %v339_v30 = vadd.f32 %v924_v25, %v338_v27  ;;  %v309_v31 = vadd.f32 %v923_v26, %v308_v28 }
 0x238   :  { %439 = vrot.lane.b32.xlu2 %v339_v30, %s962_s26  ;;  %888 = vmatpush.xpose.msk.msrb.mxu3 %vm374_vm8, %v339_v30  ;;  %v903_v30 = vld [vmem:[%s1498_s4 + $0x78] sm:$0xff] }
 0x23b   :  { %889 = vmatmul.msk.f32.vlgmr.msrb.gmra.mxu3 %vm374_vm8, %v309_v31 }
 0x23d   :  { %v341_v32 = vpop.f32.mrf.mxu1 }
 0x23e   :  { %v342_v33 = vadd.f32 %v924_v25, %v341_v32 }
 0x240   :  { %437 = vrot.lane.b32.xlu2 %v309_v31, %s962_s26  ;;  %572 = vrot.lane.b32.xlu0 %v342_v33, %s962_s26  ;;  %v902_v31 = vld [vmem:[%s1498_s4 + $0x70] sm:$0xff] }
 0x241   :  { %894 = vmatpush.xpose.msk.msrb.mxu2 %vm374_vm8, %v342_v33  ;;  %v901_v33 = vld [vmem:[%s1498_s4 + $0x68] sm:$0xff] }
 0x243   :  { %v311_v34 = vpop.f32.mrf.mxu2 }
 0x244   :  { %v312_v35 = vadd.f32 %v923_v26, %v311_v34 }
 0x245   :  { %667 = vmatpush.msra.mxu2 %v903_v30  ;;  %v793_v30 = vld [vmem:[%s1502_s10 + $0x30] sm:$0xff] }
 0x246   :  { %570 = vrot.lane.b32.xlu1 %v312_v35, %s962_s26  ;;  %895 = vmatmul.msk.f32.vlgmr.msrb.gmra.mxu2 %vm374_vm8, %v312_v35  ;;  %v900_v35 = vld [vmem:[%s1498_s4 + $0x60] sm:$0xff] }
 0x247   :  { %668 = vmatpush.msra.mxu2 %v902_v31  ;;  %v792_v31 = vld [vmem:[%s1502_s10 + $0x28] sm:$0xff] }
 0x249   :  { %669 = vmatpush.msra.mxu2 %v901_v33  ;;  %v790_v33 = vld [vmem:[%s1502_s10 + $0x18] sm:$0xff] }
 0x24b   :  { %v368_v38 = vpop.f32.mrf.mxu2  ;;  %670 = vmatpush.msra.mxu2 %v900_v35  ;;  %v788_v35 = vld [vmem:[%s1502_s10 + $0x8] sm:$0xff] }
 0x24c   :  { %v369_v39 = vadd.f32 %v925_v36, %v368_v38 }
 0x24e   :  { %432 = vmatpush.msra.mxu3 %v369_v39 }
 0x253   :  { %v371_v40 = vpop.f32.mrf.mxu2 }
 0x254   :  { %v372_v41 = vadd.f32 %v925_v36, %v371_v40 }
 0x256   :  { %565 = vmatpush.msrb.mxu3 %v372_v41 }
 0x292   :  { %v440_v42 = vpop.permute.xlu2 %439 }
 0x293   :  { %891 = vmatpush.xpose.msk.msra.mxu0 %vm374_vm8, %v440_v42 }
 0x29a   :  { %v438_v43 = vpop.permute.xlu2 %437 }
 0x29b   :  { %892 = vmatmul.msk.f32.vlgmr.msra.gmra.mxu0 %vm374_vm8, %v438_v43  ;;  %v926_v43 = vld [vmem:[%s1497_s5 + $0x3] ss:$0 sm:$0xff] }
 0x2b2   :  { %v573_v44 = vpop.permute.xlu0 %572 }
 0x2b3   :  { %897 = vmatpush.xpose.msk.msrb.mxu0 %vm374_vm8, %v573_v44 }
 0x2b8   :  { %v571_v45 = vpop.permute.xlu1 %570 }
 0x2b9   :  { %898 = vmatmul.msk.f32.vlgmr.msrb.gmra.mxu0 %vm374_vm8, %v571_v45 }
 0x2be   :  { %v398_v46 = vpop.f32.mrf.mxu3 }
 0x2bf   :  { %v401_v47 = vmul.f32 0.25, %v398_v46 }
 0x2c1   :  { %v403_v48 = vsel %vm402_vm9, %v401_v47, -inf }
 0x2c2   :  { %404 = vmax.xlane.f32.xlu1 %v403_v48 }
 0x2c9   :  { %v532_v52 = vpop.f32.mrf.mxu2 }
 0x2ca   :  { %v535_v53 = vmul.f32 0.25, %v532_v52 }
 0x2cc   :  { %v536_v54 = vsel %vm402_vm9, %v535_v53, -inf }
 0x318   :  { %v462_v49 = vpop.f32.mrf.mxu0 }
 0x319   :  { %v465_v50 = vmul.f32 0.25, %v462_v49 }
 0x31b   :  { %v466_v51 = vsel %vm402_vm9, %v465_v50, -inf }
 0x31c   :  { %467 = vmax.xlane.f32.xlu2 %v466_v51 }
 0x324   :  { %537 = vmax.xlane.f32.xlu2 %v536_v54 }
 0x335   :  { %v405_v55 = vpop.xlane.xlu1 %404 }
 0x336   :  { %v406_v56 = vsub.f32 %v401_v47, %v405_v55  ;;  %v595_v57 = vpop.f32.mrf.mxu0 }
 0x337   :  { %v598_v58 = vmul.f32 0.25, %v595_v57 }
 0x338   :  { %v407_v59 = vmul.f32 1.442695, %v406_v56 }
 0x339   :  { %v599_v60 = vsel %vm402_vm9, %v598_v58, -inf }
 0x33a   :  { %937 = vpow2.f32 %v407_v59  ;;  %600 = vmax.xlane.f32.xlu0 %v599_v60  ;;  %v735_v60 = vld [vmem:[%s1500_s8 + $0x18] sm:$0xff] }
 0x340   :  { %v938_v61 = vpop.eup %937 }
 0x341   :  { %v409_v62 = vsel %vm402_vm9, %v938_v61, 0.0 }
 0x342   :  { %410 = vadd.xlane.f32.xlu1 %v409_v62  ;;  %v733_v62 = vld [vmem:[%s1500_s8 + $0x8] sm:$0xff] }
 0x34e   :  { %478 = vrot.lane.b32.xlu0 %v369_v39, %s962_s26 }
 0x38f   :  { %v468_v63 = vpop.xlane.xlu2 %467 }
 0x390   :  { %v469_v0 = vsub.f32 %v465_v50, %v468_v63  ;;  %v732_v63 = vld [vmem:[%s1500_s8] sm:$0xff] }
 0x392   :  { %v470_v1 = vmul.f32 1.442695, %v469_v0 }
 0x394   :  { %939 = vpow2.f32 %v470_v1 }
 0x397   :  { %v538_v2 = vpop.xlane.xlu2 %537 }
 0x398   :  { %v539_v3 = vsub.f32 %v535_v53, %v538_v2 }
 0x39a   :  { %v940_v4 = vpop.eup %939  ;;  %v540_v5 = vmul.f32 1.442695, %v539_v3 }
 0x39b   :  { %v472_v6 = vsel %vm402_vm9, %v940_v4, 0.0 }
 0x39c   :  { %941 = vpow2.f32 %v540_v5  ;;  %473 = vadd.xlane.f32.xlu2 %v472_v6 }
 0x3a2   :  { %v942_v7 = vpop.eup %941 }
 0x3a3   :  { %v542_v8 = vsel %vm402_vm9, %v942_v7, 0.0 }
 0x3a4   :  { %543 = vadd.xlane.f32.xlu1 %v542_v8 }
 0x3ad   :  { %v601_v9 = vpop.xlane.xlu0 %600 }
 0x3ae   :  { %v602_v10 = vsub.f32 %v598_v58, %v601_v9  ;;  %v927_v9 = vld [vmem:[%s1495_s6 + $0x1] ss:$0 sm:$0xff] }
 0x3b0   :  { %v603_v11 = vmul.f32 1.442695, %v602_v10 }
 0x3b2   :  { %943 = vpow2.f32 %v603_v11  ;;  %v922_v11 = vld [vmem:[%s1496_s7 + $0x1] ss:$0 sm:$0xff] }
 0x3b5   :  { %v411_v12 = vpop.xlane.xlu1 %410 }
 0x3b6   :  { %945 = vrcp.f32 %v411_v12 }
 0x3b8   :  { %v944_v13 = vpop.eup %943 }
 0x3b9   :  { %v605_v14 = vsel %vm402_vm9, %v944_v13, 0.0 }
 0x3ba   :  { %606 = vadd.xlane.f32.xlu2 %v605_v14 }
 0x3bc   :  { %v946_v15 = vpop.eup %945 }
 0x3bd   :  { %v413_v16 = vmul.f32 %v946_v15, %v938_v61  ;;  %v734_v61 = vld [vmem:[%s1500_s8 + $0x10] sm:$0xff] }
 0x3bf   :  { %890 = vmatmul.msk.f32.vlgmr.msra.gmra.mxu3 %vm402_vm9, %v413_v16 }
 0x3c0   :  { %v479_v17 = vpop.permute.xlu0 %478  ;;  %758 = vmatpush.msra.mxu3 %v735_v60 }
 0x3c1   :  { %499 = vmatpush.msra.mxu1 %v479_v17 }
 0x3c2   :  { %759 = vmatpush.msra.mxu3 %v734_v61 }
 0x3c4   :  { %760 = vmatpush.msra.mxu3 %v733_v62  ;;  %v833_v62 = vld [vmem:[%s1503_s12 + $0x10] sm:$0xff] }
 0x3c6   :  { %761 = vmatpush.msra.mxu3 %v732_v63  ;;  %v832_v63 = vld [vmem:[%s1503_s12 + $0x8] sm:$0xff] }
 0x3d2   :  { %611 = vrot.lane.b32.xlu2 %v372_v41, %s962_s26 }
 0x40f   :  { %v474_v18 = vpop.xlane.xlu2 %473 }
 0x410   :  { %947 = vrcp.f32 %v474_v18 }
 0x416   :  { %v948_v19 = vpop.eup %947 }
 0x417   :  { %v476_v21 = vmul.f32 %v948_v19, %v940_v4  ;;  %v544_v22 = vpop.xlane.xlu1 %543 }
 0x418   :  { %949 = vrcp.f32 %v544_v22 }
 0x419   :  { %893 = vmatmul.msk.f32.vlgmr.msra.gmra.mxu1 %vm402_vm9, %v476_v21 }
 0x41e   :  { %v950_v23 = vpop.eup %949 }
 0x41f   :  { %v546_v24 = vmul.f32 %v950_v23, %v942_v7 }
 0x421   :  { %896 = vmatmul.msk.f32.vlgmr.msrb.gmra.mxu3 %vm402_vm9, %v546_v24 }
 0x42d   :  { %v607_v25 = vpop.xlane.xlu2 %606 }
 0x42e   :  { %951 = vrcp.f32 %v607_v25 }
 0x434   :  { %v952_v26 = vpop.eup %951 }
 0x435   :  { %v609_v27 = vmul.f32 %v952_v26, %v944_v13  ;;  %v612_v28 = vpop.permute.xlu2 %611 }
 0x436   :  { %632 = vmatpush.msrb.mxu1 %v612_v28 }
 0x437   :  { %899 = vmatmul.msk.f32.vlgmr.msrb.gmra.mxu1 %vm402_vm9, %v609_v27 }
 0x442   :  { %v434_v36 = vpop.f32.mrf.mxu3 }
 0x496   :  { %v501_v32 = vpop.f32.mrf.mxu1 }
 0x497   :  { %505 = vrot.lane.b32.xlu0 %v501_v32, %s963_s3  ;;  %v791_v32 = vld [vmem:[%s1502_s10 + $0x20] sm:$0xff] }
 0x4a4   :  { %v567_v40 = vpop.f32.mrf.mxu3 }
 0x4b4   :  { %v634_v34 = vpop.f32.mrf.mxu1 }
 0x4b5   :  { %638 = vrot.lane.b32.xlu1 %v634_v34, %s963_s3  ;;  %v789_v34 = vld [vmem:[%s1502_s10 + $0x10] sm:$0xff] }
 0x509   :  { %v506_v38 = vpop.permute.xlu0 %505 }
 0x50a   :  { %v508_v39 = vsel %vm374_vm8, %v434_v36, %v506_v38  ;;  %v787_v36 = vld [vmem:[%s1502_s10] sm:$0xff] }
 0x50b   :  { %904 = vmatmul.msk.f32.vlgmr.msra.gmra.mxu2 %vm221_vm0, %v508_v39  ;;  %v928_v38 = vld [vmem:[%s1499_s9] ss:$0 sm:$0xff] }
 0x527   :  { %v639_v41 = vpop.permute.xlu1 %638 }
 0x528   :  { %v641_v42 = vsel %vm374_vm8, %v567_v40, %v639_v41 }
 0x529   :  { %905 = vmatmul.msk.f32.gmra.mxu2 %vm221_vm0, %v641_v42 }
 0x58e   :  { %v672_v44 = vpop.f32.mrf.mxu2 }
 0x58f   :  { %v673_v45 = vadd.f32 %v926_v43, %v672_v44 }
 0x591   :  { %v1395_v46 = vadd.f32 %v673_v45, %v1261_v20 }
 0x593   :  { %v682_v47 = vsel %vm221_vm0, %v1395_v46, 0.0 }
 0x594   :  { %683 = vadd.xlane.f32.xlu2 %v682_v47 }
 0x5ac   :  { %v675_v48 = vpop.f32.mrf.mxu2 }
 0x5ad   :  { %v676_v49 = vadd.f32 %v926_v43, %v675_v48 }
 0x5af   :  { %v1400_v50 = vadd.f32 %v676_v49, %v1268_v29 }
 0x5b1   :  { %v685_v51 = vsel %vm221_vm0, %v1400_v50, 0.0 }
 0x5b2   :  { %686 = vadd.xlane.f32.xlu0 %v685_v51 }
 0x607   :  { %v684_v52 = vpop.xlane.xlu2 %683 }
 0x608   :  { %v688_v53 = vmul.f32 %v684_v52, %v1272_v37  ;;  %v834_v52 = vld [vmem:[%s1503_s12 + $0x18] sm:$0xff] }
 0x609   :  { %857 = vmatpush.msra.mxu1 %v834_v52 }
 0x60a   :  { %v690_v54 = vsub.f32 %v1395_v46, %v688_v53 }
 0x60b   :  { %858 = vmatpush.msra.mxu1 %v833_v62 }
 0x60c   :  { %v692_v20 = vmul.f32 %v690_v54, %v690_v54 }
 0x60d   :  { %859 = vmatpush.msra.mxu1 %v832_v63 }
 0x60e   :  { %v694_v55 = vsel %vm221_vm0, %v692_v20, 0.0 }
 0x60f   :  { %695 = vadd.xlane.f32.xlu1 %v694_v55 }
 0x625   :  { %v687_v56 = vpop.xlane.xlu0 %686 }
 0x626   :  { %v689_v57 = vmul.f32 %v687_v56, %v1272_v37 }
 0x628   :  { %v691_v58 = vsub.f32 %v1400_v50, %v689_v57 }
 0x62a   :  { %v693_v29 = vmul.f32 %v691_v58, %v691_v58 }
 0x62c   :  { %v697_v59 = vsel %vm221_vm0, %v693_v29, 0.0 }
 0x62d   :  { %698 = vadd.xlane.f32.xlu2 %v697_v59 }
 0x682   :  { %v696_v0 = vpop.xlane.xlu1 %695 }
 0x683   :  { %v700_v1 = vmul.f32 %v696_v0, %v1272_v37  ;;  %v831_v0 = vld [vmem:[%s1503_s12] sm:$0xff] }
 0x684   :  { %860 = vmatpush.msra.mxu1 %v831_v0 }
 0x685   :  { %v702_v2 = vadd.f32 1e-05, %v700_v1  ;;  %v929_v1 = vld [vmem:[%s1501_s11] ss:$0 sm:$0xff] }
 0x687   :  { %953 = vrsqrt.f32 %v702_v2  ;;  %vm710_vm11 = vweird.f32 %v702_v2 }
 0x68d   :  { %v954_v3 = vpop.eup %953 }
 0x68e   :  { %v705_v4 = vmul.f32 %v954_v3, %v702_v2  ;;  %vm711_vm10 = vweird.f32 %v954_v3 }
 0x68f   :  { %vm712_vm12 = vmor %vm710_vm11, %vm711_vm10 }
 0x690   :  { %v706_v5 = vmul.f32 %v954_v3, %v705_v4 }
 0x692   :  { %v707_v6 = vmul.f32 0.5, %v706_v5 }
 0x694   :  { %v708_v7 = vsub.f32 1.5, %v707_v6 }
 0x696   :  { %v709_v8 = vmul.f32 %v954_v3, %v708_v7 }
 0x698   :  { %v713_v10 = vsel %vm712_vm12, %v954_v3, %v709_v8  ;;  %v930_v8 = vld [vmem:[%s1504_s13] ss:$0 sm:$0xff] }
 0x699   :  { %v724_v12 = vmul.f32 %v713_v10, %v690_v54 }
 0x69b   :  { %v727_v13 = vmul.f32 %v927_v9, %v724_v12 }
 0x69d   :  { %v730_v14 = vadd.f32 %v922_v11, %v727_v13 }
 0x69f   :  { %906 = vmatmul.msk.f32.vlgmr.msra.gmra.mxu3 %vm221_vm0, %v730_v14 }
 0x6a0   :  { %v699_v15 = vpop.xlane.xlu2 %698 }
 0x6a1   :  { %v701_v16 = vmul.f32 %v699_v15, %v1272_v37  ;;  %v794_v37 = vld [vmem:[%s1502_s10 + $0x38] sm:$0xff] }
 0x6a2   :  { %814 = vmatpush.msra.mxu0 %v794_v37 }
 0x6a3   :  { %v703_v17 = vadd.f32 1e-05, %v701_v16 }
 0x6a4   :  { %815 = vmatpush.msra.mxu0 %v793_v30 }
 0x6a5   :  { %955 = vrsqrt.f32 %v703_v17  ;;  %vm720_vm14 = vweird.f32 %v703_v17 }
 0x6a6   :  { %816 = vmatpush.msra.mxu0 %v792_v31 }
 0x6a8   :  { %817 = vmatpush.msra.mxu0 %v791_v32 }
 0x6aa   :  { %818 = vmatpush.msra.mxu0 %v790_v33 }
 0x6ab   :  { %v956_v18 = vpop.eup %955 }
 0x6ac   :  { %v715_v19 = vmul.f32 %v956_v18, %v703_v17  ;;  %vm721_vm13 = vweird.f32 %v956_v18  ;;  %819 = vmatpush.msra.mxu0 %v789_v34 }
 0x6ad   :  { %vm722_vm15 = vmor %vm720_vm14, %vm721_vm13 }
 0x6ae   :  { %v716_v21 = vmul.f32 %v956_v18, %v715_v19  ;;  %820 = vmatpush.msra.mxu0 %v788_v35 }
 0x6b0   :  { %v717_v22 = vmul.f32 0.5, %v716_v21  ;;  %821 = vmatpush.msra.mxu0 %v787_v36 }
 0x6b2   :  { %v718_v23 = vsub.f32 1.5, %v717_v22 }
 0x6b4   :  { %v719_v24 = vmul.f32 %v956_v18, %v718_v23 }
 0x6b6   :  { %v723_v25 = vsel %vm722_vm15, %v956_v18, %v719_v24 }
 0x6b7   :  { %v725_v26 = vmul.f32 %v723_v25, %v691_v58 }
 0x6b9   :  { %v728_v27 = vmul.f32 %v927_v9, %v725_v26 }
 0x6bb   :  { %v731_v28 = vadd.f32 %v922_v11, %v728_v27 }
 0x6bd   :  { %907 = vmatmul.msk.f32.gmra.mxu3 %vm221_vm0, %v731_v28 }
 0x722   :  { %v763_v39 = vpop.f32.mrf.mxu3 }
 0x723   :  { %v764_v40 = vadd.f32 %v928_v38, %v763_v39 }
 0x725   :  { %v769_v41 = vmul.f32 %v764_v40, %v764_v40 }
 0x727   :  { %v771_v42 = vmul.f32 %v769_v41, %v764_v40 }
 0x729   :  { %v773_v43 = vmul.f32 0.044715, %v771_v42 }
 0x72b   :  { %v775_v44 = vadd.f32 %v773_v43, %v764_v40 }
 0x72d   :  { %v777_v45 = vmul.f32 0.7978846, %v775_v44 }
 0x72f   :  { %957 = vtanh.f32 %v777_v45 }
 0x735   :  { %v958_v47 = vpop.eup %957 }
 0x736   :  { %v781_v48 = vadd.f32 1.0, %v958_v47 }
 0x738   :  { %v783_v49 = vmul.f32 0.5, %v781_v48 }
 0x73a   :  { %v785_v51 = vmul.f32 %v783_v49, %v764_v40 }
 0x73c   :  { %908 = vmatmul.msk.f32.vlgmr.msra.gmra.mxu0 %vm799_vm1, %v785_v51 }
 0x740   :  { %v766_v53 = vpop.f32.mrf.mxu3 }
 0x741   :  { %v767_v54 = vadd.f32 %v928_v38, %v766_v53 }
 0x743   :  { %v770_v20 = vmul.f32 %v767_v54, %v767_v54 }
 0x745   :  { %v772_v55 = vmul.f32 %v770_v20, %v767_v54 }
 0x747   :  { %v774_v56 = vmul.f32 0.044715, %v772_v55 }
 0x749   :  { %v776_v57 = vadd.f32 %v774_v56, %v767_v54 }
 0x74b   :  { %v778_v58 = vmul.f32 0.7978846, %v776_v57 }
 0x74d   :  { %959 = vtanh.f32 %v778_v58 }
 0x753   :  { %v960_v29 = vpop.eup %959 }
 0x754   :  { %v782_v59 = vadd.f32 1.0, %v960_v29 }
 0x756   :  { %v784_v60 = vmul.f32 0.5, %v782_v59 }
 0x758   :  { %v786_v61 = vmul.f32 %v784_v60, %v767_v54 }
 0x75a   :  { %909 = vmatmul.msk.f32.gmra.mxu0 %vm799_vm1, %v786_v61 }
 0x7b9   :  { %v823_v2 = vpop.f32.mrf.mxu0 }
 0x7ba   :  { %v824_v3 = vadd.f32 %v929_v1, %v823_v2 }
 0x7bc   :  { %v829_v4 = vadd.f32 %v824_v3, %v1395_v46 }
 0x7be   :  { %910 = vmatmul.msk.f32.vlgmr.msra.gmra.mxu1 %vm221_vm0, %v829_v4 }
 0x7d7   :  { %v826_v5 = vpop.f32.mrf.mxu0 }
 0x7d8   :  { %v827_v6 = vadd.f32 %v929_v1, %v826_v5 }
 0x7da   :  { %v830_v7 = vadd.f32 %v827_v6, %v1400_v50 }
 0x7dc   :  { %911 = vmatmul.msk.f32.gmra.mxu1 %vm221_vm0, %v830_v7 }
 0x83b   :  { %v862_v9 = vpop.f32.mrf.mxu1 }
 0x83c   :  { %v863_v10 = vadd.f32 %v930_v8, %v862_v9 }
 0x83e   :  { %868 = vst.msk [vmem:[%s1505_s14] sm:$0xff] %vm221_vm0, %v863_v10 }
 0x859   :  { %v865_v46 = vpop.f32.mrf.mxu1 }
 0x85a   :  { %v866_v11 = vadd.f32 %v930_v8, %v865_v46 }
 0x85c   :  { %869 = vst.msk [vmem:[%s1505_s14 + $0x8] sm:$0xff] %vm221_vm0, %v866_v11 }

// kernel: _sam_single.5
= control target key start
LH: loop header
LB: loop body
LE: loop exit
PB: predicated region body
PF: predicated region fallthrough
CT: control target
= control target key end

     0   :  { %vm55_vm0 = vcmask 261120   ;;  %vm161_vm1 = vcmask 64512   ;;  %vm841_vm2 = vcmask 1040384   ;;  %vm843_vm3 = vcmask 1041408   ;;  %s1451_s4 = inlined_call_operand.vmem [shape: f32[4,32,32], index: 4, kind: input, shape index: {}]   ;;  %s1452_s0 = inlined_call_operand.vmem [shape: f32[14,32], index: 0, kind: input, shape index: {}]   ;;  %s1453_s2 = inlined_call_operand.vmem [shape: f32[32,8], index: 2, kind: input, shape index: {}]   ;;  %s1454_s6 = inlined_call_operand.vmem [shape: f32[4,32,8], index: 6, kind: input, shape index: {}]   ;;  %s1455_s1 = inlined_call_operand.vmem [shape: f32[16,32], index: 1, kind: input, shape index: {}]   ;;  %s1456_s3 = inlined_call_operand.vmem [shape: f32[1,8], index: 3, kind: input, shape index: {}]   ;;  %s1457_s5 = inlined_call_operand.vmem [shape: f32[4,32], index: 5, kind: input, shape index: {}]   ;;  %s1458_s7 = inlined_call_operand.vmem [shape: f32[4,8], index: 7, kind: input, shape index: {}]   ;;  %s1459_s8 = inlined_call_operand.vmem [shape: f32[32,32], index: 8, kind: input, shape index: {}]   ;;  %s1460_s10 = inlined_call_operand.vmem [shape: f32[32,4], index: 10, kind: input, shape index: {}]   ;;  %s1461_s9 = inlined_call_operand.vmem [shape: f32[1,32], index: 9, kind: input, shape index: {}]   ;;  %s1462_s12 = inlined_call_operand.vmem [shape: f32[8,8], index: 12, kind: output, shape index: {0}]   ;;  %s1463_s11 = inlined_call_operand.vmem [shape: f32[1,4], index: 11, kind: input, shape index: {}]   ;;  %s1464_s13 = inlined_call_operand.vmem [shape: f32[2,4], index: 13, kind: output, shape index: {1}]  }
   0x1   :  { %v1010_v0 = vld [vmem:[%s1451_s4 + $0x18] sm:$0xff]  ;;  %v1015_v1 = vld [vmem:[%s1451_s4 + $0x10] sm:$0xff]  ;;  %v1021_v2 = vld [vmem:[%s1452_s0] sm:$0xff]  ;;  %vm845_vm4 = vcmask 1042432   ;;  %vm847_vm5 = vcmask 1043456   ;;  %vm849_vm6 = vcmask 1044480  }
   0x2   :  { %124 = vmatpush.msra.mxu1 %v1010_v0  ;;  %v50_v3 = vld [vmem:[%s1453_s2 + $0x18] sm:$0xff]  ;;  %v1029_v4 = vld [vmem:[%s1451_s4 + $0x8] sm:$0xff]  ;;  %v49_v5 = vld [vmem:[%s1453_s2 + $0x10] sm:$0xff]  ;;  %v109_v9 = vrot.slane %v1021_v2, 1  ;;  %v194_v49 = vrot.slane %v1021_v2, 2  ;;  %v276_v51 = vrot.slane %v1021_v2, 3 }
   0x3   :  { %74 = vmatpush.msra.mxu0 %v50_v3  ;;  %v48_v6 = vld [vmem:[%s1453_s2 + $0x8] sm:$0xff]  ;;  %v1041_v7 = vld [vmem:[%s1454_s6 + $0x18] sm:$0xff]  ;;  %v1046_v8 = vld [vmem:[%s1451_s4] sm:$0xff]  ;;  %vm851_vm7 = vcmask 1045504   ;;  %vm853_vm8 = vcmask 1046528   ;;  %vm860_vm9 = vcmask 25600  }
   0x4   :  { %125 = vmatpush.msra.mxu1 %v1015_v1  ;;  %153 = vmatpush.msra.mxu2 %v1041_v7  ;;  %v47_v10 = vld [vmem:[%s1453_s2] sm:$0xff]  ;;  %v1063_v12 = vld [vmem:[%s1454_s6 + $0x10] sm:$0xff]  ;;  %v1069_v13 = vld [vmem:[%s1454_s6 + $0x8] sm:$0xff] }
   0x5   :  { %75 = vmatpush.msra.mxu0 %v49_v5  ;;  %v45_v11 = vld [vmem:[%s1455_s1] sm:$0xff]  ;;  %v1081_v15 = vld [vmem:[%s1454_s6 + $0x38] sm:$0xff]  ;;  %v1091_v17 = vld [vmem:[%s1454_s6 + $0x30] sm:$0xff] }
   0x6   :  { %126 = vmatpush.msra.mxu1 %v1029_v4  ;;  %154 = vmatpush.msra.mxu2 %v1063_v12  ;;  %v1075_v14 = vld [vmem:[%s1454_s6] sm:$0xff]  ;;  %v1086_v16 = vld [vmem:[%s1454_s6 + $0x58] sm:$0xff]  ;;  %v1098_v18 = vld [vmem:[%s1454_s6 + $0x50] sm:$0xff] }
   0x7   :  { %76 = vmatpush.msra.mxu0 %v48_v6  ;;  %v1103_v19 = vld [vmem:[%s1454_s6 + $0x28] sm:$0xff]  ;;  %v1115_v21 = vld [vmem:[%s1454_s6 + $0x20] sm:$0xff]  ;;  %v1146_v39 = vld [vmem:[%s1451_s4 + $0x38] sm:$0xff] }
   0x8   :  { %127 = vmatpush.msra.mxu1 %v1046_v8  ;;  %155 = vmatpush.msra.mxu2 %v1069_v13  ;;  %v1108_v20 = vld [vmem:[%s1454_s6 + $0x48] sm:$0xff]  ;;  %v1120_v22 = vld [vmem:[%s1454_s6 + $0x40] sm:$0xff]  ;;  %v1151_v40 = vld [vmem:[%s1451_s4 + $0x30] sm:$0xff] }
   0x9   :  { %872 = vmatmul.msk.f32.vlgmr.msra.gmra.mxu1 %vm55_vm0, %v109_v9  ;;  %77 = vmatpush.msra.mxu0 %v47_v10  ;;  %v1129_v23 = vld [vmem:[%s1457_s5] sm:$0x1]  ;;  %v1157_v41 = vld [vmem:[%s1451_s4 + $0x28] sm:$0xff]  ;;  %v1176_v46 = vld [vmem:[%s1451_s4 + $0x58] sm:$0xff] }
   0xa   :  { %870 = vmatmul.msk.f32.vlgmr.msra.gmra.mxu0 %vm55_vm0, %v45_v11  ;;  %156 = vmatpush.msra.mxu2 %v1075_v14  ;;  %v1134_v24 = vld [vmem:[%s1456_s3] ss:$0 sm:$0xff]  ;;  %v1182_v47 = vld [vmem:[%s1451_s4 + $0x50] sm:$0xff]  ;;  %v1188_v48 = vld [vmem:[%s1451_s4 + $0x48] sm:$0xff] }
   0xb   :  { %239 = vmatpush.msrb.mxu1 %v1081_v15  ;;  %321 = vmatpush.msrb.mxu0 %v1086_v16  ;;  %v1163_v42 = vld [vmem:[%s1451_s4 + $0x20] sm:$0xff]  ;;  %v46_v52 = vld [vmem:[%s1455_s1 + $0x8] sm:$0xff]  ;;  %v1230_v5 = vld [vmem:[%s1451_s4 + $0x78] sm:$0xff] }
   0xc   :  { %v1170_v43 = vld [vmem:[%s1458_s7] sm:$0x1]  ;;  %v1211_v54 = vld [vmem:[%s1457_s5 + $0x1] sm:$0x1]  ;;  %v1218_v58 = vld [vmem:[%s1457_s5 + $0x2] sm:$0x1] }
   0xd   :  { %240 = vmatpush.msrb.mxu1 %v1091_v17  ;;  %322 = vmatpush.msrb.mxu0 %v1098_v18  ;;  %v1195_v50 = vld [vmem:[%s1451_s4 + $0x40] sm:$0xff]  ;;  %v1235_v6 = vld [vmem:[%s1451_s4 + $0x70] sm:$0xff] }
   0xe   :  { %v1248_v10 = vld [vmem:[%s1451_s4 + $0x60] sm:$0xff] }
   0xf   :  { %241 = vmatpush.msrb.mxu1 %v1103_v19  ;;  %323 = vmatpush.msrb.mxu0 %v1108_v20 }
  0x11   :  { %242 = vmatpush.msrb.mxu1 %v1115_v21  ;;  %324 = vmatpush.msrb.mxu0 %v1120_v22 }
  0x12   :  { %871 = vmatmul.msk.f32.gmra.mxu0 %vm55_vm0, %v46_v52 }
  0x86   :  { %v129_v25 = vpop.f32.mrf.mxu1 }
  0x87   :  { %v130_v26 = vadd.f32 %v129_v25, %v1129_v23  ;;  %v79_v27 = vpop.f32.mrf.mxu0  ;;  %v1271_v25 = vld [vmem:[%s1459_s8] sm:$0xff] }
  0x88   :  { %v80_v28 = vadd.f32 %v1134_v24, %v79_v27 }
  0x89   :  { %v132_v29 = vmax.f32 %v130_v26, 0.0 }
  0x8a   :  { %v85_v30 = vmul.f32 %v80_v28, %v80_v28 }
  0x8b   :  { %873 = vmatmul.msk.f32.vlgmr.msra.gmra.mxu2 %vm55_vm0, %v132_v29 }
  0x8c   :  { %v87_v31 = vmul.f32 %v85_v30, %v80_v28 }
  0x8e   :  { %v89_v32 = vmul.f32 0.044715, %v87_v31 }
  0x8f   :  { %v82_v62 = vpop.f32.mrf.mxu0 }
  0x90   :  { %v91_v33 = vadd.f32 %v89_v32, %v80_v28  ;;  %v83_v63 = vadd.f32 %v1134_v24, %v82_v62 }
  0x92   :  { %v93_v34 = vmul.f32 0.7978846, %v91_v33  ;;  %v86_v3 = vmul.f32 %v83_v63, %v83_v63  ;;  %v1285_v33 = vld [vmem:[%s1458_s7 + $0x2] sm:$0x1] }
  0x94   :  { %933 = vtanh.f32 %v93_v34  ;;  %v88_v9 = vmul.f32 %v86_v3, %v83_v63  ;;  %v358_v34 = vrot.slane %v1021_v2, 4 }
  0x96   :  { %v90_v11 = vmul.f32 0.044715, %v88_v9 }
  0x98   :  { %v92_v24 = vadd.f32 %v90_v11, %v83_v63 }
  0x9a   :  { %v934_v35 = vpop.eup %933  ;;  %v94_v26 = vmul.f32 0.7978846, %v92_v24 }
  0x9b   :  { %v97_v36 = vadd.f32 1.0, %v934_v35 }
  0x9c   :  { %935 = vtanh.f32 %v94_v26 }
  0x9d   :  { %v99_v37 = vmul.f32 0.5, %v97_v36 }
  0x9f   :  { %v101_v38 = vmul.f32 %v99_v37, %v80_v28  ;;  %v1278_v28 = vld [vmem:[%s1458_s7 + $0x1] sm:$0x1] }
  0xa1   :  { %874 = vmatpush.xpose.msk.msra.mxu3 %vm161_vm1, %v101_v38  ;;  %886 = vmatpush.xpose.msk.msrb.mxu2 %vm161_vm1, %v101_v38 }
  0xa2   :  { %898 = vmatpush.xpose.msk.msra.mxu1 %vm161_vm1, %v101_v38  ;;  %910 = vmatpush.xpose.msk.msra.mxu0 %vm161_vm1, %v101_v38  ;;  %v936_v27 = vpop.eup %935  ;;  %v1304_v38 = vld [vmem:[%s1454_s6 + $0x78] sm:$0xff] }
  0xa3   :  { %v98_v29 = vadd.f32 1.0, %v936_v27 }
  0xa5   :  { %209 = vmatpush.msrb.mxu3 %v1146_v39  ;;  %373 = vmatpush.msra.mxu2 %v1230_v5  ;;  %v100_v32 = vmul.f32 0.5, %v98_v29 }
  0xa7   :  { %210 = vmatpush.msrb.mxu3 %v1151_v40  ;;  %374 = vmatpush.msra.mxu2 %v1235_v6  ;;  %v1288_v35 = vmul.f32 %v100_v32, %v83_v63 }
  0xa9   :  { %211 = vmatpush.msrb.mxu3 %v1157_v41 }
  0xab   :  { %212 = vmatpush.msrb.mxu3 %v1163_v42 }
 0x10e   :  { %v158_v44 = vpop.f32.mrf.mxu2 }
 0x10f   :  { %v159_v45 = vadd.f32 %v158_v44, %v1170_v43  ;;  %v1310_v44 = vld [vmem:[%s1454_s6 + $0x70] sm:$0xff] }
 0x111   :  { %875 = vmatmul.msk.f32.vlgmr.msra.gmra.mxu3 %vm161_vm1, %v159_v45  ;;  %v1315_v45 = vld [vmem:[%s1460_s10 + $0x18] sm:$0xff] }
 0x112   :  { %291 = vmatpush.msra.mxu3 %v1176_v46 }
 0x114   :  { %292 = vmatpush.msra.mxu3 %v1182_v47 }
 0x116   :  { %293 = vmatpush.msra.mxu3 %v1188_v48 }
 0x118   :  { %294 = vmatpush.msra.mxu3 %v1195_v50 }
 0x119   :  { %880 = vmatmul.msk.f32.vlgmr.msrb.gmra.mxu3 %vm55_vm0, %v194_v49  ;;  %v1339_v49 = vld [vmem:[%s1460_s10 + $0x8] sm:$0xff] }
 0x11a   :  { %403 = vmatpush.msrb.mxu3 %v1304_v38 }
 0x11c   :  { %404 = vmatpush.msrb.mxu3 %v1310_v44 }
 0x121   :  { %892 = vmatmul.msk.f32.vlgmr.msra.gmra.mxu3 %vm55_vm0, %v276_v51 }
 0x194   :  { %v1206_v53 = vpop.f32.mrf.mxu3 }
 0x19c   :  { %v214_v55 = vpop.f32.mrf.mxu3 }
 0x19d   :  { %v215_v56 = vadd.f32 %v214_v55, %v1211_v54 }
 0x19f   :  { %v217_v57 = vmax.f32 %v215_v56, 0.0 }
 0x1a1   :  { %885 = vmatmul.msk.f32.vlgmr.msrb.gmra.mxu1 %vm55_vm0, %v217_v57 }
 0x1a4   :  { %v296_v59 = vpop.f32.mrf.mxu3 }
 0x1a5   :  { %v297_v60 = vadd.f32 %v296_v59, %v1218_v58  ;;  %v44_v59 = vld [vmem:[%s1452_s0 + $0x8] sm:$0x3f] }
 0x1a7   :  { %v299_v61 = vmax.f32 %v297_v60, 0.0  ;;  %v563_v60 = vrot.slane %v44_v59, 1 }
 0x1a9   :  { %897 = vmatmul.msk.f32.vlgmr.msrb.gmra.mxu0 %vm55_vm0, %v299_v61 }
 0x1aa   :  { %529 = vmatpush.msrb.mxu0 %v1041_v7  ;;  %v1241_v7 = vld [vmem:[%s1451_s4 + $0x68] sm:$0xff] }
 0x1ab   :  { %375 = vmatpush.msra.mxu2 %v1241_v7 }
 0x1ac   :  { %530 = vmatpush.msrb.mxu0 %v1063_v12  ;;  %v1254_v12 = vld [vmem:[%s1459_s8 + $0x18] sm:$0xff] }
 0x1ad   :  { %376 = vmatpush.msra.mxu2 %v1248_v10  ;;  %453 = vmatpush.msrb.mxu1 %v1254_v12 }
 0x1ae   :  { %531 = vmatpush.msrb.mxu0 %v1069_v13  ;;  %v1259_v13 = vld [vmem:[%s1459_s8 + $0x10] sm:$0xff] }
 0x1af   :  { %454 = vmatpush.msrb.mxu1 %v1259_v13 }
 0x1b0   :  { %532 = vmatpush.msrb.mxu0 %v1075_v14  ;;  %v1265_v14 = vld [vmem:[%s1459_s8 + $0x8] sm:$0xff] }
 0x1b1   :  { %455 = vmatpush.msrb.mxu1 %v1265_v14 }
 0x1b3   :  { %456 = vmatpush.msrb.mxu1 %v1271_v25 }
 0x21e   :  { %v244_v30 = vpop.f32.mrf.mxu1 }
 0x21f   :  { %v245_v31 = vadd.f32 %v244_v30, %v1278_v28 }
 0x221   :  { %887 = vmatmul.msk.f32.vlgmr.msrb.gmra.mxu2 %vm161_vm1, %v245_v31 }
 0x222   :  { %482 = vmatpush.msrb.mxu2 %v1315_v45 }
 0x226   :  { %v326_v36 = vpop.f32.mrf.mxu0 }
 0x227   :  { %v327_v37 = vadd.f32 %v326_v36, %v1285_v33 }
 0x229   :  { %899 = vmatmul.msk.f32.vlgmr.msra.gmra.mxu1 %vm161_vm1, %v327_v37  ;;  %904 = vmatmul.msk.f32.vlgmr.msra.gmra.mxu2 %vm55_vm0, %v358_v34 }
 0x22a   :  { %916 = vmatpush.xpose.msk.msra.mxu1 %vm161_vm1, %v1288_v35 }
 0x231   :  { %912 = vmatmul.msk.f32.vlgmr.msrb.gmra.mxu1 %vm55_vm0, %v1021_v2 }
 0x232   :  { %648 = vmatpush.msrb.mxu1 %v1176_v46  ;;  %v1322_v46 = vld [vmem:[%s1454_s6 + $0x68] sm:$0xff] }
 0x233   :  { %405 = vmatpush.msrb.mxu3 %v1322_v46 }
 0x234   :  { %649 = vmatpush.msrb.mxu1 %v1182_v47  ;;  %v1327_v47 = vld [vmem:[%s1460_s10 + $0x10] sm:$0xff] }
 0x235   :  { %483 = vmatpush.msrb.mxu2 %v1327_v47 }
 0x236   :  { %650 = vmatpush.msrb.mxu1 %v1188_v48  ;;  %v1334_v48 = vld [vmem:[%s1454_s6 + $0x60] sm:$0xff] }
 0x237   :  { %406 = vmatpush.msrb.mxu3 %v1334_v48  ;;  %484 = vmatpush.msrb.mxu2 %v1339_v49 }
 0x238   :  { %651 = vmatpush.msrb.mxu1 %v1195_v50  ;;  %v1347_v50 = vld [vmem:[%s1460_s10] sm:$0xff] }
 0x239   :  { %505 = vmatpush.msra.mxu3 %v1010_v0  ;;  %485 = vmatpush.msrb.mxu2 %v1347_v50 }
 0x23b   :  { %506 = vmatpush.msra.mxu3 %v1015_v1  ;;  %578 = vmatpush.msra.mxu2 %v1146_v39 }
 0x23d   :  { %507 = vmatpush.msra.mxu3 %v1029_v4  ;;  %579 = vmatpush.msra.mxu2 %v1151_v40  ;;  %v1362_v4 = vld [vmem:[%s1457_s5 + $0x3] sm:$0x1]  ;;  %v1367_v40 = vld [vmem:[%s1461_s9] sm:$0x1] }
 0x23f   :  { %508 = vmatpush.msra.mxu3 %v1046_v8  ;;  %580 = vmatpush.msra.mxu2 %v1157_v41 }
 0x241   :  { %581 = vmatpush.msra.mxu2 %v1163_v42 }
 0x2a4   :  { %v267_v0 = vpop.f32.mrf.mxu2 }
 0x2a5   :  { %v821_v51 = vrot.slane %v267_v0, 7 }
 0x2a6   :  { %v349_v52 = vpop.f32.mrf.mxu1 }
 0x2a7   :  { %v842_v1 = vsel %vm841_vm2, %v1206_v53, %v821_v51  ;;  %v824_v55 = vrot.slane %v349_v52, 6 }
 0x2a9   :  { %v844_v39 = vsel %vm843_vm3, %v842_v1, %v824_v55 }
 0x2ac   :  { %v378_v8 = vpop.f32.mrf.mxu2 }
 0x2ad   :  { %v379_v41 = vadd.f32 %v378_v8, %v1362_v4 }
 0x2ae   :  { %v458_v42 = vpop.f32.mrf.mxu1 }
 0x2af   :  { %v381_v56 = vmax.f32 %v379_v41, 0.0  ;;  %v459_v57 = vadd.f32 %v458_v42, %v1367_v40 }
 0x2b1   :  { %v461_v53 = vmax.f32 %v459_v57, 0.0  ;;  %909 = vmatmul.msk.f32.vlgmr.msrb.gmra.mxu3 %vm55_vm0, %v381_v56 }
 0x2b2   :  { %602 = vmatpush.msrb.mxu3 %v1081_v15  ;;  %v1393_v15 = vld [vmem:[%s1458_s7 + $0x3] sm:$0x1] }
 0x2b3   :  { %913 = vmatmul.msk.f32.vlgmr.msrb.gmra.mxu2 %vm55_vm0, %v461_v53 }
 0x2b4   :  { %603 = vmatpush.msrb.mxu3 %v1091_v17  ;;  %672 = vmatpush.msrb.mxu2 %v1086_v16 }
 0x2b6   :  { %604 = vmatpush.msrb.mxu3 %v1103_v19  ;;  %673 = vmatpush.msrb.mxu2 %v1098_v18 }
 0x2b8   :  { %605 = vmatpush.msrb.mxu3 %v1115_v21  ;;  %674 = vmatpush.msrb.mxu2 %v1108_v20 }
 0x2b9   :  { %914 = vmatmul.msk.f32.vlgmr.msra.gmra.mxu3 %vm55_vm0, %v44_v59 }
 0x2ba   :  { %924 = vmatpush.xpose.msk.msra.mxu3 %vm161_vm1, %v1288_v35  ;;  %675 = vmatpush.msrb.mxu2 %v1120_v22 }
 0x2bb   :  { %918 = vmatmul.msk.f32.vlgmr.msra.gmra.mxu2 %vm55_vm0, %v563_v60 }
 0x2bc   :  { %928 = vmatpush.xpose.msk.msra.mxu2 %vm161_vm1, %v1288_v35 }
 0x334   :  { %v408_v16 = vpop.f32.mrf.mxu3 }
 0x335   :  { %v409_v17 = vadd.f32 %v408_v16, %v1393_v15 }
 0x336   :  { %v1396_v18 = vpop.f32.mrf.mxu2 }
 0x337   :  { %911 = vmatmul.msk.f32.vlgmr.msra.gmra.mxu0 %vm161_vm1, %v409_v17 }
 0x338   :  { %920 = vmatpush.xpose.msk.msra.mxu0 %vm161_vm1, %v1288_v35 }
 0x33c   :  { %v510_v19 = vpop.f32.mrf.mxu3 }
 0x33d   :  { %v511_v20 = vadd.f32 %v510_v19, %v1129_v23 }
 0x33e   :  { %v583_v21 = vpop.f32.mrf.mxu2 }
 0x33f   :  { %v513_v22 = vmax.f32 %v511_v20, 0.0  ;;  %v584_v61 = vadd.f32 %v583_v21, %v1211_v54 }
 0x341   :  { %v586_v62 = vmax.f32 %v584_v61, 0.0  ;;  %915 = vmatmul.msk.f32.vlgmr.msrb.gmra.mxu0 %vm55_vm0, %v513_v22 }
 0x342   :  { %718 = vmatpush.msrb.mxu0 %v1230_v5 }
 0x343   :  { %919 = vmatmul.msk.f32.vlgmr.msrb.gmra.mxu3 %vm55_vm0, %v586_v62 }
 0x344   :  { %719 = vmatpush.msrb.mxu0 %v1235_v6  ;;  %788 = vmatpush.msrb.mxu3 %v1254_v12  ;;  %v633_v6 = vrot.slane %v44_v59, 2 }
 0x346   :  { %720 = vmatpush.msrb.mxu0 %v1241_v7  ;;  %789 = vmatpush.msrb.mxu3 %v1259_v13 }
 0x348   :  { %721 = vmatpush.msrb.mxu0 %v1248_v10  ;;  %790 = vmatpush.msrb.mxu3 %v1265_v14 }
 0x34a   :  { %791 = vmatpush.msrb.mxu3 %v1271_v25 }
 0x3b4   :  { %v431_v23 = vpop.f32.mrf.mxu0 }
 0x3b5   :  { %v827_v54 = vrot.slane %v431_v23, 5 }
 0x3b7   :  { %v846_v63 = vsel %vm845_vm4, %v844_v39, %v827_v54 }
 0x3be   :  { %v534_v3 = vpop.f32.mrf.mxu0 }
 0x3bf   :  { %v535_v5 = vadd.f32 %v534_v3, %v1170_v43  ;;  %v703_v43 = vrot.slane %v44_v59, 3 }
 0x3c1   :  { %917 = vmatmul.msk.f32.vlgmr.msra.gmra.mxu1 %vm161_vm1, %v535_v5 }
 0x3c2   :  { %742 = vmatpush.msra.mxu1 %v1304_v38 }
 0x3c4   :  { %743 = vmatpush.msra.mxu1 %v1310_v44 }
 0x3c6   :  { %v607_v7 = vpop.f32.mrf.mxu3  ;;  %744 = vmatpush.msra.mxu1 %v1322_v46 }
 0x3c7   :  { %v608_v9 = vadd.f32 %v607_v7, %v1278_v28 }
 0x3c8   :  { %745 = vmatpush.msra.mxu1 %v1334_v48 }
 0x3c9   :  { %921 = vmatmul.msk.f32.vlgmr.msra.gmra.mxu0 %vm161_vm1, %v608_v9  ;;  %922 = vmatmul.msk.f32.vlgmr.msrb.gmra.mxu1 %vm55_vm0, %v633_v6 }
 0x3ca   :  { %812 = vmatpush.msra.mxu0 %v1315_v45 }
 0x3cc   :  { %813 = vmatpush.msra.mxu0 %v1327_v47 }
 0x3ce   :  { %814 = vmatpush.msra.mxu0 %v1339_v49 }
 0x3d0   :  { %815 = vmatpush.msra.mxu0 %v1347_v50 }
 0x3d1   :  { %926 = vmatmul.msk.f32.vlgmr.msrb.gmra.mxu0 %vm55_vm0, %v703_v43 }
 0x43e   :  { %v560_v10 = vpop.f32.mrf.mxu1 }
 0x43f   :  { %v830_v11 = vrot.slane %v560_v10, 4 }
 0x441   :  { %v848_v12 = vsel %vm847_vm5, %v846_v63, %v830_v11 }
 0x446   :  { %v630_v13 = vpop.f32.mrf.mxu0  ;;  %v653_v14 = vpop.f32.mrf.mxu1 }
 0x447   :  { %v833_v24 = vrot.slane %v630_v13, 3  ;;  %v654_v25 = vadd.f32 %v653_v14, %v1218_v58  ;;  %v773_v58 = vrot.slane %v1021_v2, 7  ;;  %v466_v2 = vld [vmem:[%s1463_s11] sm:$0x1] }
 0x448   :  { %v488_v0 = vadd.f32 %v1396_v18, %v466_v2 }
 0x449   :  { %v850_v26 = vsel %vm849_vm6, %v848_v12, %v833_v24  ;;  %v656_v27 = vmax.f32 %v654_v25, 0.0 }
 0x44b   :  { %923 = vmatmul.msk.f32.vlgmr.msrb.gmra.mxu2 %vm55_vm0, %v656_v27 }
 0x44e   :  { %v723_v28 = vpop.f32.mrf.mxu0 }
 0x44f   :  { %v724_v29 = vadd.f32 %v723_v28, %v1362_v4 }
 0x451   :  { %v726_v30 = vmax.f32 %v724_v29, 0.0 }
 0x453   :  { %927 = vmatmul.msk.f32.vlgmr.msra.gmra.mxu1 %vm55_vm0, %v726_v30 }
 0x4ce   :  { %v677_v31 = vpop.f32.mrf.mxu2 }
 0x4cf   :  { %v678_v32 = vadd.f32 %v677_v31, %v1285_v33 }
 0x4d0   :  { %v747_v34 = vpop.f32.mrf.mxu1 }
 0x4d1   :  { %v748_v35 = vadd.f32 %v747_v34, %v1393_v15  ;;  %925 = vmatmul.msk.f32.vlgmr.msra.gmra.mxu3 %vm161_vm1, %v678_v32 }
 0x4d3   :  { %929 = vmatmul.msk.f32.vlgmr.msra.gmra.mxu2 %vm161_vm1, %v748_v35 }
 0x4d9   :  { %930 = vmatmul.msk.f32.vlgmr.msrb.gmra.mxu3 %vm55_vm0, %v773_v58 }
 0x554   :  { %v700_v36 = vpop.f32.mrf.mxu3 }
 0x555   :  { %v836_v37 = vrot.slane %v700_v36, 2 }
 0x556   :  { %v770_v38 = vpop.f32.mrf.mxu2 }
 0x557   :  { %v852_v44 = vsel %vm851_vm7, %v850_v26, %v836_v37  ;;  %v839_v45 = vrot.slane %v770_v38, 1 }
 0x559   :  { %v854_v46 = vsel %vm853_vm8, %v852_v44, %v839_v45 }
 0x55a   :  { %855 = vst.msk [vmem:[%s1462_s12] sm:$0xff] %vm161_vm1, %v854_v46 }
 0x55c   :  { %v793_v33 = vpop.f32.mrf.mxu3 }
 0x55d   :  { %v794_v47 = vadd.f32 %v793_v33, %v1367_v40 }
 0x55f   :  { %v796_v48 = vmax.f32 %v794_v47, 0.0 }
 0x561   :  { %931 = vmatmul.msk.f32.vlgmr.msra.gmra.mxu0 %vm55_vm0, %v796_v48 }
 0x5de   :  { %v817_v49 = vpop.f32.mrf.mxu0 }
 0x5df   :  { %v818_v50 = vadd.f32 %v817_v49, %v466_v2 }
 0x5e1   :  { %v857_v51 = vrot.slane %v818_v50, 7 }
 0x5e3   :  { %v859_v52 = vsel %vm841_vm2, %v488_v0, %v857_v51 }
 0x5e4   :  { %861 = vst.msk [vmem:[%s1464_s13] sm:$0x3] %vm860_vm9, %v859_v52 }

// kernel: _sam_single.4
= control target key start
LH: loop header
LB: loop body
LE: loop exit
PB: predicated region body
PF: predicated region fallthrough
CT: control target
= control target key end

     0   :  { %vm54_vm0 = vcmask 261120   ;;  %vm144_vm1 = vcmask 130048   ;;  %vm285_vm2 = vcmask 1040384   ;;  %vm172_vm3 = vcmask 55296   ;;  %s2374_s19 = smov 16   ;;  %s3085_s3 = inlined_call_operand.vmem [shape: f32[16,32,32], index: 3, kind: input, shape index: {}]   ;;  %s3086_s0 = inlined_call_operand.vmem [shape: f32[14,32], index: 0, kind: input, shape index: {}]   ;;  %s3087_s4 = inlined_call_operand.vmem [shape: f32[16,32], index: 4, kind: input, shape index: {}]   ;;  %s3088_s9 = inlined_call_operand.vmem [shape: f32[5,32], index: 9, kind: input, shape index: {}]   ;;  %s3089_s10 = inlined_call_operand.vmem [shape: f32[5,32], index: 10, kind: input, shape index: {}]   ;;  %s3090_s1 = inlined_call_operand.vmem [shape: f32[16,32], index: 1, kind: input, shape index: {}]   ;;  %s3091_s2 = inlined_call_operand.vmem [shape: f32[16,32], index: 2, kind: input, shape index: {}]   ;;  %s3092_s6 = inlined_call_operand.vmem [shape: f32[1,64], index: 6, kind: input, shape index: {}]   ;;  %s3093_s5 = inlined_call_operand.vmem [shape: f32[32,64], index: 5, kind: input, shape index: {}]   ;;  %s3094_s8 = inlined_call_operand.vmem [shape: f32[1,32], index: 8, kind: input, shape index: {}]   ;;  %s3095_s7 = inlined_call_operand.vmem [shape: f32[64,32], index: 7, kind: input, shape index: {}]   ;;  %s3096_s12 = inlined_call_operand.vmem [shape: f32[16,32], index: 12, kind: output, shape index: {1}]   ;;  %s3097_s11 = inlined_call_operand.vmem [shape: f32[14,32], index: 11, kind: output, shape index: {0}]  }
   0x1   :  { %v51_v0 = vld [vmem:[%s3085_s3 + $0x18] sm:$0xff]  ;;  %v50_v2 = vld [vmem:[%s3085_s3 + $0x10] sm:$0xff]  ;;  %v49_v4 = vld [vmem:[%s3085_s3 + $0x8] sm:$0xff]  ;;  %vm188_vm4 = vcmask 1046528   ;;  %vm184_vm5 = vcmask 56320   ;;  %vm476_vm6 = vcmask 259072  }
   0x2   :  { %v2101_v1 = vld [vmem:[%s3085_s3 + $0x38] sm:$0xff]  ;;  %73 = vmatpush.msra.mxu0 %v51_v0  ;;  %v2100_v3 = vld [vmem:[%s3085_s3 + $0x30] sm:$0xff]  ;;  %v2099_v5 = vld [vmem:[%s3085_s3 + $0x28] sm:$0xff]  ;;  %vm666_vm14 = vcmask 63488   ;;  %vm678_vm15 = vcmask 64512  }
   0x3   :  { %103 = vmatpush.msra.mxu1 %v2101_v1  ;;  %v48_v6 = vld [vmem:[%s3085_s3] sm:$0xff]  ;;  %v2477_v9 = vld [vmem:[%s3086_s0 + $0x8] sm:$0x3f]  ;;  %v2107_v27 = vld [vmem:[%s3085_s3 + $0x58] sm:$0xff] }
   0x4   :  { %74 = vmatpush.msra.mxu0 %v50_v2  ;;  %v2098_v7 = vld [vmem:[%s3085_s3 + $0x20] sm:$0xff]  ;;  %v2106_v28 = vld [vmem:[%s3085_s3 + $0x50] sm:$0xff]  ;;  %133 = vmatpush.msra.mxu2 %v2107_v27  ;;  %v2105_v30 = vld [vmem:[%s3085_s3 + $0x48] sm:$0xff] }
   0x5   :  { %104 = vmatpush.msra.mxu1 %v2100_v3  ;;  %v2468_v8 = vld [vmem:[%s3086_s0] sm:$0xff]  ;;  %s2373_s0 = smov 112  }
   0x6   :  { %75 = vmatpush.msra.mxu0 %v49_v4  ;;  %v2251_v10 = vld [vmem:[%s3087_s4] ss:$0 sm:$0xff]  ;;  %v2252_v11 = vld [vmem:[%s3087_s4 + $0x1] ss:$0 sm:$0xff]  ;;  %134 = vmatpush.msra.mxu2 %v2106_v28  ;;  %v2253_v46 = vld [vmem:[%s3087_s4 + $0x2] ss:$0 sm:$0xff] }
   0x7   :  { %105 = vmatpush.msra.mxu1 %v2099_v5  ;;  %v2104_v35 = vld [vmem:[%s3085_s3 + $0x40] sm:$0xff] }
   0x8   :  { %76 = vmatpush.msra.mxu0 %v48_v6  ;;  %135 = vmatpush.msra.mxu2 %v2105_v30  ;;  %v2129_v30 = vld [vmem:[%s3085_s3 + $0x78] sm:$0xff] }
   0x9   :  { %106 = vmatpush.msra.mxu1 %v2098_v7  ;;  %2096 = vmatmul.msk.f32.vlgmr.msra.gmra.mxu0 %vm54_vm0, %v2468_v8 }
   0xa   :  { %2102 = vmatmul.msk.f32.vlgmr.msra.gmra.mxu1 %vm54_vm0, %v2468_v8  ;;  %136 = vmatpush.msra.mxu2 %v2104_v35 }
   0xb   :  { %2108 = vmatmul.msk.f32.vlgmr.msra.gmra.mxu2 %vm54_vm0, %v2468_v8 }
  0x11   :  { %2097 = vmatmul.msk.f32.gmra.mxu0 %vm54_vm0, %v2477_v9 }
  0x12   :  { %2103 = vmatmul.msk.f32.gmra.mxu1 %vm54_vm0, %v2477_v9 }
  0x13   :  { %2109 = vmatmul.msk.f32.gmra.mxu2 %vm54_vm0, %v2477_v9 }
  0x86   :  { %v78_v12 = vpop.f32.mrf.mxu0 }
  0x87   :  { %v108_v13 = vpop.f32.mrf.mxu1  ;;  %v79_v14 = vadd.f32 %v2251_v10, %v78_v12 }
  0x88   :  { %v109_v15 = vadd.f32 %v2252_v11, %v108_v13 }
  0x89   :  { %212 = vrot.lane.b32.xlu2 %v79_v14, %s2373_s0  ;;  %v286_v24 = vrot.slane %v79_v14, 7 }
  0x8a   :  { %2110 = vmatpush.xpose.msk.msra.mxu3 %vm144_vm1, %v109_v15  ;;  %v290_v20 = vrot.slane %v109_v15, 7 }
  0x8d   :  { %2111 = vmatmul.msk.f32.vlgmr.msra.gmra.mxu3 %vm144_vm1, %v79_v14 }
  0x8e   :  { %v81_v16 = vpop.f32.mrf.mxu0  ;;  %v138_v47 = vpop.f32.mrf.mxu2 }
  0x8f   :  { %v111_v17 = vpop.f32.mrf.mxu1  ;;  %v82_v18 = vadd.f32 %v2251_v10, %v81_v16  ;;  %v139_v48 = vadd.f32 %v2253_v46, %v138_v47 }
  0x90   :  { %v112_v19 = vadd.f32 %v2252_v11, %v111_v17 }
  0x91   :  { %v287_v22 = vrot.slane %v82_v18, 7  ;;  %2112 = vmatpush.msk.msrb.mxu3 %vm188_vm4, %v139_v48  ;;  %v330_v55 = vrot.slane %v139_v48, 7 }
  0x92   :  { %v291_v21 = vrot.slane %v112_v19, 7 }
  0x93   :  { %v288_v25 = vsel %vm285_vm2, %v286_v24, %v287_v22 }
  0x94   :  { %v292_v23 = vsel %vm285_vm2, %v290_v20, %v291_v21 }
  0x95   :  { %2118 = vmatpush.xpose.msk.msrb.mxu1 %vm144_vm1, %v292_v23 }
  0x96   :  { %v141_v53 = vpop.f32.mrf.mxu2 }
  0x97   :  { %v142_v54 = vadd.f32 %v2253_v46, %v141_v53 }
  0x98   :  { %2119 = vmatmul.msk.f32.vlgmr.msrb.gmra.mxu1 %vm144_vm1, %v288_v25 }
  0x99   :  { %v331_v56 = vrot.slane %v142_v54, 7  ;;  %458 = vmatpush.msra.mxu1 %v2129_v30  ;;  %v2255_v30 = vld [vmem:[%s3088_s9] ss:$0 sm:$0xff] }
  0x9b   :  { %v332_v59 = vsel %vm285_vm2, %v330_v55, %v331_v56 }
  0xe3   :  { %v213_v52 = vpop.permute.xlu2 %212 }
 0x110   :  { %v168_v26 = vpop.f32.mrf.mxu3 }
 0x111   :  { %v171_v29 = vmul.f32 0.25, %v168_v26 }
 0x113   :  { %v173_v31 = vsel %vm172_vm3, %v171_v29, -inf }
 0x114   :  { %174 = vmax.xlane.f32.xlu0 %v173_v31  ;;  %v2128_v31 = vld [vmem:[%s3085_s3 + $0x70] sm:$0xff] }
 0x115   :  { %v314_v32 = vpop.f32.mrf.mxu1  ;;  %459 = vmatpush.msra.mxu1 %v2128_v31 }
 0x116   :  { %v317_v33 = vmul.f32 0.25, %v314_v32  ;;  %v2127_v32 = vld [vmem:[%s3085_s3 + $0x68] sm:$0xff] }
 0x117   :  { %460 = vmatpush.msra.mxu1 %v2127_v32 }
 0x118   :  { %v318_v34 = vsel %vm172_vm3, %v317_v33, -inf }
 0x11c   :  { %319 = vmax.xlane.f32.xlu0 %v318_v34 }
 0x130   :  { %360 = vrot.lane.b32.xlu0 %v292_v23, %s2373_s0 }
 0x187   :  { %v175_v36 = vpop.xlane.xlu0 %174 }
 0x188   :  { %v176_v37 = vsub.f32 %v171_v29, %v175_v36 }
 0x18a   :  { %v177_v38 = vmul.f32 1.442695, %v176_v37 }
 0x18c   :  { %2279 = vpow2.f32 %v177_v38 }
 0x18f   :  { %v320_v39 = vpop.xlane.xlu0 %319 }
 0x190   :  { %v321_v40 = vsub.f32 %v317_v33, %v320_v39  ;;  %v2126_v33 = vld [vmem:[%s3085_s3 + $0x60] sm:$0xff] }
 0x191   :  { %461 = vmatpush.msra.mxu1 %v2126_v33 }
 0x192   :  { %v2280_v41 = vpop.eup %2279  ;;  %v322_v42 = vmul.f32 1.442695, %v321_v40  ;;  %v2254_v40 = vld [vmem:[%s3087_s4 + $0x3] ss:$0 sm:$0xff] }
 0x193   :  { %v179_v43 = vsel %vm172_vm3, %v2280_v41, 0.0 }
 0x194   :  { %2281 = vpow2.f32 %v322_v42  ;;  %180 = vadd.xlane.f32.xlu1 %v179_v43 }
 0x19a   :  { %v2282_v44 = vpop.eup %2281 }
 0x19b   :  { %v324_v45 = vsel %vm172_vm3, %v2282_v44, 0.0 }
 0x19c   :  { %325 = vadd.xlane.f32.xlu2 %v324_v45 }
 0x1a2   :  { %v361_v60 = vpop.permute.xlu0 %360 }
 0x1ad   :  { %214 = vrot.lane.b32.xlu1 %v109_v15, %s2373_s0 }
 0x1b4   :  { %358 = vrot.lane.b32.xlu2 %v288_v25, %s2373_s0 }
 0x207   :  { %v181_v49 = vpop.xlane.xlu1 %180 }
 0x208   :  { %2283 = vrcp.f32 %v181_v49  ;;  %v2375_v49 = vmov 32.0  }
 0x20e   :  { %v2284_v50 = vpop.eup %2283 }
 0x20f   :  { %v183_v51 = vmul.f32 %v2284_v50, %v2280_v41  ;;  %v326_v57 = vpop.xlane.xlu2 %325 }
 0x210   :  { %2285 = vrcp.f32 %v326_v57 }
 0x211   :  { %2113 = vmatmul.msk.f32.vlgmr.msrb.gmra.mxu3 %vm184_vm5, %v183_v51 }
 0x216   :  { %v2286_v61 = vpop.eup %2285 }
 0x217   :  { %v328_v62 = vmul.f32 %v2286_v61, %v2282_v44  ;;  %v359_v63 = vpop.permute.xlu2 %358 }
 0x21f   :  { %v215_v58 = vpop.permute.xlu1 %214 }
 0x220   :  { %2114 = vmatpush.xpose.msk.msra.mxu3 %vm144_vm1, %v215_v58 }
 0x223   :  { %2115 = vmatmul.msk.f32.vlgmr.msra.gmra.mxu3 %vm144_vm1, %v213_v52 }
 0x224   :  { %2120 = vmatpush.msk.msrb.mxu3 %vm188_vm4, %v332_v59 }
 0x226   :  { %2122 = vmatpush.xpose.msk.msra.mxu3 %vm144_vm1, %v361_v60 }
 0x22b   :  { %2121 = vmatmul.msk.f32.vlgmr.msrb.gmra.mxu3 %vm184_vm5, %v328_v62 }
 0x233   :  { %2123 = vmatmul.msk.f32.vlgmr.msra.gmra.mxu3 %vm144_vm1, %v359_v63 }
 0x294   :  { %v209_v0 = vpop.f32.mrf.mxu3 }
 0x2a6   :  { %v237_v1 = vpop.f32.mrf.mxu3 }
 0x2a7   :  { %v240_v2 = vmul.f32 0.25, %v237_v1  ;;  %v2140_v1 = vld [vmem:[%s3085_s3 + $0xb0] sm:$0xff] }
 0x2a9   :  { %v241_v3 = vsel %vm172_vm3, %v240_v2, -inf }
 0x2aa   :  { %242 = vmax.xlane.f32.xlu1 %v241_v3  ;;  %v2139_v3 = vld [vmem:[%s3085_s3 + $0xa8] sm:$0xff] }
 0x2ae   :  { %v355_v4 = vpop.f32.mrf.mxu3 }
 0x2b6   :  { %v383_v5 = vpop.f32.mrf.mxu3 }
 0x2b7   :  { %v386_v6 = vmul.f32 0.25, %v383_v5  ;;  %v44_v5 = vld [vmem:[%s3091_s2] sm:$0xff] }
 0x2b9   :  { %v387_v7 = vsel %vm172_vm3, %v386_v6, -inf }
 0x2ba   :  { %388 = vmax.xlane.f32.xlu0 %v387_v7  ;;  %v2138_v7 = vld [vmem:[%s3085_s3 + $0xa0] sm:$0xff] }
 0x2ce   :  { %252 = vrot.lane.b32.xlu0 %v139_v48, %s2373_s0 }
 0x31d   :  { %v243_v10 = vpop.xlane.xlu1 %242 }
 0x31e   :  { %v244_v11 = vsub.f32 %v240_v2, %v243_v10  ;;  %v2135_v2 = vld [vmem:[%s3085_s3 + $0x98] sm:$0xff] }
 0x31f   :  { %556 = vmatpush.msrb.mxu2 %v2135_v2  ;;  %v2144_v2 = vld [vmem:[%s3085_s3 + $0xc0] sm:$0xff] }
 0x320   :  { %v245_v12 = vmul.f32 1.442695, %v244_v11  ;;  %v2133_v11 = vld [vmem:[%s3085_s3 + $0x88] sm:$0xff] }
 0x322   :  { %2287 = vpow2.f32 %v245_v12  ;;  %v2132_v12 = vld [vmem:[%s3085_s3 + $0x80] sm:$0xff] }
 0x328   :  { %v2288_v13 = vpop.eup %2287 }
 0x329   :  { %v247_v14 = vsel %vm172_vm3, %v2288_v13, 0.0 }
 0x32a   :  { %248 = vadd.xlane.f32.xlu2 %v247_v14 }
 0x32d   :  { %v389_v15 = vpop.xlane.xlu0 %388 }
 0x32e   :  { %v390_v16 = vsub.f32 %v386_v6, %v389_v15  ;;  %v2134_v6 = vld [vmem:[%s3085_s3 + $0x90] sm:$0xff]  ;;  %v2618_v15 = vld [vmem:[%s3090_s1 + $0x8] sm:$0xff] }
 0x32f   :  { %557 = vmatpush.msrb.mxu2 %v2134_v6 }
 0x330   :  { %v391_v17 = vmul.f32 1.442695, %v390_v16  ;;  %v45_v16 = vld [vmem:[%s3091_s2 + $0x8] sm:$0xff] }
 0x331   :  { %558 = vmatpush.msrb.mxu2 %v2133_v11 }
 0x332   :  { %2289 = vpow2.f32 %v391_v17 }
 0x333   :  { %559 = vmatpush.msrb.mxu2 %v2132_v12 }
 0x338   :  { %v2290_v18 = vpop.eup %2289 }
 0x339   :  { %v393_v19 = vsel %vm172_vm3, %v2290_v18, 0.0 }
 0x33a   :  { %394 = vadd.xlane.f32.xlu1 %v393_v19 }
 0x340   :  { %v253_v20 = vpop.permute.xlu0 %252 }
 0x341   :  { %2116 = vmatpush.msk.msrb.mxu0 %vm188_vm4, %v253_v20 }
 0x342   :  { %398 = vrot.lane.b32.xlu2 %v332_v59, %s2373_s0 }
 0x39d   :  { %v249_v21 = vpop.xlane.xlu2 %248 }
 0x39e   :  { %2291 = vrcp.f32 %v249_v21 }
 0x3a4   :  { %v2292_v22 = vpop.eup %2291 }
 0x3a5   :  { %v399_v23 = vpop.permute.xlu2 %398  ;;  %v251_v24 = vmul.f32 %v2292_v22, %v2288_v13 }
 0x3a6   :  { %2124 = vmatpush.msk.msra.mxu0 %vm188_vm4, %v399_v23 }
 0x3a7   :  { %2117 = vmatmul.msk.f32.vlgmr.msrb.gmra.mxu0 %vm184_vm5, %v251_v24 }
 0x3ad   :  { %v395_v25 = vpop.xlane.xlu1 %394 }
 0x3ae   :  { %2293 = vrcp.f32 %v395_v25 }
 0x3af   :  { %2295 = vrcp.f32 %v2375_v49  ;;  %v2258_v49 = vld [vmem:[%s3087_s4 + $0x4] ss:$0 sm:$0xff] }
 0x3b4   :  { %v2294_v26 = vpop.eup %2293 }
 0x3b5   :  { %v397_v27 = vmul.f32 %v2294_v26, %v2290_v18  ;;  %v2296_v50 = vpop.eup %2295  ;;  %v2624_v18 = vadd.f32 %v45_v16, %v2618_v15 }
 0x3b6   :  { %v481_v51 = vmul.f32 32.0, %v2296_v50  ;;  %vm485_vm7 = vweird.f32 %v2296_v50 }
 0x3b7   :  { %2125 = vmatmul.msk.f32.vlgmr.msra.gmra.mxu0 %vm184_vm5, %v397_v27 }
 0x3b8   :  { %v482_v52 = vsub.f32 1.0, %v481_v51 }
 0x3ba   :  { %v483_v53 = vmul.f32 %v2296_v50, %v482_v52 }
 0x3bc   :  { %v484_v54 = vadd.f32 %v2296_v50, %v483_v53 }
 0x424   :  { %v276_v28 = vpop.f32.mrf.mxu0 }
 0x425   :  { %280 = vrot.lane.b32.xlu0 %v276_v28, %s2374_s19 }
 0x434   :  { %v422_v29 = vpop.f32.mrf.mxu0 }
 0x435   :  { %426 = vrot.lane.b32.xlu1 %v422_v29, %s2374_s19 }
 0x497   :  { %v281_v34 = vpop.permute.xlu0 %280 }
 0x498   :  { %v283_v38 = vsel %vm144_vm1, %v209_v0, %v281_v34  ;;  %v2141_v0 = vld [vmem:[%s3085_s3 + $0xb8] sm:$0xff]  ;;  %v2256_v34 = vld [vmem:[%s3089_s10] ss:$0 sm:$0xff] }
 0x499   :  { %592 = vmatpush.msrb.mxu3 %v2141_v0 }
 0x49b   :  { %593 = vmatpush.msrb.mxu3 %v2140_v1  ;;  %v2145_v1 = vld [vmem:[%s3085_s3 + $0xc8] sm:$0xff] }
 0x49d   :  { %594 = vmatpush.msrb.mxu3 %v2139_v3 }
 0x49f   :  { %595 = vmatpush.msrb.mxu3 %v2138_v7 }
 0x4a7   :  { %v427_v35 = vpop.permute.xlu1 %426 }
 0x4a8   :  { %v429_v36 = vsel %vm144_vm1, %v355_v4, %v427_v35  ;;  %v2592_v4 = vld [vmem:[%s3090_s1] sm:$0xff] }
 0x4a9   :  { %v431_v37 = vrot.slane %v429_v36, 1  ;;  %v2604_v10 = vadd.f32 %v44_v5, %v2592_v4 }
 0x4ab   :  { %v433_v39 = vsel %vm188_vm4, %v283_v38, %v431_v37  ;;  %2142 = vmatmul.msk.f32.vlgmr.msrb.gmra.mxu3 %vm54_vm0, %v2604_v10 }
 0x4ac   :  { %2130 = vmatmul.msk.f32.vlgmr.msra.gmra.mxu1 %vm54_vm0, %v433_v39 }
 0x4b3   :  { %2143 = vmatmul.msk.f32.gmra.mxu3 %vm54_vm0, %v2624_v18 }
 0x4b4   :  { %2131 = vmatmul.msk.f32.gmra.mxu1 %vm54_vm0, %v431_v37 }
 0x529   :  { %v463_v41 = vpop.f32.mrf.mxu1 }
 0x52a   :  { %v464_v42 = vadd.f32 %v2254_v40, %v463_v41 }
 0x52c   :  { %v469_v43 = vadd.f32 %v464_v42, %v2468_v8  ;;  %v2567_v8 = vsel %vm485_vm7, %v2296_v50, %v484_v54 }
 0x52e   :  { %v473_v44 = vsel %vm54_vm0, %v469_v43, 0.0 }
 0x52f   :  { %474 = vadd.xlane.f32.xlu2 %v473_v44  ;;  %v2257_v44 = vld [vmem:[%s3087_s4 + $0x5] ss:$0 sm:$0xff] }
 0x531   :  { %v466_v45 = vpop.f32.mrf.mxu1 }
 0x532   :  { %v467_v46 = vadd.f32 %v2254_v40, %v466_v45  ;;  %v597_v45 = vpop.f32.mrf.mxu3 }
 0x534   :  { %v470_v47 = vadd.f32 %v467_v46, %v2477_v9  ;;  %v598_v46 = vadd.f32 %v2257_v44, %v597_v45 }
 0x536   :  { %v477_v48 = vsel %vm476_vm6, %v470_v47, 0.0  ;;  %2150 = vmatpush.xpose.msk.msrb.mxu1 %vm144_vm1, %v598_v46 }
 0x537   :  { %478 = vadd.xlane.f32.xlu0 %v477_v48 }
 0x54b   :  { %704 = vrot.lane.b32.xlu0 %v598_v46, %s2373_s0 }
 0x5a2   :  { %v475_v55 = vpop.xlane.xlu2 %474 }
 0x5a3   :  { %v487_v56 = vmul.f32 %v2567_v8, %v475_v55 }
 0x5a5   :  { %v489_v57 = vsub.f32 %v469_v43, %v487_v56 }
 0x5a7   :  { %v491_v58 = vmul.f32 %v489_v57, %v489_v57 }
 0x5a9   :  { %v493_v9 = vsel %vm54_vm0, %v491_v58, 0.0 }
 0x5aa   :  { %v479_v59 = vpop.xlane.xlu0 %478  ;;  %494 = vadd.xlane.f32.xlu1 %v493_v9  ;;  %v2147_v9 = vld [vmem:[%s3085_s3 + $0xd8] sm:$0xff] }
 0x5ab   :  { %v488_v60 = vmul.f32 %v2567_v8, %v479_v59  ;;  %v2146_v59 = vld [vmem:[%s3085_s3 + $0xd0] sm:$0xff]  ;;  %628 = vmatpush.msrb.mxu0 %v2147_v9  ;;  %v2165_v9 = vld [vmem:[%s3085_s3 + $0xf8] sm:$0xff] }
 0x5ad   :  { %v2572_v61 = vsub.f32 %v470_v47, %v488_v60  ;;  %v600_v47 = vpop.f32.mrf.mxu3  ;;  %629 = vmatpush.msrb.mxu0 %v2146_v59  ;;  %v2164_v59 = vld [vmem:[%s3085_s3 + $0xf0] sm:$0xff] }
 0x5ae   :  { %v601_v48 = vadd.f32 %v2257_v44, %v600_v47 }
 0x5af   :  { %v492_v62 = vmul.f32 %v2572_v61, %v2572_v61  ;;  %630 = vmatpush.msrb.mxu0 %v2145_v1 }
 0x5b0   :  { %2156 = vmatpush.xpose.msk.msra.mxu1 %vm144_vm1, %v601_v48 }
 0x5b1   :  { %v496_v63 = vsel %vm476_vm6, %v492_v62, 0.0  ;;  %631 = vmatpush.msrb.mxu0 %v2144_v2 }
 0x5b2   :  { %497 = vadd.xlane.f32.xlu2 %v496_v63  ;;  %2148 = vmatmul.msk.f32.vlgmr.msrb.gmra.mxu0 %vm54_vm0, %v2592_v4  ;;  %v2259_v4 = vld [vmem:[%s3087_s4 + $0x6] ss:$0 sm:$0xff] }
 0x5ba   :  { %2149 = vmatmul.msk.f32.gmra.mxu0 %vm54_vm0, %v2618_v15 }
 0x5ca   :  { %840 = vrot.lane.b32.xlu2 %v601_v48, %s2373_s0 }
 0x61d   :  { %v495_v13 = vpop.xlane.xlu1 %494 }
 0x61e   :  { %v499_v14 = vmul.f32 %v495_v13, %v2567_v8 }
 0x620   :  { %v501_v17 = vadd.f32 1e-05, %v499_v14 }
 0x622   :  { %2297 = vrsqrt.f32 %v501_v17  ;;  %vm509_vm9 = vweird.f32 %v501_v17 }
 0x625   :  { %v498_v19 = vpop.xlane.xlu2 %497 }
 0x626   :  { %v500_v20 = vmul.f32 %v498_v19, %v2567_v8 }
 0x628   :  { %v2298_v21 = vpop.eup %2297  ;;  %v502_v22 = vadd.f32 1e-05, %v500_v20 }
 0x629   :  { %v504_v23 = vmul.f32 %v2298_v21, %v501_v17  ;;  %vm510_vm8 = vweird.f32 %v2298_v21 }
 0x62a   :  { %2299 = vrsqrt.f32 %v502_v22  ;;  %vm511_vm10 = vmor %vm509_vm9, %vm510_vm8  ;;  %vm519_vm12 = vweird.f32 %v502_v22 }
 0x62b   :  { %v505_v24 = vmul.f32 %v2298_v21, %v504_v23 }
 0x62d   :  { %v506_v25 = vmul.f32 0.5, %v505_v24  ;;  %v841_v58 = vpop.permute.xlu2 %840 }
 0x62f   :  { %v507_v26 = vsub.f32 1.5, %v506_v25  ;;  %v633_v15 = vpop.f32.mrf.mxu0 }
 0x630   :  { %v2300_v27 = vpop.eup %2299  ;;  %v634_v17 = vadd.f32 %v2259_v4, %v633_v15 }
 0x631   :  { %v508_v28 = vmul.f32 %v2298_v21, %v507_v26  ;;  %v514_v29 = vmul.f32 %v2300_v27, %v502_v22  ;;  %vm520_vm11 = vweird.f32 %v2300_v27 }
 0x632   :  { %vm521_vm13 = vmor %vm519_vm12, %vm520_vm11  ;;  %697 = vmatpush.msra.mxu2 %v634_v17  ;;  %vm1070_vm12 = vcmask 523264  }
 0x633   :  { %v512_v31 = vsel %vm511_vm10, %v2298_v21, %v508_v28  ;;  %v515_v32 = vmul.f32 %v2300_v27, %v514_v29 }
 0x634   :  { %v523_v33 = vmul.f32 %v512_v31, %v489_v57  ;;  %v705_v57 = vpop.permute.xlu0 %704 }
 0x635   :  { %v516_v35 = vmul.f32 0.5, %v515_v32  ;;  %2153 = vmatpush.xpose.msk.msra.mxu3 %vm144_vm1, %v705_v57 }
 0x636   :  { %v526_v36 = vmul.f32 %v2255_v30, %v523_v33 }
 0x637   :  { %v517_v37 = vsub.f32 1.5, %v516_v35  ;;  %v636_v19 = vpop.f32.mrf.mxu0 }
 0x638   :  { %v2635_v38 = vadd.f32 %v2256_v34, %v526_v36  ;;  %v637_v20 = vadd.f32 %v2259_v4, %v636_v19 }
 0x639   :  { %v518_v39 = vmul.f32 %v2300_v27, %v517_v37  ;;  %2159 = vmatpush.xpose.msk.msrb.mxu3 %vm144_vm1, %v841_v58 }
 0x63a   :  { %2136 = vmatmul.msk.f32.vlgmr.msrb.gmra.mxu2 %vm54_vm0, %v2635_v38 }
 0x63b   :  { %v522_v40 = vsel %vm521_vm13, %v2300_v27, %v518_v39  ;;  %833 = vmatpush.msrb.mxu2 %v637_v20 }
 0x63c   :  { %v524_v41 = vmul.f32 %v522_v40, %v2572_v61 }
 0x63e   :  { %v527_v42 = vmul.f32 %v2255_v30, %v524_v41 }
 0x640   :  { %v2640_v43 = vadd.f32 %v2256_v34, %v527_v42 }
 0x642   :  { %2137 = vmatmul.msk.f32.gmra.mxu2 %vm54_vm0, %v2640_v43 }
 0x6bd   :  { %v561_v50 = vpop.f32.mrf.mxu2 }
 0x6be   :  { %v562_v51 = vadd.f32 %v2258_v49, %v561_v50 }
 0x6c0   :  { %702 = vrot.lane.b32.xlu1 %v562_v51, %s2373_s0  ;;  %2151 = vmatmul.msk.f32.vlgmr.msrb.gmra.mxu1 %vm144_vm1, %v562_v51  ;;  %v775_v54 = vrot.slane %v562_v51, 7 }
 0x6c1   :  { %938 = vmatpush.msrb.mxu1 %v2165_v9 }
 0x6c3   :  { %939 = vmatpush.msrb.mxu1 %v2164_v59 }
 0x6c5   :  { %v564_v52 = vpop.f32.mrf.mxu2 }
 0x6c6   :  { %v565_v53 = vadd.f32 %v2258_v49, %v564_v52 }
 0x6c8   :  { %v776_v55 = vrot.slane %v565_v53, 7 }
 0x6ca   :  { %v777_v56 = vsel %vm285_vm2, %v775_v54, %v776_v55 }
 0x6cb   :  { %838 = vrot.lane.b32.xlu0 %v777_v56, %s2373_s0  ;;  %2157 = vmatmul.msk.f32.vlgmr.msra.gmra.mxu1 %vm144_vm1, %v777_v56 }
 0x732   :  { %v703_v60 = vpop.permute.xlu1 %702 }
 0x733   :  { %2154 = vmatmul.msk.f32.vlgmr.msra.gmra.mxu3 %vm144_vm1, %v703_v60  ;;  %v2163_v60 = vld [vmem:[%s3085_s3 + $0xe8] sm:$0xff] }
 0x734   :  { %940 = vmatpush.msrb.mxu1 %v2163_v60  ;;  %v1065_v60 = vld [vmem:[%s3095_s7 + $0x38] sm:$0xff] }
 0x735   :  { %1085 = vmatpush.msra.mxu3 %v1065_v60 }
 0x73d   :  { %v662_v61 = vpop.f32.mrf.mxu1  ;;  %v839_v62 = vpop.permute.xlu0 %838 }
 0x73e   :  { %v665_v63 = vmul.f32 0.25, %v662_v61  ;;  %2160 = vmatmul.msk.f32.vlgmr.msrb.gmra.mxu3 %vm144_vm1, %v839_v62  ;;  %v2162_v61 = vld [vmem:[%s3085_s3 + $0xe0] sm:$0xff] }
 0x73f   :  { %941 = vmatpush.msrb.mxu1 %v2162_v61  ;;  %v1064_v61 = vld [vmem:[%s3095_s7 + $0x30] sm:$0xff] }
 0x740   :  { %v667_v0 = vsel %vm666_vm14, %v665_v63, -inf  ;;  %1086 = vmatpush.msra.mxu3 %v1064_v61 }
 0x741   :  { %668 = vmax.xlane.f32.xlu2 %v667_v0 }
 0x748   :  { %v800_v7 = vpop.f32.mrf.mxu1 }
 0x749   :  { %v803_v11 = vmul.f32 0.25, %v800_v7  ;;  %v2260_v7 = vld [vmem:[%s3087_s4 + $0x7] ss:$0 sm:$0xff] }
 0x74b   :  { %v804_v13 = vsel %vm666_vm14, %v803_v11, -inf }
 0x7b4   :  { %v669_v25 = vpop.xlane.xlu2 %668 }
 0x7b5   :  { %v670_v29 = vsub.f32 %v665_v63, %v669_v25 }
 0x7b6   :  { %v727_v3 = vpop.f32.mrf.mxu3 }
 0x7b7   :  { %v730_v5 = vmul.f32 0.25, %v727_v3  ;;  %v671_v31 = vmul.f32 1.442695, %v670_v29  ;;  %v1004_v29 = vld [vmem:[%s3093_s5 + $0x8] sm:$0xff] }
 0x7b9   :  { %v731_v6 = vsel %vm666_vm14, %v730_v5, -inf }
 0x7ba   :  { %732 = vmax.xlane.f32.xlu1 %v731_v6 }
 0x7c1   :  { %v863_v12 = vpop.f32.mrf.mxu3 }
 0x7c2   :  { %v866_v14 = vmul.f32 0.25, %v863_v12  ;;  %805 = vmax.xlane.f32.xlu1 %v804_v13 }
 0x7c4   :  { %v867_v16 = vsel %vm666_vm14, %v866_v14, -inf }
 0x7c5   :  { %868 = vmax.xlane.f32.xlu0 %v867_v16 }
 0x7db   :  { %743 = vrot.lane.b32.xlu1 %v634_v17, %s2373_s0 }
 0x82d   :  { %v733_v21 = vpop.xlane.xlu1 %732 }
 0x82e   :  { %v734_v22 = vsub.f32 %v730_v5, %v733_v21 }
 0x830   :  { %v735_v23 = vmul.f32 1.442695, %v734_v22 }
 0x832   :  { %2301 = vpow2.f32 %v735_v23 }
 0x835   :  { %v806_v32 = vpop.xlane.xlu1 %805 }
 0x836   :  { %v807_v34 = vsub.f32 %v803_v11, %v806_v32 }
 0x838   :  { %v2302_v24 = vpop.eup %2301  ;;  %v869_v26 = vpop.xlane.xlu0 %868  ;;  %v808_v36 = vmul.f32 1.442695, %v807_v34 }
 0x839   :  { %v870_v27 = vsub.f32 %v866_v14, %v869_v26  ;;  %v737_v28 = vsel %vm666_vm14, %v2302_v24, 0.0 }
 0x83a   :  { %738 = vadd.xlane.f32.xlu0 %v737_v28  ;;  %v1005_v28 = vld [vmem:[%s3093_s5 + $0x10] sm:$0xff] }
 0x83b   :  { %v871_v30 = vmul.f32 1.442695, %v870_v27 }
 0x83d   :  { %2303 = vpow2.f32 %v871_v30  ;;  %v1003_v30 = vld [vmem:[%s3093_s5] sm:$0xff] }
 0x83e   :  { %2305 = vpow2.f32 %v671_v31 }
 0x83f   :  { %2307 = vpow2.f32 %v808_v36 }
 0x843   :  { %v2304_v33 = vpop.eup %2303 }
 0x844   :  { %v873_v35 = vsel %vm666_vm14, %v2304_v33, 0.0  ;;  %v2306_v37 = vpop.eup %2305 }
 0x845   :  { %874 = vadd.xlane.f32.xlu2 %v873_v35  ;;  %v673_v39 = vsel %vm666_vm14, %v2306_v37, 0.0  ;;  %v2308_v40 = vpop.eup %2307 }
 0x846   :  { %v810_v41 = vsel %vm666_vm14, %v2308_v40, 0.0 }
 0x84d   :  { %674 = vadd.xlane.f32.xlu2 %v673_v39  ;;  %v744_v42 = vpop.permute.xlu1 %743 }
 0x84e   :  { %879 = vrot.lane.b32.xlu0 %v637_v20, %s2373_s0  ;;  %764 = vmatpush.msra.mxu0 %v744_v42 }
 0x855   :  { %811 = vadd.xlane.f32.xlu2 %v810_v41 }
 0x8ad   :  { %v739_v44 = vpop.xlane.xlu0 %738 }
 0x8ae   :  { %2309 = vrcp.f32 %v739_v44 }
 0x8b4   :  { %v2310_v45 = vpop.eup %2309 }
 0x8b5   :  { %v741_v46 = vmul.f32 %v2310_v45, %v2302_v24 }
 0x8b7   :  { %2155 = vmatmul.msk.f32.vlgmr.msra.gmra.mxu0 %vm678_vm15, %v741_v46 }
 0x8b8   :  { %v875_v47 = vpop.xlane.xlu2 %874 }
 0x8b9   :  { %2311 = vrcp.f32 %v875_v47  ;;  %v2261_v47 = vld [vmem:[%s3088_s9 + $0x1] ss:$0 sm:$0xff] }
 0x8bf   :  { %v2312_v48 = vpop.eup %2311 }
 0x8c0   :  { %v877_v49 = vmul.f32 %v2312_v48, %v2304_v33  ;;  %v675_v50 = vpop.xlane.xlu2 %674  ;;  %v880_v51 = vpop.permute.xlu0 %879 }
 0x8c1   :  { %2313 = vrcp.f32 %v675_v50  ;;  %900 = vmatpush.msrb.mxu0 %v880_v51  ;;  %v2262_v51 = vld [vmem:[%s3089_s10 + $0x1] ss:$0 sm:$0xff] }
 0x8c2   :  { %2161 = vmatmul.msk.f32.vlgmr.msrb.gmra.mxu0 %vm678_vm15, %v877_v49 }
 0x8c7   :  { %v2314_v52 = vpop.eup %2313 }
 0x8c8   :  { %v677_v53 = vmul.f32 %v2314_v52, %v2306_v37  ;;  %v812_v54 = vpop.xlane.xlu2 %811 }
 0x8c9   :  { %2315 = vrcp.f32 %v812_v54 }
 0x8ca   :  { %2152 = vmatmul.msk.f32.vlgmr.msra.gmra.mxu2 %vm678_vm15, %v677_v53 }
 0x8cf   :  { %v2316_v55 = vpop.eup %2315 }
 0x8d0   :  { %v814_v56 = vmul.f32 %v2316_v55, %v2308_v40 }
 0x8d2   :  { %2158 = vmatmul.msk.f32.vlgmr.msrb.gmra.mxu2 %vm678_vm15, %v814_v56 }
 0x934   :  { %v766_v57 = vpop.f32.mrf.mxu0 }
 0x935   :  { %770 = vrot.lane.b32.xlu0 %v766_v57, %s2374_s19 }
 0x93f   :  { %v902_v58 = vpop.f32.mrf.mxu0 }
 0x940   :  { %906 = vrot.lane.b32.xlu2 %v902_v58, %s2374_s19 }
 0x94d   :  { %v699_v62 = vpop.f32.mrf.mxu2 }
 0x955   :  { %v835_v0 = vpop.f32.mrf.mxu2 }
 0x99a   :  { %v907_v63 = vpop.permute.xlu2 %906 }
 0x99b   :  { %v909_v1 = vsel %vm144_vm1, %v835_v0, %v907_v63  ;;  %v1062_v63 = vld [vmem:[%s3095_s7 + $0x20] sm:$0xff]  ;;  %v1061_v0 = vld [vmem:[%s3095_s7 + $0x18] sm:$0xff] }
 0x99c   :  { %v911_v2 = vrot.slane %v909_v1, 1  ;;  %v1060_v1 = vld [vmem:[%s3095_s7 + $0x10] sm:$0xff] }
 0x9a7   :  { %v771_v3 = vpop.permute.xlu0 %770 }
 0x9a8   :  { %v773_v5 = vsel %vm144_vm1, %v699_v62, %v771_v3  ;;  %v1063_v62 = vld [vmem:[%s3095_s7 + $0x28] sm:$0xff]  ;;  %v1058_v3 = vld [vmem:[%s3095_s7] sm:$0xff] }
 0x9a9   :  { %v913_v6 = vsel %vm188_vm4, %v773_v5, %v911_v2  ;;  %1087 = vmatpush.msra.mxu3 %v1063_v62  ;;  %v2263_v5 = vld [vmem:[%s3092_s6] ss:$0 sm:$0xff] }
 0x9aa   :  { %2166 = vmatmul.msk.f32.vlgmr.msrb.gmra.mxu1 %vm54_vm0, %v913_v6 }
 0x9ab   :  { %1088 = vmatpush.msra.mxu3 %v1062_v63 }
 0x9ad   :  { %1089 = vmatpush.msra.mxu3 %v1061_v0 }
 0x9af   :  { %1090 = vmatpush.msra.mxu3 %v1060_v1 }
 0x9b2   :  { %2167 = vmatmul.msk.f32.gmra.mxu1 %vm54_vm0, %v911_v2  ;;  %v1059_v2 = vld [vmem:[%s3095_s7 + $0x8] sm:$0xff] }
 0x9b3   :  { %1091 = vmatpush.msra.mxu3 %v1059_v2 }
 0x9b5   :  { %1092 = vmatpush.msra.mxu3 %v1058_v3 }
 0xa27   :  { %v943_v11 = vpop.f32.mrf.mxu1 }
 0xa28   :  { %v944_v12 = vadd.f32 %v2260_v7, %v943_v11 }
 0xa2a   :  { %v949_v13 = vadd.f32 %v944_v12, %v2635_v38 }
 0xa2c   :  { %v953_v14 = vsel %vm54_vm0, %v949_v13, 0.0 }
 0xa2d   :  { %954 = vadd.xlane.f32.xlu1 %v953_v14 }
 0xa2f   :  { %v946_v16 = vpop.f32.mrf.mxu1 }
 0xa30   :  { %v947_v4 = vadd.f32 %v2260_v7, %v946_v16 }
 0xa32   :  { %v950_v15 = vadd.f32 %v947_v4, %v2640_v43  ;;  %v1006_v43 = vld [vmem:[%s3093_s5 + $0x18] sm:$0xff] }
 0xa33   :  { %1029 = vmatpush.msra.mxu2 %v1006_v43 }
 0xa34   :  { %v956_v17 = vsel %vm476_vm6, %v950_v15, 0.0 }
 0xa35   :  { %957 = vadd.xlane.f32.xlu0 %v956_v17  ;;  %1030 = vmatpush.msra.mxu2 %v1005_v28 }
 0xa37   :  { %1031 = vmatpush.msra.mxu2 %v1004_v29  ;;  %v2264_v29 = vld [vmem:[%s3094_s8] ss:$0 sm:$0xff] }
 0xa39   :  { %1032 = vmatpush.msra.mxu2 %v1003_v30 }
 0xaa0   :  { %v955_v19 = vpop.xlane.xlu1 %954 }
 0xaa1   :  { %v959_v20 = vmul.f32 %v955_v19, %v2567_v8 }
 0xaa3   :  { %v961_v21 = vsub.f32 %v949_v13, %v959_v20 }
 0xaa5   :  { %v963_v22 = vmul.f32 %v961_v21, %v961_v21 }
 0xaa7   :  { %v965_v23 = vsel %vm54_vm0, %v963_v22, 0.0 }
 0xaa8   :  { %v958_v24 = vpop.xlane.xlu0 %957  ;;  %966 = vadd.xlane.f32.xlu2 %v965_v23 }
 0xaa9   :  { %v960_v38 = vmul.f32 %v958_v24, %v2567_v8 }
 0xaab   :  { %v962_v25 = vsub.f32 %v950_v15, %v960_v38 }
 0xaad   :  { %v964_v26 = vmul.f32 %v962_v25, %v962_v25 }
 0xaaf   :  { %v968_v27 = vsel %vm476_vm6, %v964_v26, 0.0 }
 0xab0   :  { %969 = vadd.xlane.f32.xlu1 %v968_v27 }
 0xb1b   :  { %v967_v31 = vpop.xlane.xlu2 %966 }
 0xb1c   :  { %v971_v32 = vmul.f32 %v967_v31, %v2567_v8 }
 0xb1e   :  { %v973_v33 = vadd.f32 1e-05, %v971_v32 }
 0xb20   :  { %2317 = vrsqrt.f32 %v973_v33  ;;  %vm981_vm7 = vweird.f32 %v973_v33 }
 0xb23   :  { %v970_v34 = vpop.xlane.xlu1 %969 }
 0xb24   :  { %v972_v35 = vmul.f32 %v970_v34, %v2567_v8 }
 0xb26   :  { %v2318_v36 = vpop.eup %2317  ;;  %v974_v37 = vadd.f32 1e-05, %v972_v35 }
 0xb27   :  { %v976_v39 = vmul.f32 %v2318_v36, %v973_v33  ;;  %vm982_vm3 = vweird.f32 %v2318_v36 }
 0xb28   :  { %2319 = vrsqrt.f32 %v974_v37  ;;  %vm983_vm8 = vmor %vm981_vm7, %vm982_vm3  ;;  %vm991_vm10 = vweird.f32 %v974_v37 }
 0xb29   :  { %v977_v40 = vmul.f32 %v2318_v36, %v976_v39 }
 0xb2b   :  { %v978_v41 = vmul.f32 0.5, %v977_v40 }
 0xb2d   :  { %v979_v42 = vsub.f32 1.5, %v978_v41 }
 0xb2e   :  { %v2320_v44 = vpop.eup %2319 }
 0xb2f   :  { %v980_v45 = vmul.f32 %v2318_v36, %v979_v42  ;;  %v986_v46 = vmul.f32 %v2320_v44, %v974_v37  ;;  %vm992_vm9 = vweird.f32 %v2320_v44 }
 0xb30   :  { %vm993_vm11 = vmor %vm991_vm10, %vm992_vm9 }
 0xb31   :  { %v984_v48 = vsel %vm983_vm8, %v2318_v36, %v980_v45  ;;  %v987_v49 = vmul.f32 %v2320_v44, %v986_v46 }
 0xb32   :  { %v995_v50 = vmul.f32 %v984_v48, %v961_v21 }
 0xb33   :  { %v988_v52 = vmul.f32 0.5, %v987_v49 }
 0xb34   :  { %v998_v53 = vmul.f32 %v2261_v47, %v995_v50  ;;  %v2175_v50 = vld [vmem:[%s3085_s3 + $0x118] sm:$0xff] }
 0xb35   :  { %v989_v54 = vsub.f32 1.5, %v988_v52  ;;  %1173 = vmatpush.msra.mxu0 %v2175_v50  ;;  %v2173_v52 = vld [vmem:[%s3085_s3 + $0x108] sm:$0xff] }
 0xb36   :  { %v1001_v55 = vadd.f32 %v2262_v51, %v998_v53  ;;  %v2172_v53 = vld [vmem:[%s3085_s3 + $0x100] sm:$0xff] }
 0xb37   :  { %v990_v56 = vmul.f32 %v2320_v44, %v989_v54  ;;  %v2181_v54 = vld [vmem:[%s3085_s3 + $0x138] sm:$0xff] }
 0xb38   :  { %2168 = vmatmul.msk.f32.vlgmr.msra.gmra.mxu2 %vm54_vm0, %v1001_v55  ;;  %1209 = vmatpush.msra.mxu1 %v2181_v54 }
 0xb39   :  { %v994_v57 = vsel %vm993_vm11, %v2320_v44, %v990_v56  ;;  %v2180_v56 = vld [vmem:[%s3085_s3 + $0x130] sm:$0xff] }
 0xb3a   :  { %v996_v58 = vmul.f32 %v994_v57, %v962_v25  ;;  %1210 = vmatpush.msra.mxu1 %v2180_v56  ;;  %v2185_v57 = vld [vmem:[%s3085_s3 + $0x148] sm:$0xff] }
 0xb3c   :  { %v999_v9 = vmul.f32 %v2261_v47, %v996_v58  ;;  %v2178_v58 = vld [vmem:[%s3085_s3 + $0x120] sm:$0xff] }
 0xb3e   :  { %v1002_v59 = vadd.f32 %v2262_v51, %v999_v9  ;;  %v2174_v51 = vld [vmem:[%s3085_s3 + $0x110] sm:$0xff]  ;;  %v2184_v9 = vld [vmem:[%s3085_s3 + $0x140] sm:$0xff] }
 0xb3f   :  { %1174 = vmatpush.msra.mxu0 %v2174_v51 }
 0xb40   :  { %2169 = vmatmul.msk.f32.gmra.mxu2 %vm54_vm0, %v1002_v59 }
 0xb41   :  { %1175 = vmatpush.msra.mxu0 %v2173_v52 }
 0xb43   :  { %1176 = vmatpush.msra.mxu0 %v2172_v53 }
 0xb44   :  { %2176 = vmatmul.msk.f32.vlgmr.msra.gmra.mxu0 %vm54_vm0, %v2604_v10  ;;  %v2186_v10 = vld [vmem:[%s3085_s3 + $0x150] sm:$0xff] }
 0xb4c   :  { %2177 = vmatmul.msk.f32.gmra.mxu0 %vm54_vm0, %v2624_v18  ;;  %v2179_v18 = vld [vmem:[%s3085_s3 + $0x128] sm:$0xff] }
 0xb4d   :  { %1211 = vmatpush.msra.mxu1 %v2179_v18 }
 0xb4f   :  { %1212 = vmatpush.msra.mxu1 %v2178_v58 }
 0xbbb   :  { %v1034_v6 = vpop.f32.mrf.mxu2 }
 0xbbc   :  { %v1035_v7 = vadd.f32 %v2263_v5, %v1034_v6 }
 0xbbe   :  { %v1040_v11 = vmul.f32 %v1035_v7, %v1035_v7 }
 0xbc0   :  { %v1042_v12 = vmul.f32 %v1040_v11, %v1035_v7 }
 0xbc2   :  { %v1044_v13 = vmul.f32 0.044715, %v1042_v12 }
 0xbc3   :  { %v1037_v14 = vpop.f32.mrf.mxu2 }
 0xbc4   :  { %v1046_v16 = vadd.f32 %v1044_v13, %v1035_v7  ;;  %v1038_v4 = vadd.f32 %v2263_v5, %v1037_v14  ;;  %v2265_v13 = vld [vmem:[%s3088_s9 + $0x2] ss:$0 sm:$0xff] }
 0xbc6   :  { %v1048_v15 = vmul.f32 0.7978846, %v1046_v16  ;;  %v1041_v17 = vmul.f32 %v1038_v4, %v1038_v4 }
 0xbc8   :  { %2321 = vtanh.f32 %v1048_v15  ;;  %v1043_v19 = vmul.f32 %v1041_v17, %v1038_v4  ;;  %v2266_v15 = vld [vmem:[%s3089_s10 + $0x2] ss:$0 sm:$0xff] }
 0xbca   :  { %v1045_v20 = vmul.f32 0.044715, %v1043_v19 }
 0xbcc   :  { %v1047_v21 = vadd.f32 %v1045_v20, %v1038_v4 }
 0xbce   :  { %v2322_v22 = vpop.eup %2321  ;;  %v1049_v23 = vmul.f32 0.7978846, %v1047_v21 }
 0xbcf   :  { %v1052_v24 = vadd.f32 1.0, %v2322_v22 }
 0xbd0   :  { %2323 = vtanh.f32 %v1049_v23 }
 0xbd1   :  { %v1054_v38 = vmul.f32 0.5, %v1052_v24 }
 0xbd3   :  { %v1056_v25 = vmul.f32 %v1054_v38, %v1035_v7 }
 0xbd5   :  { %2170 = vmatmul.msk.f32.vlgmr.msra.gmra.mxu3 %vm1070_vm12, %v1056_v25 }
 0xbd6   :  { %v2324_v26 = vpop.eup %2323 }
 0xbd7   :  { %v1053_v27 = vadd.f32 1.0, %v2324_v26  ;;  %v2267_v26 = vld [vmem:[%s3087_s4 + $0x8] ss:$0 sm:$0xff] }
 0xbd9   :  { %v1055_v43 = vmul.f32 0.5, %v1053_v27  ;;  %v1178_v27 = vpop.f32.mrf.mxu0 }
 0xbdb   :  { %v1057_v28 = vmul.f32 %v1055_v43, %v1038_v4  ;;  %v1179_v43 = vadd.f32 %v2267_v26, %v1178_v27 }
 0xbdd   :  { %2171 = vmatmul.msk.f32.gmra.mxu3 %vm1070_vm12, %v1057_v28 }
 0xbe1   :  { %v1181_v28 = vpop.f32.mrf.mxu0 }
 0xc58   :  { %v1094_v30 = vpop.f32.mrf.mxu3 }
 0xc59   :  { %v1095_v31 = vadd.f32 %v2264_v29, %v1094_v30  ;;  %v2268_v30 = vld [vmem:[%s3087_s4 + $0x9] ss:$0 sm:$0xff] }
 0xc5b   :  { %v1100_v32 = vadd.f32 %v1095_v31, %v1001_v55  ;;  %v2187_v55 = vld [vmem:[%s3085_s3 + $0x158] sm:$0xff] }
 0xc5c   :  { %1239 = vmatpush.msrb.mxu2 %v2187_v55 }
 0xc5d   :  { %v1104_v33 = vsel %vm54_vm0, %v1100_v32, 0.0 }
 0xc5e   :  { %1105 = vadd.xlane.f32.xlu0 %v1104_v33  ;;  %1240 = vmatpush.msrb.mxu2 %v2186_v10  ;;  %v2269_v33 = vld [vmem:[%s3087_s4 + $0xa] ss:$0 sm:$0xff] }
 0xc60   :  { %v1097_v34 = vpop.f32.mrf.mxu3  ;;  %1241 = vmatpush.msrb.mxu2 %v2185_v57 }
 0xc61   :  { %v1098_v35 = vadd.f32 %v2264_v29, %v1097_v34  ;;  %v1182_v29 = vadd.f32 %v2267_v26, %v1181_v28 }
 0xc62   :  { %1242 = vmatpush.msrb.mxu2 %v2184_v9 }
 0xc63   :  { %v1101_v36 = vadd.f32 %v1098_v35, %v1002_v59 }
 0xc65   :  { %v1107_v37 = vsel %vm476_vm6, %v1101_v36, 0.0 }
 0xc66   :  { %1108 = vadd.xlane.f32.xlu1 %v1107_v37 }
 0xcd1   :  { %v1106_v39 = vpop.xlane.xlu0 %1105 }
 0xcd2   :  { %v1110_v40 = vmul.f32 %v1106_v39, %v2567_v8 }
 0xcd4   :  { %v1112_v41 = vsub.f32 %v1100_v32, %v1110_v40 }
 0xcd6   :  { %v1114_v42 = vmul.f32 %v1112_v41, %v1112_v41 }
 0xcd8   :  { %v1116_v44 = vsel %vm54_vm0, %v1114_v42, 0.0 }
 0xcd9   :  { %1117 = vadd.xlane.f32.xlu0 %v1116_v44  ;;  %v1109_v45 = vpop.xlane.xlu1 %1108 }
 0xcda   :  { %v1111_v46 = vmul.f32 %v1109_v45, %v2567_v8 }
 0xcdc   :  { %v2783_v47 = vsub.f32 %v1101_v36, %v1111_v46 }
 0xcde   :  { %v1115_v48 = vmul.f32 %v2783_v47, %v2783_v47 }
 0xce0   :  { %v1119_v49 = vsel %vm476_vm6, %v1115_v48, 0.0 }
 0xce1   :  { %1120 = vadd.xlane.f32.xlu1 %v1119_v49 }
 0xced   :  { %1314 = vrot.lane.b32.xlu0 %v1179_v43, %s2373_s0 }
 0xcf5   :  { %1456 = vrot.lane.b32.xlu0 %v1182_v29, %s2373_s0 }
 0xd4c   :  { %v1118_v59 = vpop.xlane.xlu0 %1117 }
 0xd4d   :  { %v1122_v60 = vmul.f32 %v1118_v59, %v2567_v8 }
 0xd4f   :  { %v1124_v61 = vadd.f32 1e-05, %v1122_v60 }
 0xd51   :  { %2325 = vrsqrt.f32 %v1124_v61  ;;  %vm1132_vm3 = vweird.f32 %v1124_v61 }
 0xd54   :  { %v1121_v62 = vpop.xlane.xlu1 %1120 }
 0xd55   :  { %v1123_v63 = vmul.f32 %v1121_v62, %v2567_v8 }
 0xd57   :  { %v2326_v0 = vpop.eup %2325  ;;  %v1125_v1 = vadd.f32 1e-05, %v1123_v63 }
 0xd58   :  { %v1127_v2 = vmul.f32 %v2326_v0, %v1124_v61  ;;  %vm1133_vm13 = vweird.f32 %v2326_v0 }
 0xd59   :  { %2327 = vrsqrt.f32 %v1125_v1  ;;  %vm1134_vm7 = vmor %vm1132_vm3, %vm1133_vm13  ;;  %vm1142_vm9 = vweird.f32 %v1125_v1 }
 0xd5a   :  { %v1128_v3 = vmul.f32 %v2326_v0, %v1127_v2 }
 0xd5c   :  { %v1129_v5 = vmul.f32 0.5, %v1128_v3 }
 0xd5e   :  { %v1130_v6 = vsub.f32 1.5, %v1129_v5 }
 0xd5f   :  { %v2328_v7 = vpop.eup %2327  ;;  %v1315_v49 = vpop.permute.xlu0 %1314 }
 0xd60   :  { %v1131_v11 = vmul.f32 %v2326_v0, %v1130_v6  ;;  %v1137_v12 = vmul.f32 %v2328_v7, %v1125_v1  ;;  %vm1143_vm8 = vweird.f32 %v2328_v7 }
 0xd61   :  { %vm1144_vm10 = vmor %vm1142_vm9, %vm1143_vm8 }
 0xd62   :  { %v1135_v14 = vsel %vm1134_vm7, %v2326_v0, %v1131_v11  ;;  %v1138_v16 = vmul.f32 %v2328_v7, %v1137_v12 }
 0xd63   :  { %v1146_v4 = vmul.f32 %v1135_v14, %v1112_v41 }
 0xd64   :  { %v1139_v17 = vmul.f32 0.5, %v1138_v16 }
 0xd65   :  { %v1149_v19 = vmul.f32 %v2265_v13, %v1146_v4 }
 0xd66   :  { %v1140_v20 = vsub.f32 1.5, %v1139_v17 }
 0xd67   :  { %v2836_v21 = vadd.f32 %v2266_v15, %v1149_v19  ;;  %v1457_v51 = vpop.permute.xlu0 %1456 }
 0xd68   :  { %v1141_v22 = vmul.f32 %v2328_v7, %v1140_v20 }
 0xd69   :  { %2182 = vmatmul.msk.f32.vlgmr.msra.gmra.mxu1 %vm54_vm0, %v2836_v21  ;;  %2188 = vmatmul.msk.f32.vlgmr.msrb.gmra.mxu2 %vm54_vm0, %v2836_v21 }
 0xd6a   :  { %v1145_v23 = vsel %vm1144_vm10, %v2328_v7, %v1141_v22 }
 0xd6b   :  { %v1147_v24 = vmul.f32 %v1145_v23, %v2783_v47 }
 0xd6d   :  { %v1150_v38 = vmul.f32 %v2265_v13, %v1147_v24 }
 0xd6f   :  { %v2843_v25 = vadd.f32 %v2266_v15, %v1150_v38 }
 0xd71   :  { %2183 = vmatmul.msk.f32.gmra.mxu1 %vm54_vm0, %v2843_v25  ;;  %2189 = vmatmul.msk.f32.gmra.mxu2 %vm54_vm0, %v2843_v25 }
 0xde6   :  { %v1214_v31 = vpop.f32.mrf.mxu1 }
 0xde7   :  { %v1215_v32 = vadd.f32 %v2268_v30, %v1214_v31 }
 0xde9   :  { %1316 = vrot.lane.b32.xlu2 %v1215_v32, %s2373_s0  ;;  %2190 = vmatpush.xpose.msk.msrb.mxu0 %vm144_vm1, %v1215_v32  ;;  %v1387_v39 = vrot.slane %v1215_v32, 7 }
 0xdec   :  { %v1244_v34 = vpop.f32.mrf.mxu2  ;;  %2191 = vmatmul.msk.f32.vlgmr.msrb.gmra.mxu0 %vm144_vm1, %v1179_v43 }
 0xded   :  { %v1245_v35 = vadd.f32 %v2269_v33, %v1244_v34  ;;  %v2214_v34 = vld [vmem:[%s3085_s3 + $0x190] sm:$0xff] }
 0xdee   :  { %v1217_v36 = vpop.f32.mrf.mxu1 }
 0xdef   :  { %v1218_v37 = vadd.f32 %v2268_v30, %v1217_v36  ;;  %2192 = vmatpush.msk.msrb.mxu3 %vm188_vm4, %v1245_v35  ;;  %v1428_v45 = vrot.slane %v1245_v35, 7  ;;  %v2212_v36 = vld [vmem:[%s3085_s3 + $0x180] sm:$0xff] }
 0xdf1   :  { %v1388_v40 = vrot.slane %v1218_v37, 7 }
 0xdf3   :  { %v1389_v41 = vsel %vm285_vm2, %v1387_v39, %v1388_v40 }
 0xdf4   :  { %v1247_v42 = vpop.f32.mrf.mxu2  ;;  %1458 = vrot.lane.b32.xlu1 %v1389_v41, %s2373_s0  ;;  %2198 = vmatpush.xpose.msk.msra.mxu2 %vm144_vm1, %v1389_v41 }
 0xdf5   :  { %v1248_v44 = vadd.f32 %v2269_v33, %v1247_v42  ;;  %v2215_v33 = vld [vmem:[%s3085_s3 + $0x198] sm:$0xff] }
 0xdf6   :  { %v2209_v42 = vld [vmem:[%s3085_s3 + $0x178] sm:$0xff] }
 0xdf7   :  { %v1429_v46 = vrot.slane %v1248_v44, 7  ;;  %2199 = vmatmul.msk.f32.vlgmr.msra.gmra.mxu2 %vm144_vm1, %v1182_v29  ;;  %v2208_v44 = vld [vmem:[%s3085_s3 + $0x170] sm:$0xff] }
 0xdf8   :  { %1553 = vmatpush.msrb.mxu2 %v2209_v42 }
 0xdf9   :  { %v1430_v47 = vsel %vm285_vm2, %v1428_v45, %v1429_v46  ;;  %v2207_v45 = vld [vmem:[%s3085_s3 + $0x168] sm:$0xff]  ;;  %v2206_v46 = vld [vmem:[%s3085_s3 + $0x160] sm:$0xff] }
 0xdfa   :  { %2200 = vmatpush.msk.msra.mxu3 %vm188_vm4, %v1430_v47  ;;  %1554 = vmatpush.msrb.mxu2 %v2208_v44 }
 0xdfc   :  { %1555 = vmatpush.msrb.mxu2 %v2207_v45 }
 0xdfe   :  { %1556 = vmatpush.msrb.mxu2 %v2206_v46 }
 0xe43   :  { %v1317_v48 = vpop.permute.xlu2 %1316 }
 0xe44   :  { %2194 = vmatpush.xpose.msk.msra.mxu0 %vm144_vm1, %v1317_v48 }
 0xe47   :  { %2195 = vmatmul.msk.f32.vlgmr.msra.gmra.mxu0 %vm144_vm1, %v1315_v49 }
 0xe66   :  { %v1459_v50 = vpop.permute.xlu1 %1458 }
 0xe67   :  { %2202 = vmatpush.xpose.msk.msrb.mxu0 %vm144_vm1, %v1459_v50 }
 0xe69   :  { %v1273_v52 = vpop.f32.mrf.mxu0 }
 0xe6a   :  { %v1276_v53 = vmul.f32 0.25, %v1273_v52  ;;  %2203 = vmatmul.msk.f32.vlgmr.msrb.gmra.mxu0 %vm144_vm1, %v1457_v51 }
 0xe6c   :  { %v1277_v54 = vsel %vm184_vm5, %v1276_v53, -inf }
 0xe6d   :  { %1278 = vmax.xlane.f32.xlu1 %v1277_v54 }
 0xe7a   :  { %v1412_v18 = vpop.f32.mrf.mxu2 }
 0xe7b   :  { %v1415_v57 = vmul.f32 0.25, %v1412_v18 }
 0xe7d   :  { %v1416_v58 = vsel %vm184_vm5, %v1415_v57, -inf }
 0xe86   :  { %1354 = vrot.lane.b32.xlu1 %v1245_v35, %s2373_s0  ;;  %v2213_v35 = vld [vmem:[%s3085_s3 + $0x188] sm:$0xff] }
 0xec4   :  { %v1339_v55 = vpop.f32.mrf.mxu0 }
 0xec5   :  { %v1342_v56 = vmul.f32 0.25, %v1339_v55 }
 0xec7   :  { %v1343_v10 = vsel %vm184_vm5, %v1342_v56, -inf }
 0xec8   :  { %1344 = vmax.xlane.f32.xlu2 %v1343_v10 }
 0xed0   :  { %1417 = vmax.xlane.f32.xlu2 %v1416_v58 }
 0xee0   :  { %v1279_v61 = vpop.xlane.xlu1 %1278 }
 0xee1   :  { %v1280_v7 = vsub.f32 %v1276_v53, %v1279_v61  ;;  %v2271_v53 = vld [vmem:[%s3087_s4 + $0xb] ss:$0 sm:$0xff] }
 0xee3   :  { %v1281_v12 = vmul.f32 1.442695, %v1280_v7 }
 0xee7   :  { %v1481_v9 = vpop.f32.mrf.mxu0 }
 0xee8   :  { %v1484_v59 = vmul.f32 0.25, %v1481_v9  ;;  %v2370_v9 = vld [vmem:[%s3090_s1 + $0x8] sm:$0xff] }
 0xeea   :  { %v1485_v60 = vsel %vm184_vm5, %v1484_v59, -inf }
 0xeeb   :  { %1486 = vmax.xlane.f32.xlu0 %v1485_v60 }
 0xef8   :  { %v1355_v62 = vpop.permute.xlu1 %1354 }
 0xef9   :  { %2196 = vmatpush.msk.msrb.mxu1 %vm188_vm4, %v1355_v62 }
 0xf3b   :  { %v1345_v63 = vpop.xlane.xlu2 %1344 }
 0xf3c   :  { %v1346_v0 = vsub.f32 %v1342_v56, %v1345_v63  ;;  %v2369_v56 = vld [vmem:[%s3090_s1] sm:$0xff] }
 0xf3e   :  { %v1347_v1 = vmul.f32 1.442695, %v1346_v0 }
 0xf40   :  { %2329 = vpow2.f32 %v1347_v1 }
 0xf43   :  { %v1418_v13 = vpop.xlane.xlu2 %1417 }
 0xf44   :  { %v1419_v16 = vsub.f32 %v1415_v57, %v1418_v13 }
 0xf46   :  { %v2330_v2 = vpop.eup %2329  ;;  %v1420_v15 = vmul.f32 1.442695, %v1419_v16  ;;  %v2221_v16 = vld [vmem:[%s3085_s3 + $0x1b8] sm:$0xff] }
 0xf47   :  { %v1349_v3 = vsel %vm184_vm5, %v2330_v2, 0.0  ;;  %1675 = vmatpush.msra.mxu0 %v2221_v16 }
 0xf48   :  { %1350 = vadd.xlane.f32.xlu2 %v1349_v3 }
 0xf5e   :  { %v1487_v5 = vpop.xlane.xlu0 %1486 }
 0xf5f   :  { %v1488_v6 = vsub.f32 %v1484_v59, %v1487_v5 }
 0xf60   :  { %1496 = vrot.lane.b32.xlu2 %v1430_v47, %s2373_s0 }
 0xf61   :  { %v1489_v11 = vmul.f32 1.442695, %v1488_v6 }
 0xf63   :  { %2331 = vpow2.f32 %v1489_v11  ;;  %v2946_v11 = vld [vmem:[%s3087_s4 + $0xc] ss:$0 sm:$0xff] }
 0xf64   :  { %2333 = vpow2.f32 %v1281_v12 }
 0xf65   :  { %2335 = vpow2.f32 %v1420_v15  ;;  %v2220_v15 = vld [vmem:[%s3085_s3 + $0x1b0] sm:$0xff] }
 0xf66   :  { %1676 = vmatpush.msra.mxu0 %v2220_v15 }
 0xf69   :  { %v2332_v14 = vpop.eup %2331 }
 0xf6a   :  { %v1491_v4 = vsel %vm184_vm5, %v2332_v14, 0.0  ;;  %v2334_v17 = vpop.eup %2333 }
 0xf6b   :  { %1492 = vadd.xlane.f32.xlu0 %v1491_v4  ;;  %v1283_v19 = vsel %vm184_vm5, %v2334_v17, 0.0  ;;  %v2336_v20 = vpop.eup %2335  ;;  %v2226_v4 = vld [vmem:[%s3085_s3 + $0x1d0] sm:$0xff] }
 0xf6c   :  { %v1422_v22 = vsel %vm184_vm5, %v2336_v20, 0.0 }
 0xf73   :  { %1284 = vadd.xlane.f32.xlu0 %v1283_v19  ;;  %v2219_v19 = vld [vmem:[%s3085_s3 + $0x1a8] sm:$0xff] }
 0xf74   :  { %1677 = vmatpush.msra.mxu0 %v2219_v19 }
 0xf7b   :  { %1423 = vadd.xlane.f32.xlu0 %v1422_v22  ;;  %v2218_v22 = vld [vmem:[%s3085_s3 + $0x1a0] sm:$0xff] }
 0xf7c   :  { %1678 = vmatpush.msra.mxu0 %v2218_v22 }
 0xfbb   :  { %v1351_v23 = vpop.xlane.xlu2 %1350 }
 0xfbc   :  { %2337 = vrcp.f32 %v1351_v23 }
 0xfc2   :  { %v2338_v24 = vpop.eup %2337 }
 0xfc3   :  { %v1353_v38 = vmul.f32 %v2338_v24, %v2330_v2  ;;  %v1497_v26 = vpop.permute.xlu2 %1496 }
 0xfc4   :  { %2204 = vmatpush.msk.msra.mxu1 %vm188_vm4, %v1497_v26 }
 0xfc5   :  { %2197 = vmatmul.msk.f32.vlgmr.msrb.gmra.mxu1 %vm184_vm5, %v1353_v38 }
 0xfde   :  { %v1493_v27 = vpop.xlane.xlu0 %1492 }
 0xfdf   :  { %2339 = vrcp.f32 %v1493_v27 }
 0xfe5   :  { %v2340_v43 = vpop.eup %2339 }
 0xfe6   :  { %v1495_v28 = vmul.f32 %v2340_v43, %v2332_v14  ;;  %v1285_v29 = vpop.xlane.xlu0 %1284  ;;  %v2227_v14 = vld [vmem:[%s3085_s3 + $0x1d8] sm:$0xff] }
 0xfe7   :  { %2341 = vrcp.f32 %v1285_v29  ;;  %1711 = vmatpush.msrb.mxu1 %v2227_v14 }
 0xfe8   :  { %2205 = vmatmul.msk.f32.vlgmr.msra.gmra.mxu1 %vm184_vm5, %v1495_v28 }
 0xfe9   :  { %1712 = vmatpush.msrb.mxu1 %v2226_v4 }
 0xfed   :  { %v2342_v30 = vpop.eup %2341 }
 0xfee   :  { %v1287_v31 = vmul.f32 %v2342_v30, %v2334_v17  ;;  %v1424_v32 = vpop.xlane.xlu0 %1423  ;;  %v2225_v17 = vld [vmem:[%s3085_s3 + $0x1c8] sm:$0xff] }
 0xfef   :  { %2343 = vrcp.f32 %v1424_v32  ;;  %1713 = vmatpush.msrb.mxu1 %v2225_v17 }
 0xff0   :  { %2193 = vmatmul.msk.f32.vlgmr.msrb.gmra.mxu3 %vm184_vm5, %v1287_v31  ;;  %v2272_v31 = vld [vmem:[%s3088_s9 + $0x3] ss:$0 sm:$0xff] }
 0xff1   :  { %1639 = vmatpush.msrb.mxu3 %v2215_v33 }
 0xff3   :  { %1640 = vmatpush.msrb.mxu3 %v2214_v34  ;;  %v2273_v34 = vld [vmem:[%s3089_s10 + $0x3] ss:$0 sm:$0xff] }
 0xff5   :  { %v2344_v37 = vpop.eup %2343  ;;  %1641 = vmatpush.msrb.mxu3 %v2213_v35 }
 0xff6   :  { %v1426_v39 = vmul.f32 %v2344_v37, %v2336_v20  ;;  %v2224_v20 = vld [vmem:[%s3085_s3 + $0x1c0] sm:$0xff] }
 0xff7   :  { %1642 = vmatpush.msrb.mxu3 %v2212_v36  ;;  %1714 = vmatpush.msrb.mxu1 %v2224_v20  ;;  %v2371_v37 = vld [vmem:[%s3091_s2] sm:$0xff] }
 0xff8   :  { %2201 = vmatmul.msk.f32.vlgmr.msra.gmra.mxu3 %vm184_vm5, %v1426_v39 }
0x1000   :  { %2216 = vmatmul.msk.f32.vlgmr.msrb.gmra.mxu3 %vm54_vm0, %v2836_v21 }
0x1008   :  { %2217 = vmatmul.msk.f32.gmra.mxu3 %vm54_vm0, %v2843_v25 }
0x1042   :  { %v1378_v40 = vpop.f32.mrf.mxu1 }
0x1043   :  { %1382 = vrot.lane.b32.xlu0 %v1378_v40, %s2374_s19 }
0x1065   :  { %v1520_v41 = vpop.f32.mrf.mxu1 }
0x1066   :  { %1524 = vrot.lane.b32.xlu1 %v1520_v41, %s2374_s19 }
0x1073   :  { %v1311_v47 = vpop.f32.mrf.mxu3 }
0x107b   :  { %v1453_v50 = vpop.f32.mrf.mxu3 }
0x1083   :  { %v1644_v12 = vpop.f32.mrf.mxu3 }
0x1084   :  { %v2949_v13 = vadd.f32 %v2946_v11, %v1644_v12 }
0x10b5   :  { %v1383_v48 = vpop.permute.xlu0 %1382 }
0x10b6   :  { %v1385_v49 = vsel %vm144_vm1, %v1311_v47, %v1383_v48 }
0x10b7   :  { %2210 = vmatmul.msk.f32.vlgmr.msrb.gmra.mxu2 %vm54_vm0, %v1385_v49 }
0x10d8   :  { %v1525_v51 = vpop.permute.xlu1 %1524 }
0x10d9   :  { %v1527_v52 = vsel %vm144_vm1, %v1453_v50, %v1525_v51 }
0x10da   :  { %2211 = vmatmul.msk.f32.gmra.mxu2 %vm54_vm0, %v1527_v52 }
0x113a   :  { %v1558_v54 = vpop.f32.mrf.mxu2 }
0x113b   :  { %v1559_v55 = vadd.f32 %v2271_v53, %v1558_v54  ;;  %v2372_v54 = vld [vmem:[%s3091_s2 + $0x8] sm:$0xff] }
0x113d   :  { %v1564_v10 = vadd.f32 %v2369_v56, %v1559_v55  ;;  %v2274_v56 = vld [vmem:[%s3087_s4 + $0xe] ss:$0 sm:$0xff] }
0x113f   :  { %v1568_v18 = vsel %vm54_vm0, %v1564_v10, 0.0 }
0x1140   :  { %1569 = vadd.xlane.f32.xlu2 %v1568_v18 }
0x115d   :  { %v1561_v57 = vpop.f32.mrf.mxu2 }
0x115e   :  { %v1562_v58 = vadd.f32 %v2271_v53, %v1561_v57  ;;  %v1647_v57 = vpop.f32.mrf.mxu3 }
0x1160   :  { %v1565_v59 = vadd.f32 %v2370_v9, %v1562_v58 }
0x1162   :  { %v1571_v60 = vsel %vm54_vm0, %v1565_v59, 0.0 }
0x1163   :  { %1572 = vadd.xlane.f32.xlu1 %v1571_v60  ;;  %v1648_v60 = vadd.f32 %v2946_v11, %v1647_v57 }
0x11b3   :  { %v1570_v61 = vpop.xlane.xlu2 %1569 }
0x11b4   :  { %v1574_v62 = vmul.f32 %v1570_v61, %v2567_v8  ;;  %v1857_v61 = vrot.slane %v1648_v60, 7  ;;  %v2244_v60 = vld [vmem:[%s3085_s3 + $0x1f0] sm:$0xff] }
0x11b6   :  { %v1576_v63 = vsub.f32 %v1564_v10, %v1574_v62  ;;  %v2275_v10 = vld [vmem:[%s3087_s4 + $0xd] ss:$0 sm:$0xff]  ;;  %v1856_v62 = vrot.slane %v2949_v13, 7 }
0x11b8   :  { %v1578_v0 = vmul.f32 %v1576_v63, %v1576_v63 }
0x11ba   :  { %v1580_v1 = vsel %vm54_vm0, %v1578_v0, 0.0 }
0x11bb   :  { %1581 = vadd.xlane.f32.xlu0 %v1580_v1 }
0x11d6   :  { %v1573_v2 = vpop.xlane.xlu1 %1572 }
0x11d7   :  { %v1575_v3 = vmul.f32 %v1573_v2, %v2567_v8 }
0x11d9   :  { %v2938_v5 = vsub.f32 %v1565_v59, %v1575_v3 }
0x11db   :  { %v1579_v6 = vmul.f32 %v2938_v5, %v2938_v5 }
0x11dd   :  { %v1583_v7 = vsel %vm54_vm0, %v1579_v6, 0.0 }
0x11de   :  { %1584 = vadd.xlane.f32.xlu2 %v1583_v7 }
0x11f6   :  { %1783 = vrot.lane.b32.xlu2 %v2949_v13, %s2373_s0 }
0x122e   :  { %v1582_v23 = vpop.xlane.xlu0 %1581 }
0x122f   :  { %v1586_v24 = vmul.f32 %v1582_v23, %v2567_v8 }
0x1231   :  { %v1588_v38 = vadd.f32 1e-05, %v1586_v24 }
0x1233   :  { %2345 = vrsqrt.f32 %v1588_v38  ;;  %vm1596_vm11 = vweird.f32 %v1588_v38 }
0x1239   :  { %v2346_v26 = vpop.eup %2345 }
0x123a   :  { %v1591_v27 = vmul.f32 %v2346_v26, %v1588_v38  ;;  %vm1597_vm5 = vweird.f32 %v2346_v26 }
0x123b   :  { %vm1598_vm12 = vmor %vm1596_vm11, %vm1597_vm5 }
0x123c   :  { %v1592_v43 = vmul.f32 %v2346_v26, %v1591_v27 }
0x123e   :  { %v1593_v28 = vmul.f32 0.5, %v1592_v43 }
0x1240   :  { %v1594_v29 = vsub.f32 1.5, %v1593_v28 }
0x1242   :  { %v1595_v30 = vmul.f32 %v2346_v26, %v1594_v29 }
0x1244   :  { %v1599_v32 = vsel %vm1598_vm12, %v2346_v26, %v1595_v30 }
0x1245   :  { %v1610_v33 = vmul.f32 %v1599_v32, %v1576_v63  ;;  %v1858_v63 = vsel %vm285_vm2, %v1856_v62, %v1857_v61  ;;  %v2243_v61 = vld [vmem:[%s3085_s3 + $0x1e8] sm:$0xff]  ;;  %v2242_v62 = vld [vmem:[%s3085_s3 + $0x1e0] sm:$0xff] }
0x1247   :  { %v1613_v35 = vmul.f32 %v2272_v31, %v1610_v33 }
0x1249   :  { %v1616_v36 = vadd.f32 %v2273_v34, %v1613_v35 }
0x124b   :  { %2228 = vmatmul.msk.f32.vlgmr.msrb.gmra.mxu1 %vm54_vm0, %v1616_v36  ;;  %v1618_v39 = vadd.f32 %v2371_v37, %v1616_v36  ;;  %2086 = vst.msk [vmem:[%s3096_s12] sm:$0xff] %vm54_vm0, %v1616_v36 }
0x124d   :  { %2222 = vmatmul.msk.f32.vlgmr.msra.gmra.mxu0 %vm54_vm0, %v1618_v39 }
0x1251   :  { %v1585_v40 = vpop.xlane.xlu2 %1584 }
0x1252   :  { %v1587_v41 = vmul.f32 %v1585_v40, %v2567_v8 }
0x1254   :  { %v1589_v42 = vadd.f32 1e-05, %v1587_v41 }
0x1256   :  { %2347 = vrsqrt.f32 %v1589_v42  ;;  %vm1606_vm3 = vweird.f32 %v1589_v42 }
0x1259   :  { %v1784_v6 = vpop.permute.xlu2 %1783 }
0x125c   :  { %v2348_v44 = vpop.eup %2347 }
0x125d   :  { %v1601_v45 = vmul.f32 %v2348_v44, %v1589_v42  ;;  %vm1607_vm13 = vweird.f32 %v2348_v44 }
0x125e   :  { %vm1608_vm7 = vmor %vm1606_vm3, %vm1607_vm13 }
0x125f   :  { %v1602_v46 = vmul.f32 %v2348_v44, %v1601_v45 }
0x1261   :  { %v1603_v47 = vmul.f32 0.5, %v1602_v46 }
0x1263   :  { %v1604_v48 = vsub.f32 1.5, %v1603_v47 }
0x1265   :  { %v1605_v49 = vmul.f32 %v2348_v44, %v1604_v48 }
0x1267   :  { %v1609_v50 = vsel %vm1608_vm7, %v2348_v44, %v1605_v49 }
0x1268   :  { %v1611_v51 = vmul.f32 %v1609_v50, %v2938_v5 }
0x126a   :  { %v1614_v52 = vmul.f32 %v2272_v31, %v1611_v51 }
0x126c   :  { %v1617_v53 = vadd.f32 %v2273_v34, %v1614_v52 }
0x126e   :  { %2229 = vmatmul.msk.f32.gmra.mxu1 %vm54_vm0, %v1617_v53  ;;  %2087 = vst.msk [vmem:[%s3096_s12 + $0x8] sm:$0xff] %vm54_vm0, %v1617_v53  ;;  %v1619_v55 = vadd.f32 %v2372_v54, %v1617_v53 }
0x1270   :  { %2223 = vmatmul.msk.f32.gmra.mxu0 %vm54_vm0, %v1619_v55 }
0x12c8   :  { %v1716_v18 = vpop.f32.mrf.mxu1 }
0x12c9   :  { %v1717_v58 = vadd.f32 %v2274_v56, %v1716_v18 }
0x12ca   :  { %v1680_v9 = vpop.f32.mrf.mxu0 }
0x12cb   :  { %v1681_v59 = vadd.f32 %v2275_v10, %v1680_v9  ;;  %1778 = vmatpush.msra.mxu3 %v1717_v58 }
0x12cd   :  { %1785 = vrot.lane.b32.xlu1 %v1681_v59, %s2373_s0  ;;  %2230 = vmatpush.xpose.msk.msra.mxu2 %vm144_vm1, %v1681_v59  ;;  %v2245_v59 = vld [vmem:[%s3085_s3 + $0x1f8] sm:$0xff] }
0x12d0   :  { %2231 = vmatmul.msk.f32.vlgmr.msra.gmra.mxu2 %vm144_vm1, %v2949_v13 }
0x12d5   :  { %1919 = vrot.lane.b32.xlu1 %v1858_v63, %s2373_s0 }
0x12eb   :  { %v1719_v0 = vpop.f32.mrf.mxu1 }
0x12ec   :  { %v1720_v1 = vadd.f32 %v2274_v56, %v1719_v0 }
0x12ed   :  { %v1683_v2 = vpop.f32.mrf.mxu0 }
0x12ee   :  { %v1684_v3 = vadd.f32 %v2275_v10, %v1683_v2  ;;  %1914 = vmatpush.msrb.mxu3 %v1720_v1 }
0x12f0   :  { %1921 = vrot.lane.b32.xlu0 %v1684_v3, %s2373_s0  ;;  %2236 = vmatpush.xpose.msk.msrb.mxu2 %vm144_vm1, %v1684_v3 }
0x12f3   :  { %2237 = vmatmul.msk.f32.vlgmr.msrb.gmra.mxu2 %vm144_vm1, %v1858_v63 }
0x12f4   :  { %2019 = vmatpush.msra.mxu2 %v2245_v59 }
0x12f6   :  { %2020 = vmatpush.msra.mxu2 %v2244_v60 }
0x12f8   :  { %2021 = vmatpush.msra.mxu2 %v2243_v61 }
0x12fa   :  { %2022 = vmatpush.msra.mxu2 %v2242_v62 }
0x133f   :  { %v1786_v5 = vpop.permute.xlu1 %1785 }
0x1340   :  { %2233 = vmatpush.xpose.msk.msrb.mxu0 %vm144_vm1, %v1786_v5 }
0x1343   :  { %2234 = vmatmul.msk.f32.vlgmr.msrb.gmra.mxu0 %vm144_vm1, %v1784_v6 }
0x1347   :  { %v1920_v14 = vpop.permute.xlu1 %1919 }
0x1353   :  { %v1745_v7 = vpop.f32.mrf.mxu2 }
0x1354   :  { %v1748_v11 = vmul.f32 0.25, %v1745_v7 }
0x1356   :  { %v1749_v12 = vsel %vm666_vm14, %v1748_v11, -inf }
0x1357   :  { %1750 = vmax.xlane.f32.xlu1 %v1749_v12 }
0x1362   :  { %v1922_v13 = vpop.permute.xlu0 %1921 }
0x1363   :  { %2239 = vmatpush.xpose.msk.msra.mxu0 %vm144_vm1, %v1922_v13 }
0x1366   :  { %2240 = vmatmul.msk.f32.vlgmr.msra.gmra.mxu0 %vm144_vm1, %v1920_v14 }
0x1376   :  { %v1881_v17 = vpop.f32.mrf.mxu2 }
0x1377   :  { %v1884_v19 = vmul.f32 0.25, %v1881_v17 }
0x1379   :  { %v1885_v20 = vsel %vm666_vm14, %v1884_v19, -inf }
0x13c0   :  { %v1808_v16 = vpop.f32.mrf.mxu0 }
0x13c1   :  { %v1811_v4 = vmul.f32 0.25, %v1808_v16 }
0x13c3   :  { %v1812_v15 = vsel %vm666_vm14, %v1811_v4, -inf }
0x13c4   :  { %1813 = vmax.xlane.f32.xlu2 %v1812_v15 }
0x13ca   :  { %v1751_v31 = vpop.xlane.xlu1 %1750 }
0x13cb   :  { %v1752_v34 = vsub.f32 %v1748_v11, %v1751_v31  ;;  %v2276_v11 = vld [vmem:[%s3087_s4 + $0xf] ss:$0 sm:$0xff] }
0x13cc   :  { %1886 = vmax.xlane.f32.xlu2 %v1885_v20 }
0x13cd   :  { %v1753_v36 = vmul.f32 1.442695, %v1752_v34 }
0x13e3   :  { %v1944_v22 = vpop.f32.mrf.mxu0 }
0x13e4   :  { %v1947_v23 = vmul.f32 0.25, %v1944_v22  ;;  %1824 = vrot.lane.b32.xlu2 %v1717_v58, %s2373_s0 }
0x13e6   :  { %v1948_v24 = vsel %vm666_vm14, %v1947_v23, -inf }
0x13e7   :  { %1949 = vmax.xlane.f32.xlu0 %v1948_v24 }
0x1437   :  { %v1814_v38 = vpop.xlane.xlu2 %1813 }
0x1438   :  { %v1815_v26 = vsub.f32 %v1811_v4, %v1814_v38 }
0x143a   :  { %v1816_v27 = vmul.f32 1.442695, %v1815_v26 }
0x143c   :  { %2349 = vpow2.f32 %v1816_v27 }
0x143f   :  { %v1887_v43 = vpop.xlane.xlu2 %1886 }
0x1440   :  { %v1888_v39 = vsub.f32 %v1884_v19, %v1887_v43 }
0x1442   :  { %v2350_v28 = vpop.eup %2349  ;;  %v1889_v41 = vmul.f32 1.442695, %v1888_v39 }
0x1443   :  { %v1818_v29 = vsel %vm666_vm14, %v2350_v28, 0.0 }
0x1444   :  { %1819 = vadd.xlane.f32.xlu0 %v1818_v29 }
0x1447   :  { %v1825_v30 = vpop.permute.xlu2 %1824 }
0x1448   :  { %1845 = vmatpush.msra.mxu1 %v1825_v30 }
0x1458   :  { %1960 = vrot.lane.b32.xlu0 %v1720_v1, %s2373_s0 }
0x145a   :  { %v1950_v32 = vpop.xlane.xlu0 %1949 }
0x145b   :  { %v1951_v33 = vsub.f32 %v1947_v23, %v1950_v32 }
0x145d   :  { %v1952_v35 = vmul.f32 1.442695, %v1951_v33 }
0x145f   :  { %2351 = vpow2.f32 %v1952_v35 }
0x1460   :  { %2353 = vpow2.f32 %v1753_v36 }
0x1461   :  { %2355 = vpow2.f32 %v1889_v41 }
0x1465   :  { %v2352_v37 = vpop.eup %2351 }
0x1466   :  { %v1954_v40 = vsel %vm666_vm14, %v2352_v37, 0.0  ;;  %v2354_v42 = vpop.eup %2353 }
0x1467   :  { %1955 = vadd.xlane.f32.xlu1 %v1954_v40  ;;  %v1755_v44 = vsel %vm666_vm14, %v2354_v42, 0.0  ;;  %v2356_v45 = vpop.eup %2355 }
0x1468   :  { %v1891_v46 = vsel %vm666_vm14, %v2356_v45, 0.0 }
0x146f   :  { %1756 = vadd.xlane.f32.xlu1 %v1755_v44  ;;  %v2277_v44 = vld [vmem:[%s3088_s9 + $0x4] ss:$0 sm:$0xff] }
0x1477   :  { %1892 = vadd.xlane.f32.xlu1 %v1891_v46 }
0x14b7   :  { %v1820_v47 = vpop.xlane.xlu0 %1819 }
0x14b8   :  { %2357 = vrcp.f32 %v1820_v47 }
0x14be   :  { %v2358_v48 = vpop.eup %2357 }
0x14bf   :  { %v1822_v49 = vmul.f32 %v2358_v48, %v2350_v28 }
0x14c1   :  { %2235 = vmatmul.msk.f32.vlgmr.msra.gmra.mxu1 %vm678_vm15, %v1822_v49 }
0x14ca   :  { %v1961_v50 = vpop.permute.xlu0 %1960 }
0x14cb   :  { %1981 = vmatpush.msrb.mxu1 %v1961_v50 }
0x14da   :  { %v1956_v51 = vpop.xlane.xlu1 %1955 }
0x14db   :  { %2359 = vrcp.f32 %v1956_v51 }
0x14e1   :  { %v2360_v52 = vpop.eup %2359 }
0x14e2   :  { %v1958_v53 = vmul.f32 %v2360_v52, %v2352_v37  ;;  %v1757_v54 = vpop.xlane.xlu1 %1756 }
0x14e3   :  { %2361 = vrcp.f32 %v1757_v54 }
0x14e4   :  { %2241 = vmatmul.msk.f32.vlgmr.msrb.gmra.mxu1 %vm678_vm15, %v1958_v53 }
0x14e9   :  { %v2362_v55 = vpop.eup %2361 }
0x14ea   :  { %v1759_v56 = vmul.f32 %v2362_v55, %v2354_v42  ;;  %v1893_v10 = vpop.xlane.xlu1 %1892 }
0x14eb   :  { %2363 = vrcp.f32 %v1893_v10 }
0x14ec   :  { %2232 = vmatmul.msk.f32.vlgmr.msra.gmra.mxu3 %vm678_vm15, %v1759_v56 }
0x14f1   :  { %v2364_v18 = vpop.eup %2363 }
0x14f2   :  { %v1895_v57 = vmul.f32 %v2364_v18, %v2356_v45 }
0x14f4   :  { %2238 = vmatmul.msk.f32.vlgmr.msrb.gmra.mxu3 %vm678_vm15, %v1895_v57 }
0x153e   :  { %v1847_v58 = vpop.f32.mrf.mxu1 }
0x153f   :  { %1851 = vrot.lane.b32.xlu0 %v1847_v58, %s2374_s19 }
0x1561   :  { %v1983_v9 = vpop.f32.mrf.mxu1 }
0x1562   :  { %1987 = vrot.lane.b32.xlu1 %v1983_v9, %s2374_s19 }
0x156f   :  { %v1780_v63 = vpop.f32.mrf.mxu3 }
0x1577   :  { %v1916_v0 = vpop.f32.mrf.mxu3 }
0x15b1   :  { %v1852_v1 = vpop.permute.xlu0 %1851 }
0x15b2   :  { %v1854_v6 = vsel %vm144_vm1, %v1780_v63, %v1852_v1 }
0x15d4   :  { %v1988_v2 = vpop.permute.xlu1 %1987 }
0x15d5   :  { %v1990_v3 = vsel %vm144_vm1, %v1916_v0, %v1988_v2 }
0x15d6   :  { %v1992_v5 = vrot.slane %v1990_v3, 1 }
0x15d8   :  { %v1994_v7 = vsel %vm188_vm4, %v1854_v6, %v1992_v5 }
0x15d9   :  { %2246 = vmatmul.msk.f32.vlgmr.msra.gmra.mxu2 %vm54_vm0, %v1994_v7 }
0x15e1   :  { %2247 = vmatmul.msk.f32.gmra.mxu2 %vm54_vm0, %v1992_v5 }
0x165c   :  { %v2024_v12 = vpop.f32.mrf.mxu2 }
0x165d   :  { %v2025_v13 = vadd.f32 %v2276_v11, %v2024_v12 }
0x165f   :  { %v2030_v14 = vadd.f32 %v2025_v13, %v2836_v21 }
0x1661   :  { %v2034_v16 = vsel %vm54_vm0, %v2030_v14, 0.0 }
0x1662   :  { %2035 = vadd.xlane.f32.xlu2 %v2034_v16 }
0x1664   :  { %v2027_v4 = vpop.f32.mrf.mxu2 }
0x1665   :  { %v2028_v15 = vadd.f32 %v2276_v11, %v2027_v4 }
0x1667   :  { %v2031_v17 = vadd.f32 %v2028_v15, %v2843_v25 }
0x1669   :  { %v2037_v19 = vsel %vm476_vm6, %v2031_v17, 0.0 }
0x166a   :  { %2038 = vadd.xlane.f32.xlu0 %v2037_v19 }
0x16d5   :  { %v2036_v20 = vpop.xlane.xlu2 %2035 }
0x16d6   :  { %v2040_v22 = vmul.f32 %v2036_v20, %v2567_v8 }
0x16d8   :  { %v2042_v23 = vsub.f32 %v2030_v14, %v2040_v22 }
0x16da   :  { %v2044_v24 = vmul.f32 %v2042_v23, %v2042_v23 }
0x16dc   :  { %v2046_v38 = vsel %vm54_vm0, %v2044_v24, 0.0 }
0x16dd   :  { %v2039_v26 = vpop.xlane.xlu0 %2038  ;;  %2047 = vadd.xlane.f32.xlu1 %v2046_v38 }
0x16de   :  { %v2041_v21 = vmul.f32 %v2039_v26, %v2567_v8 }
0x16e0   :  { %v2043_v27 = vsub.f32 %v2031_v17, %v2041_v21 }
0x16e2   :  { %v2045_v43 = vmul.f32 %v2043_v27, %v2043_v27 }
0x16e4   :  { %v2049_v28 = vsel %vm476_vm6, %v2045_v43, 0.0 }
0x16e5   :  { %2050 = vadd.xlane.f32.xlu2 %v2049_v28 }
0x1750   :  { %v2048_v25 = vpop.xlane.xlu1 %2047 }
0x1751   :  { %v2052_v29 = vmul.f32 %v2048_v25, %v2567_v8 }
0x1753   :  { %v2054_v30 = vadd.f32 1e-05, %v2052_v29 }
0x1755   :  { %2365 = vrsqrt.f32 %v2054_v30  ;;  %vm2062_vm2 = vweird.f32 %v2054_v30 }
0x1758   :  { %v2051_v31 = vpop.xlane.xlu2 %2050 }
0x1759   :  { %v2053_v32 = vmul.f32 %v2051_v31, %v2567_v8  ;;  %v2278_v8 = vld [vmem:[%s3089_s10 + $0x4] ss:$0 sm:$0xff] }
0x175b   :  { %v2366_v33 = vpop.eup %2365  ;;  %v2055_v34 = vadd.f32 1e-05, %v2053_v32 }
0x175c   :  { %v2057_v35 = vmul.f32 %v2366_v33, %v2054_v30  ;;  %vm2063_vm1 = vweird.f32 %v2366_v33 }
0x175d   :  { %2367 = vrsqrt.f32 %v2055_v34  ;;  %vm2064_vm4 = vmor %vm2062_vm2, %vm2063_vm1  ;;  %vm2072_vm15 = vweird.f32 %v2055_v34 }
0x175e   :  { %v2058_v36 = vmul.f32 %v2366_v33, %v2057_v35 }
0x1760   :  { %v2059_v37 = vmul.f32 0.5, %v2058_v36 }
0x1762   :  { %v2060_v39 = vsub.f32 1.5, %v2059_v37 }
0x1763   :  { %v2368_v40 = vpop.eup %2367 }
0x1764   :  { %v2061_v41 = vmul.f32 %v2366_v33, %v2060_v39  ;;  %v2067_v42 = vmul.f32 %v2368_v40, %v2055_v34  ;;  %vm2073_vm14 = vweird.f32 %v2368_v40 }
0x1765   :  { %vm2074_vm8 = vmor %vm2072_vm15, %vm2073_vm14 }
0x1766   :  { %v2065_v45 = vsel %vm2064_vm4, %v2366_v33, %v2061_v41  ;;  %v2068_v46 = vmul.f32 %v2368_v40, %v2067_v42 }
0x1767   :  { %v2076_v47 = vmul.f32 %v2065_v45, %v2042_v23 }
0x1768   :  { %v2069_v48 = vmul.f32 0.5, %v2068_v46 }
0x1769   :  { %v2079_v49 = vmul.f32 %v2277_v44, %v2076_v47 }
0x176a   :  { %v2070_v50 = vsub.f32 1.5, %v2069_v48 }
0x176b   :  { %v2082_v51 = vadd.f32 %v2278_v8, %v2079_v49 }
0x176c   :  { %v2071_v52 = vmul.f32 %v2368_v40, %v2070_v50 }
0x176d   :  { %2084 = vst.msk [vmem:[%s3097_s11] sm:$0xff] %vm54_vm0, %v2082_v51 }
0x176e   :  { %v2075_v53 = vsel %vm2074_vm8, %v2368_v40, %v2071_v52 }
0x176f   :  { %v2077_v54 = vmul.f32 %v2075_v53, %v2043_v27 }
0x1771   :  { %v2080_v55 = vmul.f32 %v2277_v44, %v2077_v54 }
0x1773   :  { %v2083_v56 = vadd.f32 %v2278_v8, %v2080_v55 }
0x1775   :  { %2085 = vst.msk [vmem:[%s3097_s11 + $0x8] sm:$0x3f] %vm476_vm6, %v2083_v56 }

</bundles_post_ra>
